<compile_context>
chip_gen: v7x
topology: tpu7x:2x2x1
jax: 0.10.0
libtpu: 0.0.40
codegen_flags: <defaults>
</compile_context>

<pallas_src>
import numpy as np
import jax
import jax.numpy as jnp
from jax.experimental import pallas as pl
from jax.experimental.pallas import tpu as pltpu

EPS = 1e-5


def init_params(key, channel):
    keys = jax.random.split(key, 17)
    r = lambda k, shape, s=0.1: jax.random.normal(k, shape, jnp.float32) * s
    p = {}
    p['conv1_w'] = r(keys[0], (64, channel));   p['conv1_b'] = r(keys[1], (64,), 0.05)
    p['conv2_w'] = r(keys[2], (128, 64));       p['conv2_b'] = r(keys[3], (128,), 0.05)
    p['conv3_w'] = r(keys[4], (1024, 128));     p['conv3_b'] = r(keys[5], (1024,), 0.05)
    p['fc1_w']   = r(keys[6], (512, 1024));     p['fc1_b']   = r(keys[7], (512,), 0.05)
    p['fc2_w']   = r(keys[8], (256, 512));      p['fc2_b']   = r(keys[9], (256,), 0.05)
    p['fc3_w']   = r(keys[10], (4, 256));       p['fc3_b']   = r(keys[11], (4,), 0.05)
    # BatchNorm params, inference mode (running mean/var).
    for i, (name, c) in enumerate([('bn1', 64), ('bn2', 128), ('bn3', 1024),
                                   ('bn4', 512), ('bn5', 256)]):
        ks = jax.random.split(keys[12 + i], 4)
        p[f'{name}_g'] = 1.0 + r(ks[0], (c,), 0.1)
        p[f'{name}_b'] = r(ks[1], (c,), 0.1)
        p[f'{name}_m'] = r(ks[2], (c,), 0.1)
        p[f'{name}_v'] = 1.0 + jnp.abs(r(ks[3], (c,), 0.1))
    return p


def stn3d_forward(x, p, *, dtype=jnp.float32):
    """x: (B, C, N) float32 (PyTorch NCW).  Returns (B, 2, 2)."""
    B, C, N = x.shape
    f32 = jnp.float32

    # ---- fold eval-mode BatchNorm into the preceding conv / linear weights -------------
    def fold(W, b, g, beta, m, v):
        s = g / jnp.sqrt(v + EPS)                                      # (out,)
        return W.T * s[None, :], ((b - m) * s + beta)[None, :]         # (in,out), (1,out)

    w1, b1   = fold(p['conv1_w'], p['conv1_b'], p['bn1_g'], p['bn1_b'], p['bn1_m'], p['bn1_v'])
    w2, b2   = fold(p['conv2_w'], p['conv2_b'], p['bn2_g'], p['bn2_b'], p['bn2_m'], p['bn2_v'])
    w3, b3   = fold(p['conv3_w'], p['conv3_b'], p['bn3_g'], p['bn3_b'], p['bn3_m'], p['bn3_v'])
    wf1, bf1 = fold(p['fc1_w'],  p['fc1_b'],  p['bn4_g'], p['bn4_b'], p['bn4_m'], p['bn4_v'])
    wf2, bf2 = fold(p['fc2_w'],  p['fc2_b'],  p['bn5_g'], p['bn5_b'], p['bn5_m'], p['bn5_v'])

    # fc3: identity folded into bias, lane-padded to 128 outputs for a lane-dense store.
    iden = jnp.array([1.0, 0.0, 0.0, 1.0], f32)
    wf3 = jnp.zeros((256, 128), f32).at[:, :4].set(p['fc3_w'].T)
    bf3 = jnp.zeros((1, 128), f32).at[0, :4].set(p['fc3_b'] + iden)

    # Big matmul weights optionally in bf16 (MXU bf16 path); w1 (K=C tiny) and all biases
    # stay f32 so elementwise math / accumulation are f32.
    w2, w3, wf1, wf2, wf3 = (a.astype(dtype) for a in (w2, w3, wf1, wf2, wf3))

    # ---- tile selection -----------------------------------------------------------------
    def rup(a, m):
        return -(-a // m) * m

    NT_CAP = 256                                  # multiple of 128; caps the 1024-wide activation
    n8 = rup(N, 8)
    Nt = n8 if n8 <= NT_CAP else NT_CAP
    N_pad = rup(N, Nt)

    if B >= 16:
        Bb = 8
    elif B >= 4:
        Bb = (B + 1) // 2                         # keep >= 2 batch grid steps (v7x: 2 TCs)
    else:
        Bb = 1
    B_pad = rup(B, Bb)

    GB, GN = B_pad // Bb, N_pad // Nt

    xp = x
    if (B_pad, N_pad) != (B, N):
        xp = jnp.pad(x, ((0, B_pad - B), (0, 0), (0, N_pad - N)))

    # ---- kernel ---------------------------------------------------------------------------
    def kernel(x_ref, w1_ref, b1_ref, w2_ref, b2_ref, w3_ref, b3_ref,
               wf1_ref, bf1_ref, wf2_ref, bf2_ref, wf3_ref, bf3_ref,
               out_ref, max_ref):
        ni = pl.program_id(1)

        @pl.when(ni == 0)
        def _init():
            max_ref[...] = jnp.full(max_ref.shape, -jnp.inf, jnp.float32)

        w1 = w1_ref[...]                                              # (C, 64) f32
        b1 = b1_ref[...]                                              # (1, 64) f32

        # conv1 + bn1 + relu, per batch element of the block.  x stays channels-first;
        # the transpose is folded into dot_general (contract dim 0 of both operands):
        # (C, Nt)^T @ (C, 64) -> (Nt, 64), channels-last.
        dn = (((0,), (0,)), ((), ()))
        parts = []
        for b in range(Bb):                                           # static unroll, Bb <= 8
            hb = jax.lax.dot_general(x_ref[b], w1, dn,
                                     preferred_element_type=jnp.float32)
            parts.append(jnp.maximum(hb + b1, 0.0))                   # (Nt, 64)
        h1 = jnp.concatenate(parts, axis=0) if Bb > 1 else parts[0]   # (Bb*Nt, 64)

        # conv2 / conv3 (+ bn + relu) as single big matmuls over all Bb*Nt points.
        h2 = jnp.maximum(
            jnp.dot(h1.astype(w2_ref.dtype), w2_ref[...],
                    preferred_element_type=jnp.float32) + b2_ref[...], 0.0)
        h3 = jnp.maximum(
            jnp.dot(h2.astype(w3_ref.dtype), w3_ref[...],
                    preferred_element_type=jnp.float32) + b3_ref[...], 0.0)   # (Bb*Nt, 1024)

        # torch.max(x, 2): running max over point chunks (mask out padded points).
        if N_pad != N:
            idx = jax.lax.broadcasted_iota(jnp.int32, (Nt, 1), 0) + ni * Nt
            valid = idx < N
        for b in range(Bb):
            hb = h3[b * Nt:(b + 1) * Nt, :]
            if N_pad != N:
                hb = jnp.where(valid, hb, -jnp.inf)
            cm = jnp.max(hb, axis=0, keepdims=True)                   # (1, 1024)
            max_ref[b:b + 1, :] = jnp.maximum(max_ref[b:b + 1, :], cm)

        # FC head, once per batch block (after the last point chunk).
        @pl.when(ni == pl.num_programs(1) - 1)
        def _head():
            pooled = max_ref[...]                                     # (Bb, 1024) f32
            f1 = jnp.maximum(
                jnp.dot(pooled.astype(wf1_ref.dtype), wf1_ref[...],
                        preferred_element_type=jnp.float32) + bf1_ref[...], 0.0)
            f2 = jnp.maximum(
                jnp.dot(f1.astype(wf2_ref.dtype), wf2_ref[...],
                        preferred_element_type=jnp.float32) + bf2_ref[...], 0.0)
            out = jnp.dot(f2.astype(wf3_ref.dtype), wf3_ref[...],
                          preferred_element_type=jnp.float32) + bf3_ref[...]
            out_ref[0] = out                                          # (Bb, 128) lane-dense

    # ---- pallas_call ------------------------------------------------------------------------
    weights = [w1, b1, w2, b2, w3, b3, wf1, bf1, wf2, bf2, wf3, bf3]

    def wspec(a):  # grid-invariant weight/bias blocks
        nd = a.ndim
        return pl.BlockSpec(a.shape, lambda bi, ni, nd=nd: (0,) * nd)

    out = pl.pallas_call(
        kernel,
        out_shape=jax.ShapeDtypeStruct((GB, Bb, 128), jnp.float32),
        grid_spec=pltpu.PrefetchScalarGridSpec(
            num_scalar_prefetch=0,
            grid=(GB, GN),
            in_specs=[pl.BlockSpec((Bb, C, Nt), lambda bi, ni: (bi, 0, ni))]
                     + [wspec(a) for a in weights],
            out_specs=pl.BlockSpec((1, Bb, 128), lambda bi, ni: (bi, 0, 0)),
            scratch_shapes=[pltpu.VMEM((Bb, 1024), jnp.float32)],
        ),
        compiler_params=pltpu.CompilerParams(
            dimension_semantics=("parallel", "arbitrary"),
            vmem_limit_bytes=32 * 1024 * 1024),
    )(xp, *weights)

    return out.reshape(B_pad, 128)[:B, :4].reshape(B, 2, 2)           # x.view(-1, 2, 2)


def reference(x, p):
    # Pure-JAX replica of the PyTorch forward (eval-mode BN) for verification.
    def bn_c(y, g, b, m, v):
        return (y - m[None, :, None]) / jnp.sqrt(v[None, :, None] + EPS) \
               * g[None, :, None] + b[None, :, None]

    def bn_f(y, g, b, m, v):
        return (y - m[None, :]) / jnp.sqrt(v[None, :] + EPS) * g[None, :] + b[None, :]

    y = jnp.einsum('oc,bcn->bon', p['conv1_w'], x) + p['conv1_b'][None, :, None]
    y = jnp.maximum(bn_c(y, p['bn1_g'], p['bn1_b'], p['bn1_m'], p['bn1_v']), 0.0)
    y = jnp.einsum('oc,bcn->bon', p['conv2_w'], y) + p['conv2_b'][None, :, None]
    y = jnp.maximum(bn_c(y, p['bn2_g'], p['bn2_b'], p['bn2_m'], p['bn2_v']), 0.0)
    y = jnp.einsum('oc,bcn->bon', p['conv3_w'], y) + p['conv3_b'][None, :, None]
    y = jnp.maximum(bn_c(y, p['bn3_g'], p['bn3_b'], p['bn3_m'], p['bn3_v']), 0.0)
    y = jnp.max(y, axis=2)                                           # (B, 1024)
    y = y @ p['fc1_w'].T + p['fc1_b'][None, :]
    y = jnp.maximum(bn_f(y, p['bn4_g'], p['bn4_b'], p['bn4_m'], p['bn4_v']), 0.0)
    y = y @ p['fc2_w'].T + p['fc2_b'][None, :]
    y = jnp.maximum(bn_f(y, p['bn5_g'], p['bn5_b'], p['bn5_m'], p['bn5_v']), 0.0)
    y = y @ p['fc3_w'].T + p['fc3_b'][None, :]
    y = y + jnp.array([1.0, 0.0, 0.0, 1.0], jnp.float32)[None, :]
    return y.reshape(-1, 2, 2)


if __name__ == "__main__":
    key = jax.random.PRNGKey(0)
    kx, kp, kx2 = jax.random.split(key, 3)

    # Config 1: tiny smoke test (f32 path, tight check).
    B, C, N = 2, 3, 16
    x = jax.random.normal(kx, (B, C, N), jnp.float32)
    params = init_params(kp, C)

    out = jax.block_until_ready(stn3d_forward(x, params))
    assert out.shape == (B, 2, 2)
    ref = reference(x, params)
    np.testing.assert_allclose(np.asarray(out), np.asarray(ref), rtol=1e-4, atol=1e-4)

    # Config 2: exercises batch blocking (Bb=3), batch padding, point padding + masking,
    # and the bf16 weight path (loose tolerance: weights/activations are bf16-rounded).
    B2, N2 = 5, 20
    x2 = jax.random.normal(kx2, (B2, C, N2), jnp.float32)
    out2 = jax.block_until_ready(stn3d_forward(x2, params, dtype=jnp.bfloat16))
    assert out2.shape == (B2, 2, 2)
    ref2 = reference(x2, params)
    np.testing.assert_allclose(np.asarray(out2), np.asarray(ref2), rtol=1e-1, atol=1e-1)

    print("KERNEL_OK")
</pallas_src>

<mosaic_0001>
module attributes {stable_mosaic.version = 11 : i64} {
  func.func @kernel(%arg0: i32, %arg1: i32, %arg2: memref<1x3x16xf32, #tpu.memory_space<vmem>>, %arg3: memref<3x64xf32, #tpu.memory_space<vmem>>, %arg4: memref<1x64xf32, #tpu.memory_space<vmem>>, %arg5: memref<64x128xf32, #tpu.memory_space<vmem>>, %arg6: memref<1x128xf32, #tpu.memory_space<vmem>>, %arg7: memref<128x1024xf32, #tpu.memory_space<vmem>>, %arg8: memref<1x1024xf32, #tpu.memory_space<vmem>>, %arg9: memref<1024x512xf32, #tpu.memory_space<vmem>>, %arg10: memref<1x512xf32, #tpu.memory_space<vmem>>, %arg11: memref<512x256xf32, #tpu.memory_space<vmem>>, %arg12: memref<1x256xf32, #tpu.memory_space<vmem>>, %arg13: memref<256x128xf32, #tpu.memory_space<vmem>>, %arg14: memref<1x128xf32, #tpu.memory_space<vmem>>, %arg15: memref<1x1x128xf32, #tpu.memory_space<vmem>>, %arg16: memref<1x1024xf32, #tpu.memory_space<vmem>>) attributes {dimension_semantics = [#tpu.dimension_semantics<parallel>, #tpu.dimension_semantics<arbitrary>], iteration_bounds = array<i64: 2, 1>, scalar_prefetch = 0 : i64, scratch_operands = 1 : i64, tpu.core_type = #tpu.core_type<tc>, window_params = [{transform_indices = @transform_0, window_bounds = array<i64: 1, 3, 16>}, {pipeline_mode = #tpu.pipeline_mode<synchronous>, transform_indices = @transform_1, window_bounds = array<i64: 3, 64>}, {pipeline_mode = #tpu.pipeline_mode<synchronous>, transform_indices = @transform_2, window_bounds = array<i64: 1, 64>}, {pipeline_mode = #tpu.pipeline_mode<synchronous>, transform_indices = @transform_3, window_bounds = array<i64: 64, 128>}, {pipeline_mode = #tpu.pipeline_mode<synchronous>, transform_indices = @transform_4, window_bounds = array<i64: 1, 128>}, {pipeline_mode = #tpu.pipeline_mode<synchronous>, transform_indices = @transform_5, window_bounds = array<i64: 128, 1024>}, {pipeline_mode = #tpu.pipeline_mode<synchronous>, transform_indices = @transform_6, window_bounds = array<i64: 1, 1024>}, {pipeline_mode = #tpu.pipeline_mode<synchronous>, transform_indices = @transform_7, window_bounds = array<i64: 1024, 512>}, {pipeline_mode = #tpu.pipeline_mode<synchronous>, transform_indices = @transform_8, window_bounds = array<i64: 1, 512>}, {pipeline_mode = #tpu.pipeline_mode<synchronous>, transform_indices = @transform_9, window_bounds = array<i64: 512, 256>}, {pipeline_mode = #tpu.pipeline_mode<synchronous>, transform_indices = @transform_10, window_bounds = array<i64: 1, 256>}, {pipeline_mode = #tpu.pipeline_mode<synchronous>, transform_indices = @transform_11, window_bounds = array<i64: 256, 128>}, {pipeline_mode = #tpu.pipeline_mode<synchronous>, transform_indices = @transform_12, window_bounds = array<i64: 1, 128>}, {transform_indices = @transform_13, window_bounds = array<i64: 1, 1, 128>}]} {
    %c0_i32 = arith.constant 0 : i32
    %0 = arith.cmpi eq, %arg1, %c0_i32 : i32
    %1 = arith.extui %0 : i1 to i32
    %c0_i32_0 = arith.constant 0 : i32
    %2 = arith.cmpi ne, %1, %c0_i32_0 : i32
    scf.if %2 {
      %cst_27 = arith.constant 0xFF800000 : f32
      %34 = vector.broadcast %cst_27 : f32 to vector<1x1024xf32>
      %c0_28 = arith.constant 0 : index
      %c0_29 = arith.constant 0 : index
      %35 = vector.load %arg16[%c0_28, %c0_29] : memref<1x1024xf32, #tpu.memory_space<vmem>>, vector<1x1024xf32>
      tpu.vector_store %arg16[%c0_28, %c0_29], %34 {strides = array<i32>} : memref<1x1024xf32, #tpu.memory_space<vmem>>, vector<1x1024xf32>,
    } else {
    }
    %c0 = arith.constant 0 : index
    %c0_1 = arith.constant 0 : index
    %3 = vector.load %arg3[%c0, %c0_1] : memref<3x64xf32, #tpu.memory_space<vmem>>, vector<3x64xf32>
    %c0_2 = arith.constant 0 : index
    %c0_3 = arith.constant 0 : index
    %4 = vector.load %arg4[%c0_2, %c0_3] : memref<1x64xf32, #tpu.memory_space<vmem>>, vector<1x64xf32>
    %c0_4 = arith.constant 0 : index
    %c0_5 = arith.constant 0 : index
    %c0_6 = arith.constant 0 : index
    %5 = vector.load %arg2[%c0_4, %c0_5, %c0_6] : memref<1x3x16xf32, #tpu.memory_space<vmem>>, vector<1x3x16xf32>
    %6 = vector.shape_cast %5 : vector<1x3x16xf32> to vector<3x16xf32>
    %cst = arith.constant dense<0.000000e+00> : vector<16x64xf32>
    %7 = tpu.matmul %6, %3, %cst {dimension_numbers = #tpu.dot_dimension_numbers<[0], [0], [1], [1], [0, 1, 1, 1], [], []>} : vector<3x16xf32>, vector<3x64xf32>, vector<16x64xf32> -> vector<16x64xf32>
    %8 = vector.broadcast %4 : vector<1x64xf32> to vector<16x64xf32>
    %9 = arith.addf %7, %8 : vector<16x64xf32>
    %cst_7 = arith.constant 0.000000e+00 : f32
    %10 = vector.broadcast %cst_7 : f32 to vector<16x64xf32>
    %11 = arith.maximumf %9, %10 : vector<16x64xf32>
    %c0_8 = arith.constant 0 : index
    %c0_9 = arith.constant 0 : index
    %12 = vector.load %arg5[%c0_8, %c0_9] : memref<64x128xf32, #tpu.memory_space<vmem>>, vector<64x128xf32>
    %cst_10 = arith.constant dense<0.000000e+00> : vector<16x128xf32>
    %13 = tpu.matmul %11, %12, %cst_10 {dimension_numbers = #tpu.dot_dimension_numbers<[1], [0], [0], [1], [0, 0, 1, 1], [], []>} : vector<16x64xf32>, vector<64x128xf32>, vector<16x128xf32> -> vector<16x128xf32>
    %c0_11 = arith.constant 0 : index
    %c0_12 = arith.constant 0 : index
    %14 = vector.load %arg6[%c0_11, %c0_12] : memref<1x128xf32, #tpu.memory_space<vmem>>, vector<1x128xf32>
    %15 = vector.broadcast %14 : vector<1x128xf32> to vector<16x128xf32>
    %16 = arith.addf %13, %15 : vector<16x128xf32>
    %cst_13 = arith.constant 0.000000e+00 : f32
    %17 = vector.broadcast %cst_13 : f32 to vector<16x128xf32>
    %18 = arith.maximumf %16, %17 : vector<16x128xf32>
    %c0_14 = arith.constant 0 : index
    %c0_15 = arith.constant 0 : index
    %19 = vector.load %arg7[%c0_14, %c0_15] : memref<128x1024xf32, #tpu.memory_space<vmem>>, vector<128x1024xf32>
    %cst_16 = arith.constant dense<0.000000e+00> : vector<16x1024xf32>
    %20 = tpu.matmul %18, %19, %cst_16 {dimension_numbers = #tpu.dot_dimension_numbers<[1], [0], [0], [1], [0, 0, 1, 1], [], []>} : vector<16x128xf32>, vector<128x1024xf32>, vector<16x1024xf32> -> vector<16x1024xf32>
    %c0_17 = arith.constant 0 : index
    %c0_18 = arith.constant 0 : index
    %21 = vector.load %arg8[%c0_17, %c0_18] : memref<1x1024xf32, #tpu.memory_space<vmem>>, vector<1x1024xf32>
    %22 = vector.broadcast %21 : vector<1x1024xf32> to vector<16x1024xf32>
    %23 = arith.addf %20, %22 : vector<16x1024xf32>
    %cst_19 = arith.constant 0.000000e+00 : f32
    %24 = vector.broadcast %cst_19 : f32 to vector<16x1024xf32>
    %25 = arith.maximumf %23, %24 : vector<16x1024xf32>
    %cst_20 = arith.constant dense<0xFF800000> : vector<1024xf32>
    %26 = vector.multi_reduction <maximumf>, %25, %cst_20 [0] : vector<16x1024xf32> to vector<1024xf32>
    %27 = vector.shape_cast %26 : vector<1024xf32> to vector<1x1024xf32>
    %c0_21 = arith.constant 0 : index
    %c0_22 = arith.constant 0 : index
    %28 = vector.load %arg16[%c0_21, %c0_22] : memref<1x1024xf32, #tpu.memory_space<vmem>>, vector<1x1024xf32>
    %29 = arith.maximumf %28, %27 : vector<1x1024xf32>
    %c0_23 = arith.constant 0 : index
    %c0_24 = arith.constant 0 : index
    %30 = vector.load %arg16[%c0_23, %c0_24] : memref<1x1024xf32, #tpu.memory_space<vmem>>, vector<1x1024xf32>
    tpu.vector_store %arg16[%c0_23, %c0_24], %29 {strides = array<i32>} : memref<1x1024xf32, #tpu.memory_space<vmem>>, vector<1x1024xf32>,
    %c0_i32_25 = arith.constant 0 : i32
    %31 = arith.cmpi eq, %arg1, %c0_i32_25 : i32
    %32 = arith.extui %31 : i1 to i32
    %c0_i32_26 = arith.constant 0 : i32
    %33 = arith.cmpi ne, %32, %c0_i32_26 : i32
    scf.if %33 {
      %c0_27 = arith.constant 0 : index
      %c0_28 = arith.constant 0 : index
      %34 = vector.load %arg16[%c0_27, %c0_28] : memref<1x1024xf32, #tpu.memory_space<vmem>>, vector<1x1024xf32>
      %c0_29 = arith.constant 0 : index
      %c0_30 = arith.constant 0 : index
      %35 = vector.load %arg9[%c0_29, %c0_30] : memref<1024x512xf32, #tpu.memory_space<vmem>>, vector<1024x512xf32>
      %cst_31 = arith.constant dense<0.000000e+00> : vector<1x512xf32>
      %36 = tpu.matmul %34, %35, %cst_31 {dimension_numbers = #tpu.dot_dimension_numbers<[1], [0], [0], [1], [0, 0, 1, 1], [], []>} : vector<1x1024xf32>, vector<1024x512xf32>, vector<1x512xf32> -> vector<1x512xf32>
      %c0_32 = arith.constant 0 : index
      %c0_33 = arith.constant 0 : index
      %37 = vector.load %arg10[%c0_32, %c0_33] : memref<1x512xf32, #tpu.memory_space<vmem>>, vector<1x512xf32>
      %38 = arith.addf %36, %37 : vector<1x512xf32>
      %cst_34 = arith.constant 0.000000e+00 : f32
      %39 = vector.broadcast %cst_34 : f32 to vector<1x512xf32>
      %40 = arith.maximumf %38, %39 : vector<1x512xf32>
      %c0_35 = arith.constant 0 : index
      %c0_36 = arith.constant 0 : index
      %41 = vector.load %arg11[%c0_35, %c0_36] : memref<512x256xf32, #tpu.memory_space<vmem>>, vector<512x256xf32>
      %cst_37 = arith.constant dense<0.000000e+00> : vector<1x256xf32>
      %42 = tpu.matmul %40, %41, %cst_37 {dimension_numbers = #tpu.dot_dimension_numbers<[1], [0], [0], [1], [0, 0, 1, 1], [], []>} : vector<1x512xf32>, vector<512x256xf32>, vector<1x256xf32> -> vector<1x256xf32>
      %c0_38 = arith.constant 0 : index
      %c0_39 = arith.constant 0 : index
      %43 = vector.load %arg12[%c0_38, %c0_39] : memref<1x256xf32, #tpu.memory_space<vmem>>, vector<1x256xf32>
      %44 = arith.addf %42, %43 : vector<1x256xf32>
      %cst_40 = arith.constant 0.000000e+00 : f32
      %45 = vector.broadcast %cst_40 : f32 to vector<1x256xf32>
      %46 = arith.maximumf %44, %45 : vector<1x256xf32>
      %c0_41 = arith.constant 0 : index
      %c0_42 = arith.constant 0 : index
      %47 = vector.load %arg13[%c0_41, %c0_42] : memref<256x128xf32, #tpu.memory_space<vmem>>, vector<256x128xf32>
      %cst_43 = arith.constant dense<0.000000e+00> : vector<1x128xf32>
      %48 = tpu.matmul %46, %47, %cst_43 {dimension_numbers = #tpu.dot_dimension_numbers<[1], [0], [0], [1], [0, 0, 1, 1], [], []>} : vector<1x256xf32>, vector<256x128xf32>, vector<1x128xf32> -> vector<1x128xf32>
      %c0_44 = arith.constant 0 : index
      %c0_45 = arith.constant 0 : index
      %49 = vector.load %arg14[%c0_44, %c0_45] : memref<1x128xf32, #tpu.memory_space<vmem>>, vector<1x128xf32>
      %50 = arith.addf %48, %49 : vector<1x128xf32>
      %c0_46 = arith.constant 0 : index
      %c0_47 = arith.constant 0 : index
      %c0_48 = arith.constant 0 : index
      %51 = vector.load %arg15[%c0_46, %c0_47, %c0_48] : memref<1x1x128xf32, #tpu.memory_space<vmem>>, vector<1x1x128xf32>
      %52 = vector.shape_cast %51 : vector<1x1x128xf32> to vector<1x128xf32>
      %53 = vector.shape_cast %50 : vector<1x128xf32> to vector<1x1x128xf32>
      tpu.vector_store %arg15[%c0_46, %c0_47, %c0_48], %53 {strides = array<i32>} : memref<1x1x128xf32, #tpu.memory_space<vmem>>, vector<1x1x128xf32>,
    } else {
    }
    return
  }
  func.func @transform_0(%arg0: i32, %arg1: i32) -> (i32, i32, i32) {
    %c0_i32 = arith.constant 0 : i32
    %c0_i32_0 = arith.constant 0 : i32
    return %arg0, %c0_i32, %arg1 : i32, i32, i32
  }
  func.func @transform_1(%arg0: i32, %arg1: i32) -> (i32, i32) {
    %c0_i32 = arith.constant 0 : i32
    %c0_i32_0 = arith.constant 0 : i32
    %c0_i32_1 = arith.constant 0 : i32
    return %c0_i32, %c0_i32_0 : i32, i32
  }
  func.func @transform_2(%arg0: i32, %arg1: i32) -> (i32, i32) {
    %c0_i32 = arith.constant 0 : i32
    %c0_i32_0 = arith.constant 0 : i32
    %c0_i32_1 = arith.constant 0 : i32
    return %c0_i32, %c0_i32_0 : i32, i32
  }
  func.func @transform_3(%arg0: i32, %arg1: i32) -> (i32, i32) {
    %c0_i32 = arith.constant 0 : i32
    %c0_i32_0 = arith.constant 0 : i32
    %c0_i32_1 = arith.constant 0 : i32
    return %c0_i32, %c0_i32_0 : i32, i32
  }
  func.func @transform_4(%arg0: i32, %arg1: i32) -> (i32, i32) {
    %c0_i32 = arith.constant 0 : i32
    %c0_i32_0 = arith.constant 0 : i32
    %c0_i32_1 = arith.constant 0 : i32
    return %c0_i32, %c0_i32_0 : i32, i32
  }
  func.func @transform_5(%arg0: i32, %arg1: i32) -> (i32, i32) {
    %c0_i32 = arith.constant 0 : i32
    %c0_i32_0 = arith.constant 0 : i32
    %c0_i32_1 = arith.constant 0 : i32
    return %c0_i32, %c0_i32_0 : i32, i32
  }
  func.func @transform_6(%arg0: i32, %arg1: i32) -> (i32, i32) {
    %c0_i32 = arith.constant 0 : i32
    %c0_i32_0 = arith.constant 0 : i32
    %c0_i32_1 = arith.constant 0 : i32
    return %c0_i32, %c0_i32_0 : i32, i32
  }
  func.func @transform_7(%arg0: i32, %arg1: i32) -> (i32, i32) {
    %c0_i32 = arith.constant 0 : i32
    %c0_i32_0 = arith.constant 0 : i32
    %c0_i32_1 = arith.constant 0 : i32
    return %c0_i32, %c0_i32_0 : i32, i32
  }
  func.func @transform_8(%arg0: i32, %arg1: i32) -> (i32, i32) {
    %c0_i32 = arith.constant 0 : i32
    %c0_i32_0 = arith.constant 0 : i32
    %c0_i32_1 = arith.constant 0 : i32
    return %c0_i32, %c0_i32_0 : i32, i32
  }
  func.func @transform_9(%arg0: i32, %arg1: i32) -> (i32, i32) {
    %c0_i32 = arith.constant 0 : i32
    %c0_i32_0 = arith.constant 0 : i32
    %c0_i32_1 = arith.constant 0 : i32
    return %c0_i32, %c0_i32_0 : i32, i32
  }
  func.func @transform_10(%arg0: i32, %arg1: i32) -> (i32, i32) {
    %c0_i32 = arith.constant 0 : i32
    %c0_i32_0 = arith.constant 0 : i32
    %c0_i32_1 = arith.constant 0 : i32
    return %c0_i32, %c0_i32_0 : i32, i32
  }
  func.func @transform_11(%arg0: i32, %arg1: i32) -> (i32, i32) {
    %c0_i32 = arith.constant 0 : i32
    %c0_i32_0 = arith.constant 0 : i32
    %c0_i32_1 = arith.constant 0 : i32
    return %c0_i32, %c0_i32_0 : i32, i32
  }
  func.func @transform_12(%arg0: i32, %arg1: i32) -> (i32, i32) {
    %c0_i32 = arith.constant 0 : i32
    %c0_i32_0 = arith.constant 0 : i32
    %c0_i32_1 = arith.constant 0 : i32
    return %c0_i32, %c0_i32_0 : i32, i32
  }
  func.func @transform_13(%arg0: i32, %arg1: i32) -> (i32, i32, i32) {
    %c0_i32 = arith.constant 0 : i32
    %c0_i32_0 = arith.constant 0 : i32
    %c0_i32_1 = arith.constant 0 : i32
    return %arg0, %c0_i32, %c0_i32_0 : i32, i32, i32
  }
}

</mosaic_0001>

<bundles_post_ra>
// kernel: tpu_custom_call.1
= control target key start
LH: loop header
LB: loop body
LE: loop exit
PB: predicated region body
PF: predicated region fallthrough
CT: control target
= control target key end

     0   :  { %s5380_s0 = inlined_call_operand.vmem [shape: f32[2,3,16], index: 0, kind: input, shape index: {}]   ;;  %s5381_s1 = inlined_call_operand.hbm [shape: f32[3,64], index: 1, kind: input, shape index: {}]   ;;  %s5382_s2 = inlined_call_operand.hbm [shape: f32[1,64], index: 2, kind: input, shape index: {}]   ;;  %s5383_s3 = inlined_call_operand.hbm [shape: f32[64,128], index: 3, kind: input, shape index: {}]   ;;  %s5384_s4 = inlined_call_operand.hbm [shape: f32[1,128], index: 4, kind: input, shape index: {}]   ;;  %s5385_s5 = inlined_call_operand.hbm [shape: f32[128,1024], index: 5, kind: input, shape index: {}]   ;;  %s5386_s6 = inlined_call_operand.hbm [shape: f32[1,1024], index: 6, kind: input, shape index: {}]   ;;  %s5387_s7 = inlined_call_operand.hbm [shape: f32[1024,512], index: 7, kind: input, shape index: {}]   ;;  %s5388_s8 = inlined_call_operand.hbm [shape: f32[1,512], index: 8, kind: input, shape index: {}]   ;;  %s5389_s9 = inlined_call_operand.hbm [shape: f32[512,256], index: 9, kind: input, shape index: {}]   ;;  %s5390_s10 = inlined_call_operand.hbm [shape: f32[1,256], index: 10, kind: input, shape index: {}]   ;;  %s5391_s11 = inlined_call_operand.hbm [shape: f32[256,128], index: 11, kind: input, shape index: {}]   ;;  %s5392_s12 = inlined_call_operand.hbm [shape: f32[1,128], index: 12, kind: input, shape index: {}]   ;;  %s5393_s13 = inlined_call_operand.hbm [shape: f32[2,1,128], index: 13, kind: output, shape index: {}]  }
   0x1   :  { %5410 = sst [smem:[#allocation40_spill]] %s5381_s1 }
   0x2   :  { %5411 = sst [smem:[#allocation41_spill]] %s5382_s2 }
   0x3   :  { %5412 = sst [smem:[#allocation42_spill]] %s5383_s3 }
   0x4   :  { %5413 = sst [smem:[#allocation43_spill]] %s5384_s4 }
   0x5   :  { %5414 = sst [smem:[#allocation44_spill]] %s5393_s13 }
   0x6   :  { %18 = vsyncpa [#allocation4], 0 }
   0x7   :  { %19 = vsyncpa [#allocation7], 0 }
   0x8   :  { %20 = vsyncpa [#allocation10], 0 }
   0x9   :  { %21 = vsyncpa [#allocation13], 0 }
   0xa   :  { %22 = vsyncpa [#allocation16], 0 }
   0xb   :  { %23 = vsyncpa [#allocation19], 0 }
   0xc   :  { %24 = vsyncpa [#allocation22], 0 }
   0xd   :  { %25 = vsyncpa [#allocation5], 0 }
   0xe   :  { %27 = vsyncpa [#allocation5 + $0x1], 0  ;;  %s4869_s25 = smov 0   ;;  %s4871_s26 = smov 0  }
   0xf   :  { %s4873_s27 = smov 0   ;;  %s4875_s28 = smov 0  }
  0x10   :  { %s4877_s29 = smov 0   ;;  %s4879_s30 = smov 0  }
  0x11 LB: > { %5415 = sst [smem:[#allocation32_spill]] %s4754_s25  ;;  %s3198_s14 = sadd.s32 4294967295, %s4774_s30   ;;  %s4774_s30 = sphi %s4879_s30, %s33_s30   ;;  %s4770_s29 = sphi %s4877_s29, %s5448_s29   ;;  %s4766_s28 = sphi %s4875_s28, %s5447_s28   ;;  %s4762_s27 = sphi %s4873_s27, %s5446_s27   ;;  %s4758_s26 = sphi %s4871_s26, %s5450_s26   ;;  %s4754_s25 = sphi %s4869_s25, %s5449_s25  }
  0x12   : > { %5416 = sst [smem:[#allocation33_spill]] %s4762_s27  ;;  %s3199_s15 = sadd.s32 4294967294, %s4774_s30  }
  0x13   : > { %5417 = sst [smem:[#allocation34_spill]] %s4770_s29  ;;  %s45_s16 = sadd.s32 1, %s4770_s29 }
  0x14   : > { %5418 = sst [smem:[#allocation35_spill]] %s4774_s30  ;;  %s332_s17 = sadd.s32 1, %s4762_s27 }
  0x15   : > { %p47_p0 = scmp.ge.s32.totalorder %s45_s16, 2  ;;  %p342_p1 = scmp.ne.s32.totalorder %s4762_s27, %s4758_s26 }
  0x16   : > { %p343_p2 = scmp.eq.s32.totalorder %s3198_s14, 1  ;;  %p348_p3 = scmp.ne.s32.totalorder %s4758_s26, %s4754_s25 }
  0x17   : > { %s5452_s16 = smov (%p47_p0, %s45_s16), 0  ;;  %p349_p5 = scmp.eq.s32.totalorder %s3199_s15, 1 }
  0x18   : > { %5419 = sst [smem:[#allocation36_spill]] %s5452_s16  ;;  %p4909_p4 = por %p343_p2, %p342_p1 }
  0x19   : > { %s329_s19 = ssub.s32 %s4770_s29, %s5452_s16  ;;  %p3200_p6 = scmp.ge.s32.totalorder %s4774_s30, 1 }
  0x1a   : > { %s5420_s18 = scalar_select %p4909_p4, 1, 0 }
  0x1b   : > { %p330_p7 = scmp.eq.s32.totalorder %s329_s19, 0  ;;  %p4916_p8 = por %p349_p5, %p348_p3 }
  0x1c   : > { %5421 = sst [smem:[#allocation37_spill]] %s5420_s18  ;;  %p356_p9 = scmp.lt.s32.totalorder %s4774_s30, 3 }
  0x1d   : > { %s5422_s20 = scalar_select %p4916_p8, 1, 0 }
  0x1e   : > { %s4922_s21 = scalar_select %p330_p7, %s4762_s27, %s332_s17  }
  0x1f   : > { %5423 = sst [smem:[#allocation38_spill]] %s5422_s20  ;;  %p4924_p10 = pnand %p3200_p6, %p356_p9 }
  0x20   : > { %5424 = sst [smem:[#allocation39_spill]] %s4922_s21  ;;  %p4928_p11 = scmp.eq.s32.totalorder %s3198_s14, 0 }
  0x21   : > { %s5425_s22 = scalar_select %p4924_p10, 1, 0 }
  0x22   : > { %s5426_s23 = scalar_select %p4928_p11, 1, 0 }
  0x23   : > { %p4196_p12 = pneg %p4924_p10  ;;  %s4776_s24 = smov [#allocation6]  }
  0x24   : > { %s380_s15 = sshll.u32 %s4776_s24, 4  ;;  %s4777_s19 = smov [#allocation9]   ;;  %s381_s15 = int_to_ptr.vmem [resolvable:$true] %s380_s15 }
  0x25   : > { %s404_s16 = sshll.u32 %s4777_s19, 4  ;;  %p4936_p13 = pnand %p4928_p11, %p4196_p12  ;;  %s4940_s16 = int_to_ptr.vmem [resolvable:$true] %s404_s16 }
  0x26   : > { %s4778_s14 = smov [#allocation12]   ;;  %s5428_s2 = sld [smem:[#allocation41_spill]] }
  0x27   : > { %s4942_s29 = sshll.u32 %s4778_s14, 4  ;;  %p4952_p1 = pneg %p4936_p13  ;;  %s429_s29 = int_to_ptr.vmem [resolvable:$true] %s4942_s29 }
  0x2c   : > { %s4332_s20 = scalar_lea.hbm %s5428_s2, 16 }
  0x2d   : > { %p4333_p0 = scmp.ne.s32.totalorder %s5428_s2, %s4332_s20  ;;  %p4339_p5 = scmp.lt.u32.totalorder %s4332_s20, %s5428_s2 }
  0x2f   : > { %p4335_p2 = pnand %p4952_p1, %p4333_p0 }
  0x31   : > { %p4336_p3 = pneg %p4335_p2 }
  0x33   : > { %p4341_p6 = pnand %p4339_p5, %p4336_p3 }
  0x35   : > { %4344 = shalt.err (!%p4341_p6)
}
  0x36   : > { %s4345_s27 = scalar_lea.vmem %s381_s15, 16  ;;  %s4352_s25 = scalar_lea.vmem %s381_s15, 32 }
  0x37   : > { %p4346_p7 = scmp.ne.s32.totalorder %s381_s15, %s4345_s27  ;;  %p4353_p8 = scmp.lt.s32.totalorder %s381_s15, %s381_s15 }
  0x38   : > { %p4354_p4 = scmp.lt.s32.totalorder %s4352_s25, %s4345_s27 }
  0x39   : > { %p4348_p9 = pnand %p4346_p7, %p4952_p1 }
  0x3a   : > { %p4355_p11 = por %p4354_p4, %p4353_p8 }
  0x3b   : > { %p4349_p12 = pneg %p4348_p9 }
  0x3d   : > { %p4356_p10 = pnand %p4355_p11, %p4349_p12 }
  0x3f   : > { %4359 = shalt.err (!%p4356_p10)
}
  0x40   : > { %4202 = dma.hbm_to_vmem [thread:$0]  (!%p4936_p13), %s5428_s2, 16, %s381_s15, [#allocation7]  }
  0x41   : > { %s5430_s4 = sld [smem:[#allocation43_spill]] }
  0x47   : > { %s4360_s14 = scalar_lea.hbm %s5430_s4, 16 }
  0x48   : > { %p4361_p0 = scmp.ne.s32.totalorder %s5430_s4, %s4360_s14  ;;  %p4367_p8 = scmp.lt.u32.totalorder %s4360_s14, %s5430_s4 }
  0x4a   : > { %p4363_p2 = pnand %p4361_p0, %p4952_p1 }
  0x4c   : > { %p4364_p4 = pneg %p4363_p2 }
  0x4e   : > { %p4369_p10 = pnand %p4367_p8, %p4364_p4 }
  0x50   : > { %4372 = shalt.err (!%p4369_p10)
}
  0x51   : > { %s4373_s15 = scalar_lea.vmem %s4940_s16, 16  ;;  %s4380_s13 = scalar_lea.vmem %s4940_s16, 32 }
  0x52   : > { %p4374_p11 = scmp.ne.s32.totalorder %s4940_s16, %s4373_s15  ;;  %p4381_p6 = scmp.lt.s32.totalorder %s4940_s16, %s4940_s16 }
  0x53   : > { %p4382_p7 = scmp.lt.s32.totalorder %s4380_s13, %s4373_s15 }
  0x54   : > { %p4376_p3 = pnand %p4374_p11, %p4952_p1 }
  0x55   : > { %p4383_p9 = por %p4382_p7, %p4381_p6 }
  0x56   : > { %p4377_p5 = pneg %p4376_p3 }
  0x58   : > { %p4384_p12 = pnand %p4383_p9, %p4377_p5 }
  0x5a   : > { %4387 = shalt.err (!%p4384_p12)
}
  0x5b   : > { %4208 = dma.hbm_to_vmem [thread:$0]  (!%p4936_p13), %s5430_s4, 16, %s4940_s16, [#allocation10]  }
  0x5c   : > { %s4779_s24 = smov [#allocation15]   ;;  %s4388_s27 = scalar_lea.hbm %s5386_s6, 128 }
  0x5d   : > { %s452_s30 = sshll.u32 %s4779_s24, 4  ;;  %p4389_p0 = scmp.ne.s32.totalorder %s5386_s6, %s4388_s27  ;;  %s453_s30 = int_to_ptr.vmem [resolvable:$true] %s452_s30 }
  0x5e   : > { %p4395_p8 = scmp.lt.u32.totalorder %s4388_s27, %s5386_s6 }
  0x5f   : > { %p4391_p2 = pnand %p4389_p0, %p4952_p1 }
  0x61   : > { %p4392_p4 = pneg %p4391_p2 }
  0x63   : > { %p4397_p10 = pnand %p4395_p8, %p4392_p4 }
  0x65   : > { %4400 = shalt.err (!%p4397_p10)
}
  0x66   : > { %s4401_s16 = scalar_lea.vmem %s429_s29, 128  ;;  %p4409_p6 = scmp.lt.s32.totalorder %s429_s29, %s429_s29 }
  0x67   : > { %p4402_p11 = scmp.ne.s32.totalorder %s429_s29, %s4401_s16  ;;  %p4410_p7 = scmp.lt.s32.totalorder %s4401_s16, %s4401_s16 }
  0x69   : > { %p4404_p3 = pnand %p4402_p11, %p4952_p1  ;;  %p4411_p9 = por %p4410_p7, %p4409_p6 }
  0x6b   : > { %p4405_p5 = pneg %p4404_p3 }
  0x6d   : > { %p4412_p12 = pnand %p4411_p9, %p4405_p5 }
  0x6f   : > { %4415 = shalt.err (!%p4412_p12)
}
  0x70   : > { %4214 = dma.hbm_to_vmem [thread:$0]  (!%p4936_p13), %s5386_s6, 128, %s429_s29, [#allocation13]  }
  0x71   : > { %s4416_s20 = scalar_lea.hbm %s5388_s8, 64 }
  0x72   : > { %p4417_p0 = scmp.ne.s32.totalorder %s5388_s8, %s4416_s20  ;;  %p4423_p8 = scmp.lt.u32.totalorder %s4416_s20, %s5388_s8 }
  0x74   : > { %p4419_p2 = pnand %p4417_p0, %p4952_p1 }
  0x76   : > { %p4420_p4 = pneg %p4419_p2 }
  0x78   : > { %p4425_p10 = pnand %p4423_p8, %p4420_p4 }
  0x7a   : > { %4428 = shalt.err (!%p4425_p10)
}
  0x7b   : > { %s4429_s13 = scalar_lea.vmem %s453_s30, 64  ;;  %p4437_p6 = scmp.lt.s32.totalorder %s453_s30, %s453_s30 }
  0x7c   : > { %p4430_p11 = scmp.ne.s32.totalorder %s453_s30, %s4429_s13  ;;  %p4438_p7 = scmp.lt.s32.totalorder %s4429_s13, %s4429_s13 }
  0x7e   : > { %p4432_p3 = pnand %p4430_p11, %p4952_p1  ;;  %p4439_p9 = por %p4438_p7, %p4437_p6 }
  0x80   : > { %p4433_p5 = pneg %p4432_p3 }
  0x82   : > { %p4440_p12 = pnand %p4439_p9, %p4433_p5 }
  0x84   : > { %4443 = shalt.err (!%p4440_p12)
}
  0x85   : > { %4220 = dma.hbm_to_vmem [thread:$0]  (!%p4936_p13), %s5388_s8, 64, %s453_s30, [#allocation16]  }
  0x86   : > { %s4780_s18 = smov [#allocation18]   ;;  %s4444_s20 = scalar_lea.hbm %s5390_s10, 32 }
  0x87   : > { %s476_s21 = sshll.u32 %s4780_s18, 4  ;;  %p4445_p0 = scmp.ne.s32.totalorder %s5390_s10, %s4444_s20  ;;  %s477_s21 = int_to_ptr.vmem [resolvable:$true] %s476_s21 }
  0x88   : > { %p4451_p8 = scmp.lt.u32.totalorder %s4444_s20, %s5390_s10 }
  0x89   : > { %p4447_p2 = pnand %p4445_p0, %p4952_p1 }
  0x8b   : > { %p4448_p4 = pneg %p4447_p2 }
  0x8d   : > { %p4453_p10 = pnand %p4451_p8, %p4448_p4 }
  0x8f   : > { %4456 = shalt.err (!%p4453_p10)
}
  0x90   : > { %s4457_s30 = scalar_lea.vmem %s477_s21, 32  ;;  %p4465_p6 = scmp.lt.s32.totalorder %s477_s21, %s477_s21 }
  0x91   : > { %p4458_p11 = scmp.ne.s32.totalorder %s477_s21, %s4457_s30  ;;  %p4466_p7 = scmp.lt.s32.totalorder %s4457_s30, %s4457_s30 }
  0x93   : > { %p4460_p3 = pnand %p4458_p11, %p4952_p1  ;;  %p4467_p9 = por %p4466_p7, %p4465_p6 }
  0x95   : > { %p4461_p5 = pneg %p4460_p3 }
  0x97   : > { %p4468_p12 = pnand %p4467_p9, %p4461_p5 }
  0x99   : > { %4471 = shalt.err (!%p4468_p12)
}
  0x9a   : > { %4226 = dma.hbm_to_vmem [thread:$0]  (!%p4936_p13), %s5390_s10, 32, %s477_s21, [#allocation19]  }
  0x9b   : > { %s4781_s16 = smov [#allocation3]   ;;  %s4782_s2 = smov [#allocation8]  }
  0x9c   : > { %s369_s18 = sshll.u32 %s4781_s16, 4  ;;  %s390_s24 = sshll.u32 %s4782_s2, 4  ;;  %s370_s18 = int_to_ptr.vmem [resolvable:$true] %s369_s18  ;;  %s5047_s24 = int_to_ptr.vmem [resolvable:$true] %s390_s24 }
  0x9d   : > { %s5431_s1 = sld [smem:[#allocation40_spill]] }
  0xa3   : > { %s4472_s27 = scalar_lea.hbm %s5431_s1, 64 }
  0xa4   : > { %p4473_p0 = scmp.ne.s32.totalorder %s5431_s1, %s4472_s27  ;;  %p4479_p8 = scmp.lt.u32.totalorder %s4472_s27, %s5431_s1 }
  0xa6   : > { %p4475_p2 = pnand %p4473_p0, %p4952_p1 }
  0xa8   : > { %p4476_p4 = pneg %p4475_p2 }
  0xaa   : > { %p4481_p10 = pnand %p4479_p8, %p4476_p4 }
  0xac   : > { %4484 = shalt.err (!%p4481_p10)
}
  0xad   : > { %s4485_s13 = scalar_lea.vmem %s370_s18, 64  ;;  %p4493_p6 = scmp.lt.s32.totalorder %s370_s18, %s370_s18 }
  0xae   : > { %p4486_p11 = scmp.ne.s32.totalorder %s370_s18, %s4485_s13  ;;  %p4494_p7 = scmp.lt.s32.totalorder %s4485_s13, %s4485_s13 }
  0xb0   : > { %p4488_p3 = pnand %p4486_p11, %p4952_p1  ;;  %p4495_p9 = por %p4494_p7, %p4493_p6 }
  0xb2   : > { %p4489_p5 = pneg %p4488_p3 }
  0xb4   : > { %p4496_p12 = pnand %p4495_p9, %p4489_p5 }
  0xb6   : > { %4499 = shalt.err (!%p4496_p12)
}
  0xb7   : > { %4199 = dma.hbm_to_vmem [thread:$0]  (!%p4936_p13), %s5431_s1, 64, %s370_s18, [#allocation4]  }
  0xb8   : > { %s5432_s3 = sld [smem:[#allocation42_spill]] }
  0xbe   : > { %s4500_s14 = scalar_lea.hbm %s5432_s3, 1024 }
  0xbf   : > { %p4501_p0 = scmp.ne.s32.totalorder %s5432_s3, %s4500_s14  ;;  %p4507_p8 = scmp.lt.u32.totalorder %s4500_s14, %s5432_s3 }
  0xc1   : > { %p4503_p2 = pnand %p4501_p0, %p4952_p1 }
  0xc3   : > { %p4504_p4 = pneg %p4503_p2 }
  0xc5   : > { %p4509_p10 = pnand %p4507_p8, %p4504_p4 }
  0xc7   : > { %4512 = shalt.err (!%p4509_p10)
}
  0xc8   : > { %s4513_s18 = scalar_lea.vmem %s5047_s24, 1024  ;;  %p4521_p6 = scmp.lt.s32.totalorder %s5047_s24, %s5047_s24 }
  0xc9   : > { %p4514_p11 = scmp.ne.s32.totalorder %s5047_s24, %s4513_s18  ;;  %p4522_p7 = scmp.lt.s32.totalorder %s4513_s18, %s4513_s18 }
  0xcb   : > { %p4516_p3 = pnand %p4514_p11, %p4952_p1  ;;  %p4523_p9 = por %p4522_p7, %p4521_p6 }
  0xcd   : > { %p4517_p5 = pneg %p4516_p3 }
  0xcf   : > { %p4524_p12 = pnand %p4523_p9, %p4517_p5 }
  0xd1   : > { %4527 = shalt.err (!%p4524_p12)
}
  0xd2   : > { %s5408_s21 = smov 128   ;;  %s5409_s13 = smov 8  }
  0xd3   : > { %4205 = dma.hbm_to_vmem [thread:$0]  (!%p4936_p13), %s5432_s3, 1024, %s5047_s24, [#allocation7], %s5408_s21, %s5408_s21, %s5409_s13  }
  0xd4   : > { %s4785_s2 = smov [#allocation11]   ;;  %s4528_s25 = scalar_lea.hbm %s5385_s5, 16384 }
  0xd5   : > { %s414_s20 = sshll.u32 %s4785_s2, 4  ;;  %p4529_p0 = scmp.ne.s32.totalorder %s5385_s5, %s4528_s25  ;;  %s415_s20 = int_to_ptr.vmem [resolvable:$true] %s414_s20 }
  0xd6   : > { %p4535_p8 = scmp.lt.u32.totalorder %s4528_s25, %s5385_s5 }
  0xd7   : > { %p4531_p2 = pnand %p4529_p0, %p4952_p1 }
  0xd9   : > { %p4532_p4 = pneg %p4531_p2 }
  0xdb   : > { %p4537_p10 = pnand %p4535_p8, %p4532_p4 }
  0xdd   : > { %4540 = shalt.err (!%p4537_p10)
}
  0xde   : > { %s4541_s24 = scalar_lea.vmem %s415_s20, 16384  ;;  %p4549_p6 = scmp.lt.s32.totalorder %s415_s20, %s415_s20 }
  0xdf   : > { %p4542_p11 = scmp.ne.s32.totalorder %s415_s20, %s4541_s24  ;;  %p4550_p7 = scmp.lt.s32.totalorder %s4541_s24, %s4541_s24 }
  0xe1   : > { %p4544_p3 = pnand %p4542_p11, %p4952_p1  ;;  %p4551_p9 = por %p4550_p7, %p4549_p6 }
  0xe3   : > { %p4545_p5 = pneg %p4544_p3 }
  0xe5   : > { %p4552_p12 = pnand %p4551_p9, %p4545_p5 }
  0xe7   : > { %4555 = shalt.err (!%p4552_p12)
}
  0xe8   : > { %s4786_s29 = smov 1024   ;;  %s4787_s16 = smov 64  }
  0xe9   : > { %4211 = dma.hbm_to_vmem [thread:$0]  (!%p4936_p13), %s5385_s5, 16384, %s415_s20, [#allocation10], %s4786_s29, %s4786_s29, %s4787_s16  }
  0xea   : > { %s4788_s14 = smov [#allocation14]   ;;  %s4556_s30 = scalar_lea.hbm %s5387_s7, 65536 }
  0xeb   : > { %s438_s27 = sshll.u32 %s4788_s14, 4  ;;  %p4557_p0 = scmp.ne.s32.totalorder %s5387_s7, %s4556_s30  ;;  %s439_s27 = int_to_ptr.vmem [resolvable:$true] %s438_s27 }
  0xec   : > { %p4563_p8 = scmp.lt.u32.totalorder %s4556_s30, %s5387_s7 }
  0xed   : > { %p4559_p2 = pnand %p4557_p0, %p4952_p1 }
  0xef   : > { %p4560_p4 = pneg %p4559_p2 }
  0xf1   : > { %p4565_p10 = pnand %p4563_p8, %p4560_p4 }
  0xf3   : > { %4568 = shalt.err (!%p4565_p10)
}
  0xf4   : > { %s4569_s20 = scalar_lea.vmem %s439_s27, 65536  ;;  %p4577_p6 = scmp.lt.s32.totalorder %s439_s27, %s439_s27 }
  0xf5   : > { %p4570_p11 = scmp.ne.s32.totalorder %s439_s27, %s4569_s20  ;;  %p4578_p7 = scmp.lt.s32.totalorder %s4569_s20, %s4569_s20 }
  0xf7   : > { %p4572_p3 = pnand %p4570_p11, %p4952_p1  ;;  %p4579_p9 = por %p4578_p7, %p4577_p6 }
  0xf9   : > { %p4573_p5 = pneg %p4572_p3 }
  0xfb   : > { %p4580_p12 = pnand %p4579_p9, %p4573_p5 }
  0xfd   : > { %4583 = shalt.err (!%p4580_p12)
}
  0xfe   : > { %s4789_s29 = smov 512   ;;  %s4790_s16 = smov 32  }
  0xff   : > { %4217 = dma.hbm_to_vmem [thread:$0]  (!%p4936_p13), %s5387_s7, 65536, %s439_s27, [#allocation13], %s4789_s29, %s4789_s29, %s4790_s16  }
 0x100   : > { %s4791_s1 = smov [#allocation17]   ;;  %s4584_s15 = scalar_lea.hbm %s5389_s9, 16384 }
 0x101   : > { %s462_s2 = sshll.u32 %s4791_s1, 4  ;;  %p4585_p0 = scmp.ne.s32.totalorder %s5389_s9, %s4584_s15  ;;  %s463_s2 = int_to_ptr.vmem [resolvable:$true] %s462_s2 }
 0x102   : > { %p4591_p8 = scmp.lt.u32.totalorder %s4584_s15, %s5389_s9 }
 0x103   : > { %p4587_p2 = pnand %p4585_p0, %p4952_p1 }
 0x105   : > { %p4588_p4 = pneg %p4587_p2 }
 0x107   : > { %p4593_p10 = pnand %p4591_p8, %p4588_p4 }
 0x109   : > { %4596 = shalt.err (!%p4593_p10)
}
 0x10a   : > { %s4597_s27 = scalar_lea.vmem %s463_s2, 16384  ;;  %p4605_p6 = scmp.lt.s32.totalorder %s463_s2, %s463_s2 }
 0x10b   : > { %p4598_p11 = scmp.ne.s32.totalorder %s463_s2, %s4597_s27  ;;  %p4606_p7 = scmp.lt.s32.totalorder %s4597_s27, %s4597_s27 }
 0x10d   : > { %p4600_p3 = pnand %p4598_p11, %p4952_p1  ;;  %p4607_p9 = por %p4606_p7, %p4605_p6 }
 0x10f   : > { %p4601_p5 = pneg %p4600_p3 }
 0x111   : > { %p4608_p12 = pnand %p4607_p9, %p4601_p5 }
 0x113   : > { %4611 = shalt.err (!%p4608_p12)
}
 0x114   : > { %s4792_s29 = smov 256   ;;  %s4793_s16 = smov 16  }
 0x115   : > { %4223 = dma.hbm_to_vmem [thread:$0]  (!%p4936_p13), %s5389_s9, 16384, %s463_s2, [#allocation16], %s4792_s29, %s4792_s29, %s4793_s16  }
 0x116   : > { %s4794_s1 = smov [#allocation20]   ;;  %s4795_s25 = smov [#allocation21]  }
 0x117   : > { %s486_s14 = sshll.u32 %s4794_s1, 4  ;;  %s500_s15 = sshll.u32 %s4795_s25, 4  ;;  %s487_s14 = int_to_ptr.vmem [resolvable:$true] %s486_s14  ;;  %s501_s15 = int_to_ptr.vmem [resolvable:$true] %s500_s15 }
 0x118   : > { %s4612_s24 = scalar_lea.hbm %s5391_s11, 4096 }
 0x119   : > { %p4613_p0 = scmp.ne.s32.totalorder %s5391_s11, %s4612_s24  ;;  %p4619_p8 = scmp.lt.u32.totalorder %s4612_s24, %s5391_s11 }
 0x11b   : > { %p4615_p2 = pnand %p4613_p0, %p4952_p1 }
 0x11d   : > { %p4616_p4 = pneg %p4615_p2 }
 0x11f   : > { %p4621_p10 = pnand %p4619_p8, %p4616_p4 }
 0x121   : > { %4624 = shalt.err (!%p4621_p10)
}
 0x122   : > { %s4625_s2 = scalar_lea.vmem %s487_s14, 4096  ;;  %p4633_p6 = scmp.lt.s32.totalorder %s487_s14, %s487_s14 }
 0x123   : > { %p4626_p11 = scmp.ne.s32.totalorder %s487_s14, %s4625_s2  ;;  %p4634_p7 = scmp.lt.s32.totalorder %s4625_s2, %s4625_s2 }
 0x125   : > { %p4628_p3 = pnand %p4626_p11, %p4952_p1  ;;  %p4635_p9 = por %p4634_p7, %p4633_p6 }
 0x127   : > { %p4629_p5 = pneg %p4628_p3 }
 0x129   : > { %p4636_p12 = pnand %p4635_p9, %p4629_p5 }
 0x12b   : > { %4639 = shalt.err (!%p4636_p12)
}
 0x12c   : > { %s5433_s29 = smov 8   ;;  %s5434_s16 = smov 128  }
 0x12d   : > { %4229 = dma.hbm_to_vmem [thread:$0]  (!%p4936_p13), %s5391_s11, 4096, %s487_s14, [#allocation19], %s5434_s16, %s5434_s16, %s5433_s29  }
 0x12e   : > { %s4640_s1 = scalar_lea.hbm %s5392_s12, 16 }
 0x12f   : > { %p4641_p0 = scmp.ne.s32.totalorder %s5392_s12, %s4640_s1  ;;  %p4647_p8 = scmp.lt.u32.totalorder %s4640_s1, %s5392_s12 }
 0x131   : > { %p4643_p2 = pnand %p4641_p0, %p4952_p1 }
 0x133   : > { %p4644_p4 = pneg %p4643_p2 }
 0x135   : > { %p4649_p10 = pnand %p4647_p8, %p4644_p4 }
 0x137   : > { %4652 = shalt.err (!%p4649_p10)
}
 0x138   : > { %s4653_s20 = scalar_lea.vmem %s501_s15, 16  ;;  %s4660_s14 = scalar_lea.vmem %s501_s15, 32 }
 0x139   : > { %p4654_p11 = scmp.ne.s32.totalorder %s501_s15, %s4653_s20  ;;  %p4661_p6 = scmp.lt.s32.totalorder %s501_s15, %s501_s15 }
 0x13a   : > { %p4662_p7 = scmp.lt.s32.totalorder %s4660_s14, %s4653_s20 }
 0x13b   : > { %p4656_p3 = pnand %p4654_p11, %p4952_p1 }
 0x13c   : > { %p4663_p9 = por %p4662_p7, %p4661_p6 }
 0x13d   : > { %p4657_p5 = pneg %p4656_p3 }
 0x13f   : > { %p4664_p12 = pnand %p4663_p9, %p4657_p5 }
 0x141   : > { %4667 = shalt.err (!%p4664_p12)
}
 0x142   : > { %4232 = dma.hbm_to_vmem [thread:$0]  (!%p4936_p13), %s5392_s12, 16, %s501_s15, [#allocation22]  }
 0x143   : > { %p5435_p0 = scmp.ne.s32.totalorder %s5425_s22, 0 }
 0x144   : > { %p5436_p2 = scmp.ne.s32.totalorder (!%p5435_p0), %s5426_s23, 0 }
 0x145   : > { %523 = sbr.rel (%p5435_p0) target bundleno = 2155 (0x86b), region = 72 }
 0x14c   : > { %4721 = dma.done.wait (%p5436_p2), [#allocation4], 64  }
 0x14d   : > { %4723 = vsyncadd (%p5436_p2), [#allocation4], 4294967232 }
 0x14e   : > { %4725 = dma.done.wait (%p5436_p2), [#allocation7], 1040  }
 0x14f   : > { %4727 = vsyncadd (%p5436_p2), [#allocation7], 4294966256 }
 0x150   : > { %4729 = dma.done.wait (%p5436_p2), [#allocation10], 16400  }
 0x151   : > { %4731 = vsyncadd (%p5436_p2), [#allocation10], 4294950896 }
 0x152   : > { %4733 = dma.done.wait (%p5436_p2), [#allocation13], 65664  }
 0x153   : > { %4735 = vsyncadd (%p5436_p2), [#allocation13], 4294901632 }
 0x154   : > { %4737 = dma.done.wait (%p5436_p2), [#allocation16], 16448  }
 0x155   : > { %4739 = vsyncadd (%p5436_p2), [#allocation16], 4294950848 }
 0x156   : > { %4741 = dma.done.wait (%p5436_p2), [#allocation19], 4128  }
 0x157   : > { %4743 = vsyncadd (%p5436_p2), [#allocation19], 4294963168 }
 0x158   : > { %4745 = dma.done.wait (%p5436_p2), [#allocation22], 16  }
 0x159   : > { %4747 = vsyncadd (%p5436_p2), [#allocation22], 4294967280  ;;  %p612_p13 = scmp.lt.s32.totalorder %s4766_s28, 1  ;;  %v624_v1 = vld [vmem:[#allocation3] sm:$0x7]  ;;  %vm672_vm0 = vcmask 1042432  }
 0x15a   : > { %3286 = vmatprep.subr.msk.mxu1 %vm672_vm0, %v624_v1  ;;  %v753_v2 = vld [vmem:[#allocation8] sm:$0xff]  ;;  %v754_v3 = vld [vmem:[#allocation8 + $0x8] sm:$0xff]  ;;  %vm665_vm1 = vcmask 23552   ;;  %v755_v6 = vld [vmem:[#allocation8 + $0x10] sm:$0xff]  ;;  %vm768_vm2 = vcmask 523264   ;;  %s5437_s23 = sld [smem:[#allocation37_spill]] }
 0x15b   : > { %s613_s22 = scalar_select %p612_p13, %s4766_s28, 1  ;;  %3287 = vmatpush3.msk.msra.mxu1 %vm672_vm0, %v624_v1  ;;  %v3310_v4 = vpack.c.bf16 %v754_v3, %v753_v2  ;;  %v756_v7 = vld [vmem:[#allocation8 + $0x18] sm:$0xff]  ;;  %v757_v10 = vld [vmem:[#allocation8 + $0x20] sm:$0xff]  ;;  %v758_v11 = vld [vmem:[#allocation8 + $0x28] sm:$0xff] }
 0x15c   : > { %v3314_v8 = vpack.c.bf16 %v756_v7, %v755_v6  ;;  %v3318_v12 = vpack.c.bf16 %v758_v11, %v757_v10  ;;  %v759_v13 = vld [vmem:[#allocation8 + $0x30] sm:$0xff]  ;;  %v760_v14 = vld [vmem:[#allocation8 + $0x38] sm:$0xff]  ;;  %v856_v22 = vld [vmem:[#allocation11 + $0x20] sm:$0xff]  ;;  %s610_s16 = sand.u32 1, %s4758_s26   ;;  %s3235_s3 = sshll.u32 %s4766_s28, 4 }
 0x15d   : > { %s3227_s17 = sshll.u32 %s613_s22, 2  ;;  %3311 = vmatprep.subr.bf16.mxu1 %v3310_v4  ;;  %v3322_v15 = vpack.c.bf16 %v760_v14, %v759_v13  ;;  %v853_v16 = vld [vmem:[#allocation11 + $0x8] sm:$0xff]  ;;  %v864_v23 = vld [vmem:[#allocation11 + $0x60] sm:$0xff]  ;;  %v3228_v61 = vld [vmem:[#allocation6] ss:$0 sm:$0xff]  ;;  %s611_s4 = scalar_lea.vmem [#allocation23], %s610_s16 }
 0x15e   : > { %s618_s29 = scalar_lea.vmem %s5380_s0, %s3227_s17  ;;  %v861_v17 = vld [vmem:[#allocation11 + $0x48] sm:$0xff]  ;;  %v3392_v24 = vpack.c.bf16 %v864_v23, %v856_v22  ;;  %v872_v27 = vld [vmem:[#allocation11 + $0xa0] sm:$0xff]  ;;  %s3015_s21 = sshll.u32 %s611_s4, 4  ;;  %s5335_s21 = int_to_ptr.vmem [resolvable:$true] %s3015_s21 }
 0x15f   : > { %v626_v0 = vld [vmem:[%s618_s29] sm:$0x7]  ;;  %v3326_v18 = vpack.c.bf16 %v861_v17, %v853_v16  ;;  %v857_v19 = vld [vmem:[#allocation11 + $0x28] sm:$0xff]  ;;  %v880_v29 = vld [vmem:[#allocation11 + $0xe0] sm:$0xff]  ;;  %s5438_s25 = sld [smem:[#allocation44_spill]]  ;;  %s3003_s24 = scalar_lea.sflag [#allocation5], %s610_s16 }
 0x160   : > { %633 = vxpose.xlu0.b32.start.end [1/1] (short) (narrow) %v626_v0, 16  ;;  %v865_v20 = vld [vmem:[#allocation11 + $0x68] sm:$0xff]  ;;  %v3396_v30 = vpack.c.bf16 %v880_v29, %v872_v27  ;;  %v888_v33 = vld [vmem:[#allocation11 + $0x120] sm:$0xff]  ;;  %s4668_s20 = scalar_lea.vmem %s5335_s21, 16  ;;  %p5440_p4 = scmp.ne.s32.totalorder %s5437_s23, 0 }
 0x161   : > { %v3390_v21 = vpack.c.bf16 %v865_v20, %v857_v19  ;;  %v873_v25 = vld [vmem:[#allocation11 + $0xa8] sm:$0xff]  ;;  %v896_v35 = vld [vmem:[#allocation11 + $0x160] sm:$0xff]  ;;  %p4669_p1 = scmp.ne.s32.totalorder %s5335_s21, %s4668_s20  ;;  %s4798_s28 = smov [#allocation23]  }
 0x162   : > { %v881_v26 = vld [vmem:[#allocation11 + $0xe8] sm:$0xff]  ;;  %v3400_v36 = vpack.c.bf16 %v896_v35, %v888_v33  ;;  %v904_v39 = vld [vmem:[#allocation11 + $0x1a0] sm:$0xff]  ;;  %s4672_s14 = sshll.u32 %s4798_s28, 4  ;;  %s4673_s14 = int_to_ptr.vmem [resolvable:$false] %s4672_s14 }
 0x163   : > { %3391 = vmatprep.subr.bf16.mxu0 %v3390_v21  ;;  %v3394_v28 = vpack.c.bf16 %v881_v26, %v873_v25  ;;  %v889_v31 = vld [vmem:[#allocation11 + $0x128] sm:$0xff]  ;;  %v912_v41 = vld [vmem:[#allocation11 + $0x1e0] sm:$0xff]  ;;  %p4670_p8 = pnand %p4669_p1, %p5440_p4  ;;  %s4674_s27 = scalar_lea.vmem %s4673_s14, 32 }
 0x164   : > { %3393 = vmatpush1.bf16.msra.mxu0 %v3392_v24  ;;  %v897_v32 = vld [vmem:[#allocation11 + $0x168] sm:$0xff]  ;;  %v3404_v42 = vpack.c.bf16 %v912_v41, %v904_v39  ;;  %v920_v45 = vld [vmem:[#allocation11 + $0x220] sm:$0xff]  ;;  %p4675_p11 = scmp.lt.s32.totalorder %s5335_s21, %s4673_s14  ;;  %p4676_p3 = scmp.lt.s32.totalorder %s4674_s27, %s4668_s20 }
 0x165   : > { %3395 = vmatprep.subr.bf16.mxu0 %v3394_v28  ;;  %v3398_v34 = vpack.c.bf16 %v897_v32, %v889_v31  ;;  %v905_v37 = vld [vmem:[#allocation11 + $0x1a8] sm:$0xff]  ;;  %v928_v47 = vld [vmem:[#allocation11 + $0x260] sm:$0xff]  ;;  %s5439_s18 = smov %s5438_s25  ;;  %s5333_s30 = scalar_lea.hbm %s5438_s25, %s3235_s3 }
 0x166   : > { %v913_v38 = vld [vmem:[#allocation11 + $0x1e8] sm:$0xff]  ;;  %v3408_v48 = vpack.c.bf16 %v928_v47, %v920_v45  ;;  %v936_v51 = vld [vmem:[#allocation11 + $0x2a0] sm:$0xff]  ;;  %p4671_p10 = pneg %p4670_p8  ;;  %p4677_p5 = por %p4676_p3, %p4675_p11 }
 0x167   : > { %v3402_v40 = vpack.c.bf16 %v913_v38, %v905_v37  ;;  %v921_v43 = vld [vmem:[#allocation11 + $0x228] sm:$0xff]  ;;  %v944_v53 = vld [vmem:[#allocation11 + $0x2e0] sm:$0xff] }
 0x168   : > { %3397 = vmatpush1.bf16.msra.mxu0 %v3396_v30  ;;  %v929_v44 = vld [vmem:[#allocation11 + $0x268] sm:$0xff]  ;;  %v3412_v54 = vpack.c.bf16 %v944_v53, %v936_v51  ;;  %v952_v57 = vld [vmem:[#allocation11 + $0x320] sm:$0xff]  ;;  %p4678_p6 = pnand %p4677_p5, %p4671_p10 }
 0x169   : > { %3399 = vmatprep.subr.bf16.mxu0 %v3398_v34  ;;  %v3406_v46 = vpack.c.bf16 %v929_v44, %v921_v43  ;;  %v937_v49 = vld [vmem:[#allocation11 + $0x2a8] sm:$0xff]  ;;  %v960_v59 = vld [vmem:[#allocation11 + $0x360] sm:$0xff] }
 0x16a   : > { %v945_v50 = vld [vmem:[#allocation11 + $0x2e8] sm:$0xff]  ;;  %v3416_v60 = vpack.c.bf16 %v960_v59, %v952_v57  ;;  %v852_v1 = vld [vmem:[#allocation11] sm:$0xff]  ;;  %v3232_v59 = vld [vmem:[#allocation9] ss:$0 sm:$0xff] }
 0x16b   : > { %v3410_v52 = vpack.c.bf16 %v945_v50, %v937_v49  ;;  %v953_v55 = vld [vmem:[#allocation11 + $0x328] sm:$0xff]  ;;  %v860_v2 = vld [vmem:[#allocation11 + $0x40] sm:$0xff] }
 0x16c   : > { %3401 = vmatpush1.bf16.msra.mxu0 %v3400_v36  ;;  %v961_v56 = vld [vmem:[#allocation11 + $0x368] sm:$0xff]  ;;  %v3328_v7 = vpack.c.bf16 %v860_v2, %v852_v1  ;;  %v868_v10 = vld [vmem:[#allocation11 + $0x80] sm:$0xff]  ;;  %v879_v1 = vld [vmem:[#allocation11 + $0xd8] sm:$0xff] }
 0x16d   : > { %3403 = vmatprep.subr.bf16.mxu0 %v3402_v40  ;;  %v3414_v58 = vpack.c.bf16 %v961_v56, %v953_v55  ;;  %v876_v11 = vld [vmem:[#allocation11 + $0xc0] sm:$0xff]  ;;  %v893_v13 = vld [vmem:[#allocation11 + $0x148] sm:$0xff]  ;;  %v855_v55 = vld [vmem:[#allocation11 + $0x18] sm:$0xff] }
 0x16e   : > { %v3332_v14 = vpack.c.bf16 %v876_v11, %v868_v10  ;;  %v884_v16 = vld [vmem:[#allocation11 + $0x100] sm:$0xff]  ;;  %v909_v19 = vld [vmem:[#allocation11 + $0x1c8] sm:$0xff]  ;;  %v863_v56 = vld [vmem:[#allocation11 + $0x58] sm:$0xff] }
 0x16f   : > { %v892_v17 = vld [vmem:[#allocation11 + $0x140] sm:$0xff]  ;;  %v917_v24 = vld [vmem:[#allocation11 + $0x208] sm:$0xff]  ;;  %v3358_v57 = vpack.c.bf16 %v863_v56, %v855_v55  ;;  %v895_v10 = vld [vmem:[#allocation11 + $0x158] sm:$0xff] }
 0x170   : > { %3405 = vmatpush1.bf16.msra.mxu0 %v3404_v42  ;;  %v3336_v20 = vpack.c.bf16 %v892_v17, %v884_v16  ;;  %v900_v22 = vld [vmem:[#allocation11 + $0x180] sm:$0xff]  ;;  %v925_v25 = vld [vmem:[#allocation11 + $0x248] sm:$0xff]  ;;  %v903_v16 = vld [vmem:[#allocation11 + $0x198] sm:$0xff] }
 0x171   : > { %3407 = vmatprep.subr.bf16.mxu0 %v3406_v46  ;;  %v908_v23 = vld [vmem:[#allocation11 + $0x1c0] sm:$0xff]  ;;  %v3342_v27 = vpack.c.bf16 %v925_v25, %v917_v24  ;;  %v933_v30 = vld [vmem:[#allocation11 + $0x288] sm:$0xff]  ;;  %v911_v17 = vld [vmem:[#allocation11 + $0x1d8] sm:$0xff] }
 0x172   : > { %v3340_v26 = vpack.c.bf16 %v908_v23, %v900_v22  ;;  %v916_v28 = vld [vmem:[#allocation11 + $0x200] sm:$0xff]  ;;  %v941_v31 = vld [vmem:[#allocation11 + $0x2c8] sm:$0xff]  ;;  %v919_v22 = vld [vmem:[#allocation11 + $0x218] sm:$0xff] }
 0x173   : > { %v924_v29 = vld [vmem:[#allocation11 + $0x240] sm:$0xff]  ;;  %v3346_v33 = vpack.c.bf16 %v941_v31, %v933_v30  ;;  %v949_v36 = vld [vmem:[#allocation11 + $0x308] sm:$0xff]  ;;  %v927_v23 = vld [vmem:[#allocation11 + $0x258] sm:$0xff] }
 0x174   : > { %3409 = vmatpush1.bf16.msra.mxu0 %v3408_v48  ;;  %v3344_v32 = vpack.c.bf16 %v924_v29, %v916_v28  ;;  %v932_v34 = vld [vmem:[#allocation11 + $0x280] sm:$0xff]  ;;  %v957_v37 = vld [vmem:[#allocation11 + $0x348] sm:$0xff]  ;;  %v3374_v25 = vpack.c.bf16 %v927_v23, %v919_v22  ;;  %v935_v28 = vld [vmem:[#allocation11 + $0x298] sm:$0xff] }
 0x175   : > { %3411 = vmatprep.subr.bf16.mxu0 %v3410_v52  ;;  %v940_v35 = vld [vmem:[#allocation11 + $0x2c0] sm:$0xff]  ;;  %v3350_v39 = vpack.c.bf16 %v957_v37, %v949_v36  ;;  %v965_v43 = vld [vmem:[#allocation11 + $0x388] sm:$0xff]  ;;  %v943_v29 = vld [vmem:[#allocation11 + $0x2d8] sm:$0xff] }
 0x176   : > { %v3348_v38 = vpack.c.bf16 %v940_v35, %v932_v34  ;;  %v948_v40 = vld [vmem:[#allocation11 + $0x300] sm:$0xff]  ;;  %v973_v44 = vld [vmem:[#allocation11 + $0x3c8] sm:$0xff]  ;;  %v3378_v31 = vpack.c.bf16 %v943_v29, %v935_v28  ;;  %v951_v34 = vld [vmem:[#allocation11 + $0x318] sm:$0xff] }
 0x177   : > { %v956_v41 = vld [vmem:[#allocation11 + $0x340] sm:$0xff]  ;;  %v3354_v45 = vpack.c.bf16 %v973_v44, %v965_v43  ;;  %v969_v48 = vld [vmem:[#allocation11 + $0x3a8] sm:$0xff]  ;;  %v959_v35 = vld [vmem:[#allocation11 + $0x358] sm:$0xff] }
 0x178   : > { %3413 = vmatpush1.bf16.msra.mxu0 %v3412_v54  ;;  %v3352_v42 = vpack.c.bf16 %v956_v41, %v948_v40  ;;  %v964_v46 = vld [vmem:[#allocation11 + $0x380] sm:$0xff]  ;;  %v977_v50 = vld [vmem:[#allocation11 + $0x3e8] sm:$0xff]  ;;  %v3382_v37 = vpack.c.bf16 %v959_v35, %v951_v34  ;;  %v967_v40 = vld [vmem:[#allocation11 + $0x398] sm:$0xff] }
 0x179   : > { %3415 = vmatprep.subr.bf16.mxu0 %v3414_v58  ;;  %v972_v47 = vld [vmem:[#allocation11 + $0x3c0] sm:$0xff]  ;;  %v3418_v52 = vpack.c.bf16 %v977_v50, %v969_v48  ;;  %v4796_v58 = vmov 0.0   ;;  %v975_v41 = vld [vmem:[#allocation11 + $0x3d8] sm:$0xff]  ;;  %v966_v44 = vld [vmem:[#allocation11 + $0x390] sm:$0xff] }
 0x17a   : > { %v3356_v49 = vpack.c.bf16 %v972_v47, %v964_v46  ;;  %v968_v51 = vld [vmem:[#allocation11 + $0x3a0] sm:$0xff]  ;;  %1240 = vmatprep.mubr.f32.mxu0 %v4796_v58  ;;  %v3386_v43 = vpack.c.bf16 %v975_v41, %v967_v40  ;;  %v859_v46 = vld [vmem:[#allocation11 + $0x38] sm:$0xff]  ;;  %v858_v50 = vld [vmem:[#allocation11 + $0x30] sm:$0xff] }
 0x17b   : > { %v976_v53 = vld [vmem:[#allocation11 + $0x3e0] sm:$0xff]  ;;  %v867_v47 = vld [vmem:[#allocation11 + $0x78] sm:$0xff]  ;;  %v874_v56 = vld [vmem:[#allocation11 + $0xb0] sm:$0xff] }
 0x17c   : > { %3417 = vmatpush1.bf16.msra.mxu0 %v3416_v60  ;;  %v3420_v54 = vpack.c.bf16 %v976_v53, %v968_v51  ;;  %v866_v51 = vld [vmem:[#allocation11 + $0x70] sm:$0xff]  ;;  %v883_v53 = vld [vmem:[#allocation11 + $0xf8] sm:$0xff]  ;;  %v1471_v40 = vld [vmem:[#allocation14 + $0x20] sm:$0xff] }
 0x17d   : > { %3419 = vmatprep.subr.bf16.mxu0 %v3418_v52  ;;  %v875_v52 = vld [vmem:[#allocation11 + $0xb8] sm:$0xff]  ;;  %v1468_v34 = vld [vmem:[#allocation14 + $0x8] sm:$0xff] }
 0x17e   : > { %v3426_v55 = vpack.c.bf16 %v883_v53, %v875_v52  ;;  %v963_v22 = vld [vmem:[#allocation11 + $0x378] sm:$0xff]  ;;  %v1472_v35 = vld [vmem:[#allocation14 + $0x28] sm:$0xff] }
 0x17f   : > { %v979_v28 = vld [vmem:[#allocation11 + $0x3f8] sm:$0xff] }
 0x180   : > { %3421 = vmatpush1.bf16.msra.mxu0 %v3420_v54  ;;  %v3424_v54 = vpack.c.bf16 %v866_v51, %v858_v50  ;;  %v1477_v52 = vld [vmem:[#allocation14 + $0x50] sm:$0xff] }
 0x181   : > { %v1481_v53 = vld [vmem:[#allocation14 + $0x70] sm:$0xff] }
 0x1e0   : > { %v649_v5 = vpop.trf.xlu0 }
 0x1e1   : > { %3288 = vmatprep.mubr.msk.f32.mxu1 %vm665_vm1, %v649_v5  ;;  %v877_v5 = vld [vmem:[#allocation11 + $0xc8] sm:$0xff] }
 0x1e4   : > { %v650_v9 = vpop.trf.xlu0 }
 0x1e5   : > { %3289 = vmatmul.mubr.msk.f32.vlgmr.msra.gmra.mrb[0].mxu1 %vm665_vm1, %v650_v9 }
 0x1e6   : > { %3313 = vmatpush3.bf16.msra.mxu1 %v3310_v4  ;;  %v869_v4 = vld [vmem:[#allocation11 + $0x88] sm:$0xff] }
 0x1e7   : > { %3315 = vmatprep.subr.bf16.mxu1 %v3314_v8  ;;  %v3330_v9 = vpack.c.bf16 %v877_v5, %v869_v4 }
 0x1ea   : > { %3317 = vmatpush3.bf16.msra.mxu1 %v3314_v8 }
 0x1eb   : > { %3319 = vmatprep.subr.bf16.mxu1 %v3318_v12 }
 0x1ee   : > { %3321 = vmatpush3.bf16.msra.mxu1 %v3318_v12  ;;  %v885_v12 = vld [vmem:[#allocation11 + $0x108] sm:$0xff] }
 0x1ef   : > { %3323 = vmatprep.subr.bf16.mxu1 %v3322_v15 }
 0x1f2   : > { %3325 = vmatpush3.bf16.msra.mxu1 %v3322_v15  ;;  %v3334_v15 = vpack.c.bf16 %v893_v13, %v885_v12 }
 0x1f3   : > { %3327 = vmatprep.subr.bf16.mxu1 %v3326_v18  ;;  %v901_v18 = vld [vmem:[#allocation11 + $0x188] sm:$0xff] }
 0x1f4   : > { %v3338_v21 = vpack.c.bf16 %v909_v19, %v901_v18  ;;  %v3370_v19 = vpack.c.bf16 %v911_v17, %v903_v16  ;;  %v947_v16 = vld [vmem:[#allocation11 + $0x2f8] sm:$0xff] }
 0x2b8   : > { %v3290_v62 = vpop.f32.mrb[0].mxu1 }
 0x2b9   : > { %v748_v63 = vadd.f32 %v3290_v62, %v3228_v61  ;;  %v742_v0 = vpop.f32.mrb[1].mxu1  ;;  %v862_v62 = vld [vmem:[#allocation11 + $0x50] sm:$0xff] }
 0x2ba   : > { %v743_v3 = vadd.f32 %v3228_v61, %v742_v0  ;;  %v854_v61 = vld [vmem:[#allocation11 + $0x10] sm:$0xff]  ;;  %v871_v0 = vld [vmem:[#allocation11 + $0x98] sm:$0xff] }
 0x2bb   : > { %v752_v8 = vmax.f32 %v748_v63, 0.0 }
 0x2bc   : > { %v751_v6 = vmax.f32 %v743_v3, 0.0  ;;  %v3360_v3 = vpack.c.bf16 %v862_v62, %v854_v61 }
 0x2be   : > { %3307 = vmatprep.mubr.msk.f32.mxu1 %vm768_vm2, %v751_v6  ;;  %v3362_v6 = vpack.c.bf16 %v879_v1, %v871_v0  ;;  %v898_v0 = vld [vmem:[#allocation11 + $0x170] sm:$0xff]  ;;  %v907_v1 = vld [vmem:[#allocation11 + $0x1b8] sm:$0xff] }
 0x2bf   : > { %3308 = vmatmul.mubr.msk.f32.vlgmr.msra.gmra.mrb[2].mxu1 %vm768_vm2, %v752_v8  ;;  %v878_v8 = vld [vmem:[#allocation11 + $0xd0] sm:$0xff] }
 0x2c0   : > { %3329 = vmatpush1.bf16.msra.mxu1 %v3328_v7  ;;  %1086 = vmatprep.mubr.f32.mxu1 %v4796_v58  ;;  %v870_v7 = vld [vmem:[#allocation11 + $0x90] sm:$0xff] }
 0x2c1   : > { %3331 = vmatprep.subr.bf16.mxu1 %v3330_v9  ;;  %v887_v9 = vld [vmem:[#allocation11 + $0x118] sm:$0xff]  ;;  %v3364_v11 = vpack.c.bf16 %v878_v8, %v870_v7  ;;  %v914_v7 = vld [vmem:[#allocation11 + $0x1f0] sm:$0xff] }
 0x2c2   : > { %v3366_v13 = vpack.c.bf16 %v895_v10, %v887_v9  ;;  %v923_v8 = vld [vmem:[#allocation11 + $0x238] sm:$0xff] }
 0x2c3   : > { %v931_v9 = vld [vmem:[#allocation11 + $0x278] sm:$0xff] }
 0x2c4   : > { %3333 = vmatpush1.bf16.msra.mxu1 %v3332_v14  ;;  %v886_v14 = vld [vmem:[#allocation11 + $0x110] sm:$0xff] }
 0x2c5   : > { %3335 = vmatprep.subr.bf16.mxu1 %v3334_v15  ;;  %v894_v15 = vld [vmem:[#allocation11 + $0x150] sm:$0xff] }
 0x2c6   : > { %v3368_v18 = vpack.c.bf16 %v894_v15, %v886_v14  ;;  %v930_v14 = vld [vmem:[#allocation11 + $0x270] sm:$0xff]  ;;  %v939_v15 = vld [vmem:[#allocation11 + $0x2b8] sm:$0xff] }
 0x2c8   : > { %3337 = vmatpush1.bf16.msra.mxu1 %v3336_v20  ;;  %v902_v20 = vld [vmem:[#allocation11 + $0x190] sm:$0xff] }
 0x2c9   : > { %3339 = vmatprep.subr.bf16.mxu1 %v3338_v21  ;;  %v910_v21 = vld [vmem:[#allocation11 + $0x1d0] sm:$0xff] }
 0x2ca   : > { %v3372_v24 = vpack.c.bf16 %v910_v21, %v902_v20  ;;  %v946_v20 = vld [vmem:[#allocation11 + $0x2f0] sm:$0xff]  ;;  %v955_v21 = vld [vmem:[#allocation11 + $0x338] sm:$0xff] }
 0x2cc   : > { %3341 = vmatpush1.bf16.msra.mxu1 %v3340_v26  ;;  %v918_v26 = vld [vmem:[#allocation11 + $0x210] sm:$0xff] }
 0x2cd   : > { %3343 = vmatprep.subr.bf16.mxu1 %v3342_v27  ;;  %v926_v27 = vld [vmem:[#allocation11 + $0x250] sm:$0xff] }
 0x2ce   : > { %v3376_v30 = vpack.c.bf16 %v926_v27, %v918_v26  ;;  %v962_v26 = vld [vmem:[#allocation11 + $0x370] sm:$0xff]  ;;  %v971_v27 = vld [vmem:[#allocation11 + $0x3b8] sm:$0xff] }
 0x2d0   : > { %3345 = vmatpush1.bf16.msra.mxu1 %v3344_v32  ;;  %v934_v32 = vld [vmem:[#allocation11 + $0x290] sm:$0xff] }
 0x2d1   : > { %3347 = vmatprep.subr.bf16.mxu1 %v3346_v33  ;;  %v942_v33 = vld [vmem:[#allocation11 + $0x2d0] sm:$0xff] }
 0x2d2   : > { %v3380_v36 = vpack.c.bf16 %v942_v33, %v934_v32  ;;  %v978_v32 = vld [vmem:[#allocation11 + $0x3f0] sm:$0xff] }
 0x2d4   : > { %3349 = vmatpush1.bf16.msra.mxu1 %v3348_v38  ;;  %v950_v38 = vld [vmem:[#allocation11 + $0x310] sm:$0xff] }
 0x2d5   : > { %3351 = vmatprep.subr.bf16.mxu1 %v3350_v39  ;;  %v958_v39 = vld [vmem:[#allocation11 + $0x350] sm:$0xff] }
 0x2d8   : > { %3353 = vmatpush1.bf16.msra.mxu1 %v3352_v42  ;;  %v3384_v42 = vpack.c.bf16 %v958_v39, %v950_v38  ;;  %v1474_v38 = vld [vmem:[#allocation14 + $0x38] sm:$0xff]  ;;  %v1467_v39 = vld [vmem:[#allocation14] sm:$0xff] }
 0x2d9   : > { %3355 = vmatprep.subr.bf16.mxu1 %v3354_v45  ;;  %v974_v45 = vld [vmem:[#allocation11 + $0x3d0] sm:$0xff] }
 0x2da   : > { %v3388_v48 = vpack.c.bf16 %v974_v45, %v966_v44  ;;  %v1473_v44 = vld [vmem:[#allocation14 + $0x30] sm:$0xff] }
 0x2dc   : > { %3357 = vmatpush1.bf16.msra.mxu1 %v3356_v49  ;;  %v3422_v49 = vpack.c.bf16 %v867_v47, %v859_v46  ;;  %v1480_v46 = vld [vmem:[#allocation14 + $0x68] sm:$0xff]  ;;  %v1482_v47 = vld [vmem:[#allocation14 + $0x78] sm:$0xff] }
 0x2dd   : > { %3359 = vmatprep.subr.bf16.mxu1 %v3358_v57  ;;  %v882_v57 = vld [vmem:[#allocation11 + $0xf0] sm:$0xff] }
 0x2de   : > { %v3428_v61 = vpack.c.bf16 %v882_v57, %v874_v56  ;;  %v1488_v56 = vld [vmem:[#allocation14 + $0xa8] sm:$0xff]  ;;  %v1486_v57 = vld [vmem:[#allocation14 + $0x98] sm:$0xff] }
 0x392   : > { %v3309_v60 = vpop.f32.mrb[2].mxu1 }
 0x393   : > { %v841_v63 = vpop.f32.mrb[3].mxu1  ;;  %v847_v4 = vadd.f32 %v3309_v60, %v3232_v59  ;;  %v899_v60 = vld [vmem:[#allocation11 + $0x178] sm:$0xff] }
 0x394   : > { %v842_v2 = vadd.f32 %v3232_v59, %v841_v63  ;;  %v891_v59 = vld [vmem:[#allocation11 + $0x138] sm:$0xff]  ;;  %v890_v63 = vld [vmem:[#allocation11 + $0x130] sm:$0xff] }
 0x395   : > { %v5228_v12 = vmax.f32 %v847_v4, 0.0  ;;  %v3430_v62 = vpack.c.bf16 %v899_v60, %v891_v59  ;;  %v1490_v60 = vld [vmem:[#allocation14 + $0xb8] sm:$0xff] }
 0x396   : > { %v5223_v5 = vmax.f32 %v842_v2, 0.0  ;;  %v915_v2 = vld [vmem:[#allocation11 + $0x1f8] sm:$0xff] }
 0x397   : > { %v3434_v4 = vpack.c.bf16 %v915_v2, %v907_v1  ;;  %v1485_v1 = vld [vmem:[#allocation14 + $0x90] sm:$0xff] }
 0x398   : > { %1087 = vmatmul.mubr.f32.vlgmr.msra.gmra.mrb[4].mxu1 %v5223_v5  ;;  %1241 = vmatmul.mubr.f32.vlgmr.msra.gmra.mrb[0].mxu0 %v5223_v5  ;;  %v1489_v2 = vld [vmem:[#allocation14 + $0xb0] sm:$0xff] }
 0x399   : > { %3361 = vmatpush1.bf16.msra.mxu1 %v3360_v3  ;;  %1092 = vmatprep.mubr.f32.mxu1 %v4796_v58  ;;  %v3432_v3 = vpack.c.bf16 %v898_v0, %v890_v63  ;;  %v3718_v63 = vpack.c.bf16 %v1490_v60, %v1486_v57  ;;  %v1527_v57 = vld [vmem:[#allocation14 + $0x1e0] sm:$0xff] }
 0x39a   : > { %3363 = vmatprep.subr.bf16.mxu1 %v3362_v6  ;;  %1246 = vmatprep.mubr.f32.mxu0 %v4796_v58  ;;  %v906_v6 = vld [vmem:[#allocation11 + $0x1b0] sm:$0xff] }
 0x39b   : > { %v3436_v10 = vpack.c.bf16 %v914_v7, %v906_v6  ;;  %v1496_v6 = vld [vmem:[#allocation14 + $0xe8] sm:$0xff]  ;;  %v1494_v7 = vld [vmem:[#allocation14 + $0xd8] sm:$0xff] }
 0x39c   : > { %1093 = vmatmul.mubr.f32.gmra.mrb[6].mxu1 %v5228_v12  ;;  %1247 = vmatmul.mubr.f32.gmra.mrb[2].mxu0 %v5228_v12 }
 0x39d   : > { %3365 = vmatpush1.bf16.msra.mxu1 %v3364_v11  ;;  %1163 = vmatprep.mubr.f32.mxu1 %v4796_v58  ;;  %v3438_v11 = vpack.c.bf16 %v931_v9, %v923_v8  ;;  %v1498_v9 = vld [vmem:[#allocation14 + $0xf8] sm:$0xff] }
 0x39e   : > { %3367 = vmatprep.subr.bf16.mxu1 %v3366_v13  ;;  %v922_v13 = vld [vmem:[#allocation11 + $0x230] sm:$0xff] }
 0x39f   : > { %v3440_v17 = vpack.c.bf16 %v930_v14, %v922_v13  ;;  %v3722_v13 = vpack.c.bf16 %v1498_v9, %v1494_v7  ;;  %v1535_v7 = vld [vmem:[#allocation14 + $0x220] sm:$0xff] }
 0x3a1   : > { %3369 = vmatpush1.bf16.msra.mxu1 %v3368_v18  ;;  %v3442_v18 = vpack.c.bf16 %v947_v16, %v939_v15  ;;  %v1493_v15 = vld [vmem:[#allocation14 + $0xd0] sm:$0xff] }
 0x3a2   : > { %3371 = vmatprep.subr.bf16.mxu1 %v3370_v19  ;;  %v938_v19 = vld [vmem:[#allocation11 + $0x2b0] sm:$0xff]  ;;  %v1497_v16 = vld [vmem:[#allocation14 + $0xf0] sm:$0xff] }
 0x3a3   : > { %v3444_v23 = vpack.c.bf16 %v946_v20, %v938_v19  ;;  %v1504_v19 = vld [vmem:[#allocation14 + $0x128] sm:$0xff]  ;;  %v1502_v20 = vld [vmem:[#allocation14 + $0x118] sm:$0xff] }
 0x3a5   : > { %3373 = vmatpush1.bf16.msra.mxu1 %v3372_v24  ;;  %v3446_v24 = vpack.c.bf16 %v963_v22, %v955_v21  ;;  %v1506_v22 = vld [vmem:[#allocation14 + $0x138] sm:$0xff] }
 0x3a6   : > { %3375 = vmatprep.subr.bf16.mxu1 %v3374_v25  ;;  %v954_v25 = vld [vmem:[#allocation11 + $0x330] sm:$0xff] }
 0x3a7   : > { %v3448_v29 = vpack.c.bf16 %v962_v26, %v954_v25  ;;  %v3726_v25 = vpack.c.bf16 %v1506_v22, %v1502_v20  ;;  %v1543_v20 = vld [vmem:[#allocation14 + $0x260] sm:$0xff] }
 0x3a9   : > { %3377 = vmatpush1.bf16.msra.mxu1 %v3376_v30  ;;  %v3450_v30 = vpack.c.bf16 %v979_v28, %v971_v27  ;;  %v1501_v27 = vld [vmem:[#allocation14 + $0x110] sm:$0xff] }
 0x3aa   : > { %3379 = vmatprep.subr.bf16.mxu1 %v3378_v31  ;;  %v970_v31 = vld [vmem:[#allocation11 + $0x3b0] sm:$0xff]  ;;  %v1505_v28 = vld [vmem:[#allocation14 + $0x130] sm:$0xff] }
 0x3ab   : > { %v3452_v33 = vpack.c.bf16 %v978_v32, %v970_v31  ;;  %v1512_v31 = vld [vmem:[#allocation14 + $0x168] sm:$0xff]  ;;  %v1510_v32 = vld [vmem:[#allocation14 + $0x158] sm:$0xff] }
 0x3ad   : > { %3381 = vmatpush1.bf16.msra.mxu1 %v3380_v36  ;;  %v1470_v36 = vld [vmem:[#allocation14 + $0x18] sm:$0xff] }
 0x3ae   : > { %3383 = vmatprep.subr.bf16.mxu1 %v3382_v37  ;;  %v3454_v37 = vpack.c.bf16 %v1472_v35, %v1468_v34  ;;  %v3710_v41 = vpack.c.bf16 %v1474_v38, %v1470_v36  ;;  %v1514_v34 = vld [vmem:[#allocation14 + $0x178] sm:$0xff]  ;;  %v1507_v35 = vld [vmem:[#allocation14 + $0x140] sm:$0xff] }
 0x3af   : > { %v1511_v36 = vld [vmem:[#allocation14 + $0x160] sm:$0xff] }
 0x3b0   : > { %3455 = vmatprep.subr.bf16.mxu0 %v3454_v37  ;;  %v3730_v37 = vpack.c.bf16 %v1514_v34, %v1510_v32  ;;  %v3476_v38 = vpack.c.bf16 %v1511_v36, %v1507_v35  ;;  %v1551_v32 = vld [vmem:[#allocation14 + $0x2a0] sm:$0xff]  ;;  %v1549_v35 = vld [vmem:[#allocation14 + $0x290] sm:$0xff] }
 0x3b1   : > { %3385 = vmatpush1.bf16.msra.mxu1 %v3384_v42  ;;  %v3456_v42 = vpack.c.bf16 %v1471_v40, %v1467_v39  ;;  %v1509_v39 = vld [vmem:[#allocation14 + $0x150] sm:$0xff] }
 0x3b2   : > { %3387 = vmatprep.subr.bf16.mxu1 %v3386_v43  ;;  %v1469_v43 = vld [vmem:[#allocation14 + $0x10] sm:$0xff] }
 0x3b3   : > { %v3712_v45 = vpack.c.bf16 %v1473_v44, %v1469_v43  ;;  %3457 = vmatpush1.bf16.msra.mxu0 %v3456_v42  ;;  %v1513_v40 = vld [vmem:[#allocation14 + $0x170] sm:$0xff]  ;;  %v1516_v42 = vld [vmem:[#allocation14 + $0x188] sm:$0xff]  ;;  %v1518_v44 = vld [vmem:[#allocation14 + $0x198] sm:$0xff] }
 0x3b4   : > { %v1520_v43 = vld [vmem:[#allocation14 + $0x1a8] sm:$0xff]  ;;  %v1553_v36 = vld [vmem:[#allocation14 + $0x2b0] sm:$0xff] }
 0x3b5   : > { %3389 = vmatpush1.bf16.msra.mxu1 %v3388_v48  ;;  %v1475_v48 = vld [vmem:[#allocation14 + $0x40] sm:$0xff] }
 0x3b6   : > { %3423 = vmatprep.subr.bf16.mxu1 %v3422_v49  ;;  %v1479_v49 = vld [vmem:[#allocation14 + $0x60] sm:$0xff] }
 0x3b7   : > { %v3460_v51 = vpack.c.bf16 %v1479_v49, %v1475_v48  ;;  %v1517_v48 = vld [vmem:[#allocation14 + $0x190] sm:$0xff] }
 0x3b8   : > { %1164 = vmatmul.mubr.f32.vlgmr.msra.gmra.mrb[8].mxu1 %v5223_v5  ;;  %v1521_v49 = vld [vmem:[#allocation14 + $0x1b0] sm:$0xff] }
 0x3b9   : > { %3425 = vmatpush1.bf16.msra.mxu1 %v3424_v54  ;;  %1169 = vmatprep.mubr.f32.mxu1 %v4796_v58  ;;  %v3716_v54 = vpack.c.bf16 %v1481_v53, %v1477_v52  ;;  %v1528_v52 = vld [vmem:[#allocation14 + $0x1e8] sm:$0xff]  ;;  %v1526_v53 = vld [vmem:[#allocation14 + $0x1d8] sm:$0xff] }
 0x3ba   : > { %3427 = vmatprep.subr.bf16.mxu1 %v3426_v55  ;;  %v1484_v55 = vld [vmem:[#allocation14 + $0x88] sm:$0xff] }
 0x3bb   : > { %v3462_v59 = vpack.c.bf16 %v1488_v56, %v1484_v55  ;;  %v1530_v55 = vld [vmem:[#allocation14 + $0x1f8] sm:$0xff]  ;;  %v1523_v56 = vld [vmem:[#allocation14 + $0x1c0] sm:$0xff] }
 0x3bc   : > { %1170 = vmatmul.mubr.f32.gmra.mrb[10].mxu1 %v5228_v12  ;;  %v3484_v60 = vpack.c.bf16 %v1527_v57, %v1523_v56  ;;  %v1565_v56 = vld [vmem:[#allocation14 + $0x310] sm:$0xff] }
 0x3bd   : > { %3429 = vmatpush1.bf16.msra.mxu1 %v3428_v61  ;;  %1317 = vmatprep.mubr.f32.mxu1 %v4796_v58  ;;  %v1483_v61 = vld [vmem:[#allocation14 + $0x80] sm:$0xff]  ;;  %v1569_v57 = vld [vmem:[#allocation14 + $0x330] sm:$0xff] }
 0x3be   : > { %3431 = vmatprep.subr.bf16.mxu1 %v3430_v62  ;;  %v1487_v62 = vld [vmem:[#allocation14 + $0xa0] sm:$0xff] }
 0x3bf   : > { %v3464_v0 = vpack.c.bf16 %v1487_v62, %v1483_v61  ;;  %v1525_v61 = vld [vmem:[#allocation14 + $0x1d0] sm:$0xff] }
 0x3c0   : > { %v1529_v62 = vld [vmem:[#allocation14 + $0x1f0] sm:$0xff] }
 0x3c1   : > { %3433 = vmatpush1.bf16.msra.mxu1 %v3432_v3  ;;  %v3720_v3 = vpack.c.bf16 %v1489_v2, %v1485_v1  ;;  %v1536_v1 = vld [vmem:[#allocation14 + $0x228] sm:$0xff]  ;;  %v1534_v2 = vld [vmem:[#allocation14 + $0x218] sm:$0xff] }
 0x3c2   : > { %3435 = vmatprep.subr.bf16.mxu1 %v3434_v4  ;;  %v1492_v4 = vld [vmem:[#allocation14 + $0xc8] sm:$0xff] }
 0x3c3   : > { %v3466_v8 = vpack.c.bf16 %v1496_v6, %v1492_v4  ;;  %v1538_v4 = vld [vmem:[#allocation14 + $0x238] sm:$0xff]  ;;  %v1531_v6 = vld [vmem:[#allocation14 + $0x200] sm:$0xff] }
 0x3c4   : > { %v3488_v9 = vpack.c.bf16 %v1535_v7, %v1531_v6  ;;  %v1573_v6 = vld [vmem:[#allocation14 + $0x350] sm:$0xff] }
 0x3c5   : > { %3437 = vmatpush1.bf16.msra.mxu1 %v3436_v10  ;;  %v1491_v10 = vld [vmem:[#allocation14 + $0xc0] sm:$0xff]  ;;  %v1577_v7 = vld [vmem:[#allocation14 + $0x370] sm:$0xff] }
 0x3c6   : > { %3439 = vmatprep.subr.bf16.mxu1 %v3438_v11  ;;  %v1495_v11 = vld [vmem:[#allocation14 + $0xe0] sm:$0xff] }
 0x3c7   : > { %v3468_v14 = vpack.c.bf16 %v1495_v11, %v1491_v10  ;;  %v1533_v10 = vld [vmem:[#allocation14 + $0x210] sm:$0xff] }
 0x3c8   : > { %v1537_v11 = vld [vmem:[#allocation14 + $0x230] sm:$0xff] }
 0x3c9   : > { %3441 = vmatpush1.bf16.msra.mxu1 %v3440_v17  ;;  %v3724_v17 = vpack.c.bf16 %v1497_v16, %v1493_v15  ;;  %v1544_v15 = vld [vmem:[#allocation14 + $0x268] sm:$0xff]  ;;  %v1542_v16 = vld [vmem:[#allocation14 + $0x258] sm:$0xff] }
 0x3ca   : > { %3443 = vmatprep.subr.bf16.mxu1 %v3442_v18  ;;  %v1500_v18 = vld [vmem:[#allocation14 + $0x108] sm:$0xff] }
 0x3cb   : > { %v3470_v21 = vpack.c.bf16 %v1504_v19, %v1500_v18  ;;  %v1546_v18 = vld [vmem:[#allocation14 + $0x278] sm:$0xff]  ;;  %v1539_v19 = vld [vmem:[#allocation14 + $0x240] sm:$0xff] }
 0x3cc   : > { %v3492_v22 = vpack.c.bf16 %v1543_v20, %v1539_v19  ;;  %v1581_v19 = vld [vmem:[#allocation14 + $0x390] sm:$0xff] }
 0x3cd   : > { %3445 = vmatpush1.bf16.msra.mxu1 %v3444_v23  ;;  %v1499_v23 = vld [vmem:[#allocation14 + $0x100] sm:$0xff]  ;;  %v1585_v20 = vld [vmem:[#allocation14 + $0x3b0] sm:$0xff] }
 0x3ce   : > { %3447 = vmatprep.subr.bf16.mxu1 %v3446_v24  ;;  %v1503_v24 = vld [vmem:[#allocation14 + $0x120] sm:$0xff] }
 0x3cf   : > { %v3472_v26 = vpack.c.bf16 %v1503_v24, %v1499_v23  ;;  %v1541_v23 = vld [vmem:[#allocation14 + $0x250] sm:$0xff] }
 0x3d0   : > { %v1545_v24 = vld [vmem:[#allocation14 + $0x270] sm:$0xff] }
 0x3d1   : > { %3449 = vmatpush1.bf16.msra.mxu1 %v3448_v29  ;;  %v3728_v29 = vpack.c.bf16 %v1505_v28, %v1501_v27  ;;  %v1552_v27 = vld [vmem:[#allocation14 + $0x2a8] sm:$0xff]  ;;  %v1550_v28 = vld [vmem:[#allocation14 + $0x298] sm:$0xff] }
 0x3d2   : > { %3451 = vmatprep.subr.bf16.mxu1 %v3450_v30  ;;  %v1508_v30 = vld [vmem:[#allocation14 + $0x148] sm:$0xff] }
 0x3d5   : > { %3453 = vmatpush1.bf16.msra.mxu1 %v3452_v33  ;;  %v3474_v33 = vpack.c.bf16 %v1512_v31, %v1508_v30  ;;  %v1554_v30 = vld [vmem:[#allocation14 + $0x2b8] sm:$0xff]  ;;  %v1547_v31 = vld [vmem:[#allocation14 + $0x280] sm:$0xff] }
 0x3d6   : > { %3711 = vmatprep.subr.bf16.mxu1 %v3710_v41  ;;  %v3732_v41 = vpack.c.bf16 %v1513_v40, %v1509_v39  ;;  %v3496_v34 = vpack.c.bf16 %v1551_v32, %v1547_v31  ;;  %v1560_v39 = vld [vmem:[#allocation14 + $0x2e8] sm:$0xff]  ;;  %v1558_v40 = vld [vmem:[#allocation14 + $0x2d8] sm:$0xff]  ;;  %v1589_v31 = vld [vmem:[#allocation14 + $0x3d0] sm:$0xff] }
 0x3d7   : > { %v1593_v32 = vld [vmem:[#allocation14 + $0x3f0] sm:$0xff] }
 0x3d8   : > { %1318 = vmatmul.mubr.f32.vlgmr.msra.gmra.mrb[12].mxu1 %v5223_v5  ;;  %v1476_v5 = vld [vmem:[#allocation14 + $0x48] sm:$0xff] }
 0x3d9   : > { %1323 = vmatprep.mubr.f32.mxu1 %v4796_v58  ;;  %v1478_v58 = vld [vmem:[#allocation14 + $0x58] sm:$0xff]  ;;  %3713 = vmatpush1.bf16.msra.mxu1 %v3712_v45  ;;  %v3478_v45 = vpack.c.bf16 %v1520_v43, %v1516_v42  ;;  %v1555_v43 = vld [vmem:[#allocation14 + $0x2c0] sm:$0xff] }
 0x3da   : > { %v3714_v50 = vpack.c.bf16 %v1482_v47, %v1478_v58  ;;  %v1519_v58 = vld [vmem:[#allocation14 + $0x1a0] sm:$0xff]  ;;  %v1562_v42 = vld [vmem:[#allocation14 + $0x2f8] sm:$0xff] }
 0x3dc   : > { %1324 = vmatmul.mubr.f32.gmra.mrb[14].mxu1 %v5228_v12  ;;  %v3458_v12 = vpack.c.bf16 %v1480_v46, %v1476_v5  ;;  %3715 = vmatprep.subr.bf16.mxu1 %v3714_v50  ;;  %v1522_v5 = vld [vmem:[#allocation14 + $0x1b8] sm:$0xff]  ;;  %v1515_v46 = vld [vmem:[#allocation14 + $0x180] sm:$0xff]  ;;  %v3736_v50 = vpack.c.bf16 %v1521_v49, %v1517_v48  ;;  %v1568_v48 = vld [vmem:[#allocation14 + $0x328] sm:$0xff] }
 0x3dd   : > { %3717 = vmatpush1.bf16.msra.mxu1 %v3716_v54  ;;  %v3480_v47 = vpack.c.bf16 %v1519_v58, %v1515_v46  ;;  %v1557_v46 = vld [vmem:[#allocation14 + $0x2d0] sm:$0xff]  ;;  %v1566_v49 = vld [vmem:[#allocation14 + $0x318] sm:$0xff] }
 0x3de   : > { %3459 = vmatprep.subr.bf16.mxu0 %v3458_v12  ;;  %3719 = vmatprep.subr.bf16.mxu1 %v3718_v63  ;;  %v3734_v12 = vpack.c.bf16 %v1522_v5, %v1518_v44  ;;  %v3740_v63 = vpack.c.bf16 %v1529_v62, %v1525_v61  ;;  %v1559_v44 = vld [vmem:[#allocation14 + $0x2e0] sm:$0xff]  ;;  %v1561_v58 = vld [vmem:[#allocation14 + $0x2f0] sm:$0xff]  ;;  %v1576_v61 = vld [vmem:[#allocation14 + $0x368] sm:$0xff] }
 0x3df   : > { %3461 = vmatpush1.bf16.msra.mxu0 %v3460_v51  ;;  %v1524_v51 = vld [vmem:[#allocation14 + $0x1c8] sm:$0xff]  ;;  %v3500_v5 = vpack.c.bf16 %v1559_v44, %v1555_v43  ;;  %v1574_v62 = vld [vmem:[#allocation14 + $0x358] sm:$0xff] }
 0x3e0   : > { %3463 = vmatprep.subr.bf16.mxu0 %v3462_v59  ;;  %v3482_v54 = vpack.c.bf16 %v1528_v52, %v1524_v51  ;;  %v3738_v59 = vpack.c.bf16 %v1530_v55, %v1526_v53  ;;  %v1570_v51 = vld [vmem:[#allocation14 + $0x338] sm:$0xff]  ;;  %v1563_v52 = vld [vmem:[#allocation14 + $0x300] sm:$0xff] }
 0x3e1   : > { %3721 = vmatpush1.bf16.msra.mxu1 %v3720_v3  ;;  %v1567_v53 = vld [vmem:[#allocation14 + $0x320] sm:$0xff]  ;;  %v5247_v44 = vld [vmem:[#allocation12] sm:$0xff] }
 0x3e2   : > { %3723 = vmatprep.subr.bf16.mxu1 %v3722_v13  ;;  %v3744_v13 = vpack.c.bf16 %v1537_v11, %v1533_v10  ;;  %v3504_v55 = vpack.c.bf16 %v1567_v53, %v1563_v52  ;;  %v1584_v10 = vld [vmem:[#allocation14 + $0x3a8] sm:$0xff]  ;;  %v1582_v11 = vld [vmem:[#allocation14 + $0x398] sm:$0xff] }
 0x3e3   : > { %3465 = vmatpush1.bf16.msra.mxu0 %v3464_v0  ;;  %v1532_v0 = vld [vmem:[#allocation14 + $0x208] sm:$0xff] }
 0x3e4   : > { %3467 = vmatprep.subr.bf16.mxu0 %v3466_v8  ;;  %v3486_v3 = vpack.c.bf16 %v1536_v1, %v1532_v0  ;;  %v3742_v8 = vpack.c.bf16 %v1538_v4, %v1534_v2  ;;  %v1578_v0 = vld [vmem:[#allocation14 + $0x378] sm:$0xff]  ;;  %v1571_v1 = vld [vmem:[#allocation14 + $0x340] sm:$0xff] }
 0x3e5   : > { %3725 = vmatpush1.bf16.msra.mxu1 %v3724_v17  ;;  %v1575_v2 = vld [vmem:[#allocation14 + $0x360] sm:$0xff] }
 0x3e6   : > { %3727 = vmatprep.subr.bf16.mxu1 %v3726_v25  ;;  %v3748_v25 = vpack.c.bf16 %v1545_v24, %v1541_v23  ;;  %v3508_v4 = vpack.c.bf16 %v1575_v2, %v1571_v1  ;;  %v1592_v23 = vld [vmem:[#allocation14 + $0x3e8] sm:$0xff]  ;;  %v1590_v24 = vld [vmem:[#allocation14 + $0x3d8] sm:$0xff] }
 0x3e7   : > { %3469 = vmatpush1.bf16.msra.mxu0 %v3468_v14  ;;  %v1540_v14 = vld [vmem:[#allocation14 + $0x248] sm:$0xff] }
 0x3e8   : > { %3471 = vmatprep.subr.bf16.mxu0 %v3470_v21  ;;  %v3490_v17 = vpack.c.bf16 %v1544_v15, %v1540_v14  ;;  %v3746_v21 = vpack.c.bf16 %v1546_v18, %v1542_v16  ;;  %v1586_v14 = vld [vmem:[#allocation14 + $0x3b8] sm:$0xff]  ;;  %v1579_v15 = vld [vmem:[#allocation14 + $0x380] sm:$0xff] }
 0x3e9   : > { %3729 = vmatpush1.bf16.msra.mxu1 %v3728_v29  ;;  %v1583_v16 = vld [vmem:[#allocation14 + $0x3a0] sm:$0xff] }
 0x3ea   : > { %3731 = vmatprep.subr.bf16.mxu1 %v3730_v37  ;;  %v3752_v37 = vpack.c.bf16 %v1553_v36, %v1549_v35  ;;  %v3512_v18 = vpack.c.bf16 %v1583_v16, %v1579_v15  ;;  %v1600_v35 = vld [vmem:[#allocation14 + $0x428] sm:$0xff]  ;;  %v1598_v36 = vld [vmem:[#allocation14 + $0x418] sm:$0xff] }
 0x3eb   : > { %3473 = vmatpush1.bf16.msra.mxu0 %v3472_v26  ;;  %v1548_v26 = vld [vmem:[#allocation14 + $0x288] sm:$0xff] }
 0x3ec   : > { %3475 = vmatprep.subr.bf16.mxu0 %v3474_v33  ;;  %v3494_v29 = vpack.c.bf16 %v1552_v27, %v1548_v26  ;;  %v3750_v33 = vpack.c.bf16 %v1554_v30, %v1550_v28  ;;  %v1594_v26 = vld [vmem:[#allocation14 + $0x3f8] sm:$0xff]  ;;  %v1587_v27 = vld [vmem:[#allocation14 + $0x3c0] sm:$0xff] }
 0x3ed   : > { %3733 = vmatpush1.bf16.msra.mxu1 %v3732_v41  ;;  %v1591_v28 = vld [vmem:[#allocation14 + $0x3e0] sm:$0xff] }
 0x3ee   : > { %3735 = vmatprep.subr.bf16.mxu1 %v3734_v12  ;;  %v3756_v12 = vpack.c.bf16 %v1561_v58, %v1557_v46  ;;  %v3516_v30 = vpack.c.bf16 %v1591_v28, %v1587_v27 }
 0x3ef   : > { %3477 = vmatpush1.bf16.msra.mxu0 %v3476_v38  ;;  %v1556_v38 = vld [vmem:[#allocation14 + $0x2c8] sm:$0xff] }
 0x3f0   : > { %3479 = vmatprep.subr.bf16.mxu0 %v3478_v45  ;;  %v3498_v41 = vpack.c.bf16 %v1560_v39, %v1556_v38  ;;  %v3754_v45 = vpack.c.bf16 %v1562_v42, %v1558_v40  ;;  %v1602_v38 = vld [vmem:[#allocation14 + $0x438] sm:$0xff]  ;;  %v982_v40 = vlaneseq }
 0x3f1   : > { %3737 = vmatpush1.bf16.msra.mxu1 %v3736_v50  ;;  %v3774_v39 = vpack.c.bf16 %v1602_v38, %v1598_v36 }
 0x3f2   : > { %3739 = vmatprep.subr.bf16.mxu1 %v3738_v59  ;;  %v3760_v59 = vpack.c.bf16 %v1569_v57, %v1565_v56 }
 0x3f3   : > { %3481 = vmatpush1.bf16.msra.mxu0 %v3480_v47  ;;  %v1564_v47 = vld [vmem:[#allocation14 + $0x308] sm:$0xff] }
 0x3f4   : > { %3483 = vmatprep.subr.bf16.mxu0 %v3482_v54  ;;  %v3502_v50 = vpack.c.bf16 %v1568_v48, %v1564_v47  ;;  %v3758_v54 = vpack.c.bf16 %v1570_v51, %v1566_v49 }
 0x3f5   : > { %3741 = vmatpush1.bf16.msra.mxu1 %v3740_v63 }
 0x3f6   : > { %3743 = vmatprep.subr.bf16.mxu1 %v3742_v8  ;;  %v3764_v8 = vpack.c.bf16 %v1577_v7, %v1573_v6 }
 0x3f7   : > { %3485 = vmatpush1.bf16.msra.mxu0 %v3484_v60  ;;  %v1572_v60 = vld [vmem:[#allocation14 + $0x348] sm:$0xff] }
 0x3f8   : > { %3487 = vmatprep.subr.bf16.mxu0 %v3486_v3  ;;  %v3506_v63 = vpack.c.bf16 %v1576_v61, %v1572_v60  ;;  %v3762_v3 = vpack.c.bf16 %v1578_v0, %v1574_v62 }
 0x3f9   : > { %3745 = vmatpush1.bf16.msra.mxu1 %v3744_v13 }
 0x3fa   : > { %3747 = vmatprep.subr.bf16.mxu1 %v3746_v21  ;;  %v3768_v21 = vpack.c.bf16 %v1585_v20, %v1581_v19 }
 0x3fb   : > { %3489 = vmatpush1.bf16.msra.mxu0 %v3488_v9  ;;  %v1580_v9 = vld [vmem:[#allocation14 + $0x388] sm:$0xff] }
 0x3fc   : > { %3491 = vmatprep.subr.bf16.mxu0 %v3490_v17  ;;  %v3510_v13 = vpack.c.bf16 %v1584_v10, %v1580_v9  ;;  %v3766_v17 = vpack.c.bf16 %v1586_v14, %v1582_v11 }
 0x3fd   : > { %3749 = vmatpush1.bf16.msra.mxu1 %v3748_v25 }
 0x3fe   : > { %3751 = vmatprep.subr.bf16.mxu1 %v3750_v33  ;;  %v3772_v33 = vpack.c.bf16 %v1593_v32, %v1589_v31 }
 0x3ff   : > { %3493 = vmatpush1.bf16.msra.mxu0 %v3492_v22  ;;  %v1588_v22 = vld [vmem:[#allocation14 + $0x3c8] sm:$0xff] }
 0x400   : > { %3495 = vmatprep.subr.bf16.mxu0 %v3494_v29  ;;  %v3514_v25 = vpack.c.bf16 %v1592_v23, %v1588_v22  ;;  %v3770_v29 = vpack.c.bf16 %v1594_v26, %v1590_v24 }
 0x401   : > { %3753 = vmatpush1.bf16.msra.mxu1 %v3752_v37 }
 0x402   : > { %3755 = vmatprep.subr.bf16.mxu1 %v3754_v45 }
 0x403   : > { %3497 = vmatpush1.bf16.msra.mxu0 %v3496_v34  ;;  %v1596_v34 = vld [vmem:[#allocation14 + $0x408] sm:$0xff] }
 0x404   : > { %3499 = vmatprep.subr.bf16.mxu0 %v3498_v41  ;;  %v3518_v37 = vpack.c.bf16 %v1600_v35, %v1596_v34  ;;  %v5241_v41 = vshrl.u32 %v982_v40, 7 }
 0x405   : > { %3757 = vmatpush1.bf16.msra.mxu1 %v3756_v12 }
 0x406   : > { %3759 = vmatprep.subr.bf16.mxu1 %v3758_v54  ;;  %v5244_v42 = vsub.s32 0, %v5241_v41  ;;  %v1000_v43 = vsub.s32 4, %v5241_v41  ;;  %v5250_v45 = vsub.s32 1, %v5241_v41 }
 0x407   : > { %3501 = vmatpush1.bf16.msra.mxu0 %v3500_v5  ;;  %v1004_v5 = vsub.s32 5, %v5241_v41 }
 0x408   : > { %3503 = vmatprep.subr.bf16.mxu0 %v3502_v50  ;;  %v985_v46 = vrot.slane %v5247_v44, %v5244_v42  ;;  %v1001_v58 = vrot.slane %v5247_v44, %v1000_v43  ;;  %v989_v48 = vrot.slane %v5247_v44, %v5250_v45 }
 0x409   : > { %3761 = vmatpush1.bf16.msra.mxu1 %v3760_v59  ;;  %v1005_v49 = vrot.slane %v5247_v44, %v1004_v5 }
 0x40a   : > { %3763 = vmatprep.subr.bf16.mxu1 %v3762_v3 }
 0x40b   : > { %3505 = vmatpush1.bf16.msra.mxu0 %v3504_v55 }
 0x40c   : > { %3507 = vmatprep.subr.bf16.mxu0 %v3506_v63 }
 0x40d   : > { %3765 = vmatpush1.bf16.msra.mxu1 %v3764_v8 }
 0x40e   : > { %3767 = vmatprep.subr.bf16.mxu1 %v3766_v17 }
 0x40f   : > { %3509 = vmatpush1.bf16.msra.mxu0 %v3508_v4 }
 0x410   : > { %3511 = vmatprep.subr.bf16.mxu0 %v3510_v13 }
 0x411   : > { %3769 = vmatpush1.bf16.msra.mxu1 %v3768_v21 }
 0x412   : > { %3771 = vmatprep.subr.bf16.mxu1 %v3770_v29 }
 0x413   : > { %3513 = vmatpush1.bf16.msra.mxu0 %v3512_v18 }
 0x414   : > { %3515 = vmatprep.subr.bf16.mxu0 %v3514_v25 }
 0x415   : > { %3773 = vmatpush1.bf16.msra.mxu1 %v3772_v33 }
 0x416   : > { %3775 = vmatprep.subr.bf16.mxu1 %v3774_v39 }
 0x417   : > { %3517 = vmatpush1.bf16.msra.mxu0 %v3516_v30 }
 0x418   : > { %3519 = vmatprep.subr.bf16.mxu0 %v3518_v37 }
 0x46b   : > { %v1088_v12 = vpop.f32.mrb[4].mxu1  ;;  %v1242_v47 = vpop.f32.mrb[0].mxu0 }
 0x46c   : > { %v1090_v50 = vpop.f32.mrb[5].mxu1  ;;  %v1244_v51 = vpop.f32.mrb[1].mxu0  ;;  %v1089_v52 = vadd.f32 %v1088_v12, %v985_v46  ;;  %v1243_v53 = vadd.f32 %v1242_v47, %v1001_v58 }
 0x46d   : > { %v1091_v54 = vadd.f32 %v1090_v50, %v989_v48  ;;  %v1245_v55 = vadd.f32 %v1244_v51, %v1005_v49 }
 0x46e   : > { %v1330_v1 = vmax.f32 %v1089_v52, 0.0  ;;  %v1334_v2 = vmax.f32 %v1243_v53, 0.0 }
 0x46f   : > { %v1094_v56 = vpop.f32.mrb[6].mxu1  ;;  %v1248_v57 = vpop.f32.mrb[2].mxu0  ;;  %v1331_v6 = vmax.f32 %v1091_v54, 0.0  ;;  %v1335_v7 = vmax.f32 %v1245_v55, 0.0 }
 0x470   : > { %v1095_v59 = vadd.f32 %v1094_v56, %v985_v46  ;;  %v1249_v60 = vadd.f32 %v1248_v57, %v1001_v58  ;;  %v1096_v61 = vpop.f32.mrb[7].mxu1  ;;  %v1250_v62 = vpop.f32.mrb[3].mxu0  ;;  %v5270_v46 = vsub.s32 2, %v5241_v41  ;;  %v5273_v58 = vsub.s32 3, %v5241_v41 }
 0x471   : > { %v1097_v63 = vadd.f32 %v1096_v61, %v989_v48  ;;  %v1251_v0 = vadd.f32 %v1250_v62, %v1005_v49 }
 0x472   : > { %v1338_v3 = vmax.f32 %v1095_v59, 0.0  ;;  %v1342_v4 = vmax.f32 %v1249_v60, 0.0  ;;  %v993_v12 = vrot.slane %v5247_v44, %v5270_v46  ;;  %v997_v48 = vrot.slane %v5247_v44, %v5273_v58 }
 0x473   : > { %v1339_v8 = vmax.f32 %v1097_v63, 0.0  ;;  %v1343_v9 = vmax.f32 %v1251_v0, 0.0 }
 0x474   : > { %v1346_v10 = vmax.f32 %v1330_v1, %v1338_v3  ;;  %v1374_v11 = vmax.f32 %v1334_v2, %v1342_v4  ;;  %v4797_v2 = vmov 1966171168  }
 0x475   : > { %v1353_v13 = vmax.f32 %v1331_v6, %v1339_v8  ;;  %v1381_v14 = vmax.f32 %v1335_v7, %v1343_v9  ;;  %v1416_v3 = vunpack.c.l.s4 %v4797_v2  ;;  %v1599_v2 = vld [vmem:[#allocation14 + $0x420] sm:$0xff] }
 0x476   : > { %v1347_v15 = vrot.slane %v1346_v10, 4  ;;  %v1375_v16 = vrot.slane %v1374_v11, 4 }
 0x477   : > { %v1354_v17 = vrot.slane %v1353_v13, 4  ;;  %v1382_v18 = vrot.slane %v1381_v14, 4  ;;  %v1417_v9 = vunpack.c.0.s8 %v1416_v3  ;;  %v1597_v3 = vld [vmem:[#allocation14 + $0x410] sm:$0xff] }
 0x478   : > { %v1348_v19 = vmax.f32 %v1346_v10, %v1347_v15  ;;  %v1376_v20 = vmax.f32 %v1374_v11, %v1375_v16 }
 0x479   : > { %v1355_v21 = vmax.f32 %v1353_v13, %v1354_v17  ;;  %v1383_v22 = vmax.f32 %v1381_v14, %v1382_v18  ;;  %v1420_v15 = vsub.s32 %v1417_v9, %v5241_v41  ;;  %v1606_v9 = vld [vmem:[#allocation14 + $0x458] sm:$0xff] }
 0x47a   : > { %v1349_v23 = vrot.slane %v1348_v19, 2  ;;  %v1377_v24 = vrot.slane %v1376_v20, 2 }
 0x47b   : > { %v1356_v25 = vrot.slane %v1355_v21, 2  ;;  %v1384_v26 = vrot.slane %v1383_v22, 2 }
 0x47c   : > { %v1350_v27 = vmax.f32 %v1348_v19, %v1349_v23  ;;  %v1378_v28 = vmax.f32 %v1376_v20, %v1377_v24  ;;  %v1008_v20 = vsub.s32 6, %v5241_v41 }
 0x47d   : > { %v1357_v29 = vmax.f32 %v1355_v21, %v1356_v25  ;;  %v1385_v30 = vmax.f32 %v1383_v22, %v1384_v26  ;;  %v1012_v22 = vsub.s32 7, %v5241_v41 }
 0x47e   : > { %v1351_v31 = vrot.slane %v1350_v27, 1  ;;  %v1379_v32 = vrot.slane %v1378_v28, 1  ;;  %v1009_v23 = vrot.slane %v5247_v44, %v1008_v20 }
 0x47f   : > { %v1358_v33 = vrot.slane %v1357_v29, 1  ;;  %v1386_v34 = vrot.slane %v1385_v30, 1  ;;  %v1013_v25 = vrot.slane %v5247_v44, %v1012_v22 }
 0x480   : > { %v1352_v35 = vmax.f32 %v1350_v27, %v1351_v31  ;;  %v5263_v36 = vmax.f32 %v1378_v28, %v1379_v32 }
 0x481   : > { %v1359_v37 = vmax.f32 %v1357_v29, %v1358_v33  ;;  %v5265_v38 = vmax.f32 %v1385_v30, %v1386_v34 }
 0x483   : > { %v1411_v39 = vcombine.low %v1352_v35, %v1359_v37  ;;  %v1413_v40 = vcombine.low %v5263_v36, %v5265_v38 }
 0x485   : > { %v1421_v18 = vrot.slane %v1411_v39, %v1420_v15 }
 0x48b   : > { %v1165_v47 = vpop.f32.mrb[8].mxu1 }
 0x48c   : > { %v1167_v49 = vpop.f32.mrb[9].mxu1  ;;  %v1166_v50 = vadd.f32 %v1165_v47, %v993_v12 }
 0x48d   : > { %v1168_v51 = vadd.f32 %v1167_v49, %v997_v48 }
 0x48e   : > { %v1332_v56 = vmax.f32 %v1166_v50, 0.0 }
 0x48f   : > { %v1171_v52 = vpop.f32.mrb[10].mxu1  ;;  %v1333_v59 = vmax.f32 %v1168_v51, 0.0 }
 0x490   : > { %v1172_v53 = vadd.f32 %v1171_v52, %v993_v12  ;;  %v1173_v54 = vpop.f32.mrb[11].mxu1 }
 0x491   : > { %v1174_v55 = vadd.f32 %v1173_v54, %v997_v48 }
 0x492   : > { %v1340_v57 = vmax.f32 %v1172_v53, 0.0 }
 0x493   : > { %v1341_v60 = vmax.f32 %v1174_v55, 0.0 }
 0x494   : > { %v1360_v61 = vmax.f32 %v1332_v56, %v1340_v57 }
 0x495   : > { %v1367_v62 = vmax.f32 %v1333_v59, %v1341_v60  ;;  %v1435_v60 = vrot.slane %v1413_v40, %v1420_v15 }
 0x496   : > { %v1361_v63 = vrot.slane %v1360_v61, 4 }
 0x497   : > { %v1368_v0 = vrot.slane %v1367_v62, 4 }
 0x498   : > { %v1362_v1 = vmax.f32 %v1360_v61, %v1361_v63 }
 0x499   : > { %v1369_v4 = vmax.f32 %v1367_v62, %v1368_v0 }
 0x49a   : > { %v1363_v6 = vrot.slane %v1362_v1, 2 }
 0x49b   : > { %v1370_v7 = vrot.slane %v1369_v4, 2 }
 0x49c   : > { %v1364_v8 = vmax.f32 %v1362_v1, %v1363_v6  ;;  %v1595_v1 = vld [vmem:[#allocation14 + $0x400] sm:$0xff] }
 0x49d   : > { %v1371_v10 = vmax.f32 %v1369_v4, %v1370_v7  ;;  %v1601_v4 = vld [vmem:[#allocation14 + $0x430] sm:$0xff]  ;;  %v1604_v7 = vld [vmem:[#allocation14 + $0x448] sm:$0xff]  ;;  %v3520_v38 = vpack.c.bf16 %v1599_v2, %v1595_v1 }
 0x49e   : > { %v1365_v11 = vrot.slane %v1364_v8, 1  ;;  %v3776_v40 = vpack.c.bf16 %v1601_v4, %v1597_v3  ;;  %v1633_v1 = vld [vmem:[#allocation14 + $0x530] sm:$0xff]  ;;  %v1636_v2 = vld [vmem:[#allocation14 + $0x548] sm:$0xff]  ;;  %v1638_v4 = vld [vmem:[#allocation14 + $0x558] sm:$0xff] }
 0x49f   : > { %v1372_v13 = vrot.slane %v1371_v10, 1  ;;  %v1640_v3 = vld [vmem:[#allocation14 + $0x568] sm:$0xff] }
 0x4a0   : > { %v1366_v14 = vmax.f32 %v1364_v8, %v1365_v11  ;;  %v1608_v8 = vld [vmem:[#allocation14 + $0x468] sm:$0xff] }
 0x4a1   : > { %v1373_v16 = vmax.f32 %v1371_v10, %v1372_v13  ;;  %v1610_v10 = vld [vmem:[#allocation14 + $0x478] sm:$0xff]  ;;  %v1603_v13 = vld [vmem:[#allocation14 + $0x440] sm:$0xff] }
 0x4a3   : > { %v1412_v17 = vcombine.low %v1366_v14, %v1373_v16  ;;  %v1607_v14 = vld [vmem:[#allocation14 + $0x460] sm:$0xff]  ;;  %v1609_v16 = vld [vmem:[#allocation14 + $0x470] sm:$0xff] }
 0x4a5   : > { %v1428_v19 = vrot.slane %v1412_v17, %v1420_v15  ;;  %v1612_v17 = vld [vmem:[#allocation14 + $0x488] sm:$0xff] }
 0x4a7   : > { %v1443_v21 = vcombine.low %v1421_v18, %v1428_v19  ;;  %v3522_v18 = vpack.c.bf16 %v1608_v8, %v1604_v7  ;;  %v3778_v19 = vpack.c.bf16 %v1610_v10, %v1606_v9  ;;  %v1642_v7 = vld [vmem:[#allocation14 + $0x578] sm:$0xff]  ;;  %v1635_v10 = vld [vmem:[#allocation14 + $0x540] sm:$0xff] }
 0x4a9   : > { %v1451_v63 = vrot.slane %v1443_v21, %v1420_v15  ;;  %v1616_v21 = vld [vmem:[#allocation14 + $0x4a8] sm:$0xff] }
 0x4ab   : > { %v1319_v24 = vpop.f32.mrb[12].mxu1 }
 0x4ac   : > { %v1321_v26 = vpop.f32.mrb[13].mxu1  ;;  %v1320_v27 = vadd.f32 %v1319_v24, %v1009_v23  ;;  %v1618_v24 = vld [vmem:[#allocation14 + $0x4b8] sm:$0xff] }
 0x4ad   : > { %v1322_v28 = vadd.f32 %v1321_v26, %v1013_v25  ;;  %v3524_v26 = vpack.c.bf16 %v1607_v14, %v1603_v13  ;;  %v1641_v13 = vld [vmem:[#allocation14 + $0x570] sm:$0xff]  ;;  %v1644_v14 = vld [vmem:[#allocation14 + $0x588] sm:$0xff] }
 0x4ae   : > { %v1336_v33 = vmax.f32 %v1320_v27, 0.0 }
 0x4af   : > { %v1325_v29 = vpop.f32.mrb[14].mxu1  ;;  %v1337_v35 = vmax.f32 %v1322_v28, 0.0  ;;  %v1611_v28 = vld [vmem:[#allocation14 + $0x480] sm:$0xff] }
 0x4b0   : > { %v1326_v30 = vadd.f32 %v1325_v29, %v1009_v23  ;;  %v1327_v31 = vpop.f32.mrb[15].mxu1  ;;  %v1614_v23 = vld [vmem:[#allocation14 + $0x498] sm:$0xff]  ;;  %v1615_v29 = vld [vmem:[#allocation14 + $0x4a0] sm:$0xff] }
 0x4b1   : > { %v1328_v32 = vadd.f32 %v1327_v31, %v1013_v25  ;;  %v3782_v31 = vpack.c.bf16 %v1618_v24, %v1614_v23  ;;  %v1647_v23 = vld [vmem:[#allocation14 + $0x5a0] sm:$0xff] }
 0x4b2   : > { %v1344_v34 = vmax.f32 %v1326_v30, 0.0  ;;  %v3526_v30 = vpack.c.bf16 %v1616_v21, %v1612_v17  ;;  %v1650_v17 = vld [vmem:[#allocation14 + $0x5b8] sm:$0xff]  ;;  %v1643_v21 = vld [vmem:[#allocation14 + $0x580] sm:$0xff] }
 0x4b3   : > { %v1345_v37 = vmax.f32 %v1328_v32, 0.0  ;;  %v1613_v32 = vld [vmem:[#allocation14 + $0x490] sm:$0xff] }
 0x4b4   : > { %v1388_v39 = vmax.f32 %v1336_v33, %v1344_v34  ;;  %v1617_v33 = vld [vmem:[#allocation14 + $0x4b0] sm:$0xff]  ;;  %v1620_v34 = vld [vmem:[#allocation14 + $0x4c8] sm:$0xff] }
 0x4b5   : > { %v1395_v12 = vmax.f32 %v1337_v35, %v1345_v37  ;;  %v1624_v35 = vld [vmem:[#allocation14 + $0x4e8] sm:$0xff]  ;;  %v1622_v37 = vld [vmem:[#allocation14 + $0x4d8] sm:$0xff] }
 0x4b6   : > { %v1389_v47 = vrot.slane %v1388_v39, 4 }
 0x4b7   : > { %v1396_v48 = vrot.slane %v1395_v12, 4 }
 0x4b8   : > { %v1390_v49 = vmax.f32 %v1388_v39, %v1389_v47  ;;  %v1626_v39 = vld [vmem:[#allocation14 + $0x4f8] sm:$0xff]  ;;  %v3784_v47 = vpack.c.bf16 %v1617_v33, %v1613_v32  ;;  %v3544_v32 = vpack.c.bf16 %v1647_v23, %v1643_v21  ;;  %v1684_v21 = vld [vmem:[#allocation14 + $0x6c8] sm:$0xff] }
 0x4b9   : > { %v1397_v50 = vmax.f32 %v1395_v12, %v1396_v48  ;;  %v3528_v12 = vpack.c.bf16 %v1615_v29, %v1611_v28  ;;  %v1619_v48 = vld [vmem:[#allocation14 + $0x4c0] sm:$0xff]  ;;  %v1652_v28 = vld [vmem:[#allocation14 + $0x5c8] sm:$0xff] }
 0x4ba   : > { %v1391_v51 = vrot.slane %v1390_v49, 2  ;;  %v1656_v29 = vld [vmem:[#allocation14 + $0x5e8] sm:$0xff] }
 0x4bb   : > { %v1398_v52 = vrot.slane %v1397_v50, 2  ;;  %v1688_v23 = vld [vmem:[#allocation14 + $0x6e8] sm:$0xff] }
 0x4bc   : > { %v1392_v44 = vmax.f32 %v1390_v49, %v1391_v51  ;;  %v1623_v49 = vld [vmem:[#allocation14 + $0x4e0] sm:$0xff]  ;;  %v3786_v51 = vpack.c.bf16 %v1626_v39, %v1622_v37  ;;  %v3546_v37 = vpack.c.bf16 %v1656_v29, %v1652_v28 }
 0x4bd   : > { %v1399_v53 = vmax.f32 %v1397_v50, %v1398_v52  ;;  %v3530_v50 = vpack.c.bf16 %v1624_v35, %v1620_v34  ;;  %v1621_v52 = vld [vmem:[#allocation14 + $0x4d0] sm:$0xff]  ;;  %v1651_v34 = vld [vmem:[#allocation14 + $0x5c0] sm:$0xff] }
 0x4be   : > { %v1393_v54 = vrot.slane %v1392_v44, 1  ;;  %v1655_v35 = vld [vmem:[#allocation14 + $0x5e0] sm:$0xff] }
 0x4bf   : > { %v1400_v55 = vrot.slane %v1399_v53, 1  ;;  %v1683_v28 = vld [vmem:[#allocation14 + $0x6c0] sm:$0xff] }
 0x4c0   : > { %v1394_v56 = vmax.f32 %v1392_v44, %v1393_v54  ;;  %v1625_v44 = vld [vmem:[#allocation14 + $0x4f0] sm:$0xff]  ;;  %v1632_v54 = vld [vmem:[#allocation14 + $0x528] sm:$0xff]  ;;  %v1687_v29 = vld [vmem:[#allocation14 + $0x6e0] sm:$0xff] }
 0x4c1   : > { %v1401_v57 = vmax.f32 %v1399_v53, %v1400_v55  ;;  %v1628_v53 = vld [vmem:[#allocation14 + $0x508] sm:$0xff]  ;;  %v1630_v55 = vld [vmem:[#allocation14 + $0x518] sm:$0xff] }
 0x4c3   : > { %v1414_v59 = vcombine.low %v1394_v56, %v1401_v57  ;;  %v1634_v56 = vld [vmem:[#allocation14 + $0x538] sm:$0xff]  ;;  %v3532_v57 = vpack.c.bf16 %v1623_v49, %v1619_v48  ;;  %v1660_v48 = vld [vmem:[#allocation14 + $0x608] sm:$0xff] }
 0x4c4   : > { %v1664_v49 = vld [vmem:[#allocation14 + $0x628] sm:$0xff] }
 0x4c5   : > { %v1442_v61 = vrot.slane %v1414_v59, %v1420_v15  ;;  %v3788_v59 = vpack.c.bf16 %v1625_v44, %v1621_v52  ;;  %v3548_v52 = vpack.c.bf16 %v1655_v35, %v1651_v34  ;;  %v1692_v34 = vld [vmem:[#allocation14 + $0x708] sm:$0xff] }
 0x4c6   : > { %v1696_v35 = vld [vmem:[#allocation14 + $0x728] sm:$0xff] }
 0x4c7   : > { %v1444_v62 = vcombine.low %v1435_v60, %v1442_v61  ;;  %v1627_v60 = vld [vmem:[#allocation14 + $0x500] sm:$0xff] }
 0x4c8   : > { %v1631_v61 = vld [vmem:[#allocation14 + $0x520] sm:$0xff] }
 0x4c9   : > { %v1458_v0 = vrot.slane %v1444_v62, %v1420_v15  ;;  %v1605_v15 = vld [vmem:[#allocation14 + $0x450] sm:$0xff]  ;;  %v3534_v62 = vpack.c.bf16 %v1632_v54, %v1628_v53  ;;  %v3536_v8 = vpack.c.bf16 %v1631_v61, %v1627_v60  ;;  %v1659_v53 = vld [vmem:[#allocation14 + $0x600] sm:$0xff]  ;;  %v1668_v60 = vld [vmem:[#allocation14 + $0x648] sm:$0xff] }
 0x4ca   : > { %v3780_v27 = vpack.c.bf16 %v1609_v16, %v1605_v15  ;;  %v1648_v15 = vld [vmem:[#allocation14 + $0x5a8] sm:$0xff]  ;;  %v1646_v16 = vld [vmem:[#allocation14 + $0x598] sm:$0xff]  ;;  %v1663_v54 = vld [vmem:[#allocation14 + $0x620] sm:$0xff] }
 0x4cb   : > { %v5291_v6 = vcombine.low %v1451_v63, %v1458_v0  ;;  %v3790_v63 = vpack.c.bf16 %v1634_v56, %v1630_v55  ;;  %v1629_v0 = vld [vmem:[#allocation14 + $0x510] sm:$0xff]  ;;  %v3542_v24 = vpack.c.bf16 %v1648_v15, %v1644_v14  ;;  %v3550_v55 = vpack.c.bf16 %v1664_v49, %v1660_v48  ;;  %v1672_v61 = vld [vmem:[#allocation14 + $0x668] sm:$0xff]  ;;  %v1675_v14 = vld [vmem:[#allocation14 + $0x680] sm:$0xff] }
 0x4cc   : > { %v3792_v9 = vpack.c.bf16 %v1633_v1, %v1629_v0  ;;  %v3552_v0 = vpack.c.bf16 %v1663_v54, %v1659_v53  ;;  %v1679_v15 = vld [vmem:[#allocation14 + $0x6a0] sm:$0xff]  ;;  %v1700_v53 = vld [vmem:[#allocation14 + $0x748] sm:$0xff] }
 0x4cd   : > { %v1988_v11 = vrot.slane %v5291_v6, %v5250_v45  ;;  %v1984_v36 = vrot.slane %v5291_v6, %v5244_v42  ;;  %v1996_v25 = vrot.slane %v5291_v6, %v5273_v58  ;;  %v1691_v48 = vld [vmem:[#allocation14 + $0x700] sm:$0xff]  ;;  %v1704_v54 = vld [vmem:[#allocation14 + $0x768] sm:$0xff] }
 0x4ce   : > { %v1695_v49 = vld [vmem:[#allocation14 + $0x720] sm:$0xff] }
 0x4cf   : > { %2106 = vmatprep.mubr.f32.mxu0 %v1988_v11  ;;  %2390 = vmatprep.mubr.f32.mxu1 %v1988_v11  ;;  %v1639_v11 = vld [vmem:[#allocation14 + $0x560] sm:$0xff] }
 0x4d0   : > { %2107 = vmatmul.mubr.f32.vlgmr.msra.gmra.mrb[4].mxu0 %v1984_v36  ;;  %2391 = vmatmul.mubr.f32.vlgmr.msra.gmra.mrb[16].mxu1 %v1984_v36  ;;  %v3538_v36 = vpack.c.bf16 %v1640_v3, %v1636_v2  ;;  %v1667_v2 = vld [vmem:[#allocation14 + $0x640] sm:$0xff] }
 0x4d1   : > { %3521 = vmatpush1.bf16.msra.mxu0 %v3520_v38  ;;  %3777 = vmatpush1.bf16.msra.mxu1 %v3776_v40  ;;  %v3794_v38 = vpack.c.bf16 %v1642_v7, %v1638_v4  ;;  %v1637_v40 = vld [vmem:[#allocation14 + $0x550] sm:$0xff]  ;;  %v1671_v3 = vld [vmem:[#allocation14 + $0x660] sm:$0xff]  ;;  %v3554_v4 = vpack.c.bf16 %v1672_v61, %v1668_v60 }
 0x4d2   : > { %2177 = vmatprep.mubr.f32.mxu0 %v1996_v25  ;;  %2461 = vmatprep.mubr.f32.mxu1 %v1996_v25  ;;  %v3798_v25 = vpack.c.bf16 %v1650_v17, %v1646_v16  ;;  %v1699_v60 = vld [vmem:[#allocation14 + $0x740] sm:$0xff] }
 0x4d3   : > { %3523 = vmatprep.subr.bf16.mxu0 %v3522_v18  ;;  %3779 = vmatprep.subr.bf16.mxu1 %v3778_v19  ;;  %v3540_v18 = vpack.c.bf16 %v1639_v11, %v1635_v10  ;;  %v3796_v19 = vpack.c.bf16 %v1641_v13, %v1637_v40  ;;  %v1676_v10 = vld [vmem:[#allocation14 + $0x688] sm:$0xff]  ;;  %v3556_v40 = vpack.c.bf16 %v1671_v3, %v1667_v2  ;;  %v1703_v61 = vld [vmem:[#allocation14 + $0x760] sm:$0xff] }
 0x4d4   : > { %v1680_v11 = vld [vmem:[#allocation14 + $0x6a8] sm:$0xff] }
 0x4d5   : > { %3525 = vmatpush1.bf16.msra.mxu0 %v3524_v26  ;;  %3781 = vmatpush1.bf16.msra.mxu1 %v3780_v27  ;;  %v1645_v26 = vld [vmem:[#allocation14 + $0x590] sm:$0xff]  ;;  %v3558_v16 = vpack.c.bf16 %v1680_v11, %v1676_v10  ;;  %v1708_v2 = vld [vmem:[#allocation14 + $0x788] sm:$0xff]  ;;  %v1707_v10 = vld [vmem:[#allocation14 + $0x780] sm:$0xff] }
 0x4d6   : > { %3527 = vmatprep.subr.bf16.mxu0 %v3526_v30  ;;  %3783 = vmatprep.subr.bf16.mxu1 %v3782_v31  ;;  %v1649_v27 = vld [vmem:[#allocation14 + $0x5b0] sm:$0xff]  ;;  %v1654_v30 = vld [vmem:[#allocation14 + $0x5d8] sm:$0xff]  ;;  %v1712_v3 = vld [vmem:[#allocation14 + $0x7a8] sm:$0xff] }
 0x4d7   : > { %v1658_v31 = vld [vmem:[#allocation14 + $0x5f8] sm:$0xff]  ;;  %v3800_v33 = vpack.c.bf16 %v1649_v27, %v1645_v26  ;;  %v3560_v26 = vpack.c.bf16 %v1679_v15, %v1675_v14  ;;  %v1711_v11 = vld [vmem:[#allocation14 + $0x7a0] sm:$0xff]  ;;  %v1716_v14 = vld [vmem:[#allocation14 + $0x7c8] sm:$0xff] }
 0x4d8   : > { %v3802_v39 = vpack.c.bf16 %v1658_v31, %v1654_v30  ;;  %v3562_v30 = vpack.c.bf16 %v1688_v23, %v1684_v21  ;;  %v1720_v15 = vld [vmem:[#allocation14 + $0x7e8] sm:$0xff]  ;;  %v1715_v21 = vld [vmem:[#allocation14 + $0x7c0] sm:$0xff] }
 0x4d9   : > { %3529 = vmatpush1.bf16.msra.mxu0 %v3528_v12  ;;  %3785 = vmatpush1.bf16.msra.mxu1 %v3784_v47  ;;  %v1653_v12 = vld [vmem:[#allocation14 + $0x5d0] sm:$0xff]  ;;  %v1719_v23 = vld [vmem:[#allocation14 + $0x7e0] sm:$0xff] }
 0x4da   : > { %3531 = vmatprep.subr.bf16.mxu0 %v3530_v50  ;;  %3787 = vmatprep.subr.bf16.mxu1 %v3786_v51  ;;  %v1657_v47 = vld [vmem:[#allocation14 + $0x5f0] sm:$0xff]  ;;  %v1662_v50 = vld [vmem:[#allocation14 + $0x618] sm:$0xff] }
 0x4db   : > { %v1666_v51 = vld [vmem:[#allocation14 + $0x638] sm:$0xff]  ;;  %v3804_v44 = vpack.c.bf16 %v1657_v47, %v1653_v12  ;;  %v3564_v12 = vpack.c.bf16 %v1687_v29, %v1683_v28  ;;  %v1724_v28 = vld [vmem:[#allocation14 + $0x808] sm:$0xff] }
 0x4dc   : > { %v3806_v56 = vpack.c.bf16 %v1666_v51, %v1662_v50  ;;  %v3566_v50 = vpack.c.bf16 %v1696_v35, %v1692_v34  ;;  %v1728_v29 = vld [vmem:[#allocation14 + $0x828] sm:$0xff] }
 0x4dd   : > { %3533 = vmatpush1.bf16.msra.mxu0 %v3532_v57  ;;  %3789 = vmatpush1.bf16.msra.mxu1 %v3788_v59  ;;  %v1661_v57 = vld [vmem:[#allocation14 + $0x610] sm:$0xff]  ;;  %v3582_v34 = vpack.c.bf16 %v1728_v29, %v1724_v28 }
 0x4de   : > { %3535 = vmatprep.subr.bf16.mxu0 %v3534_v62  ;;  %3791 = vmatprep.subr.bf16.mxu1 %v3790_v63  ;;  %v1665_v59 = vld [vmem:[#allocation14 + $0x630] sm:$0xff]  ;;  %v1670_v62 = vld [vmem:[#allocation14 + $0x658] sm:$0xff] }
 0x4df   : > { %v1674_v63 = vld [vmem:[#allocation14 + $0x678] sm:$0xff]  ;;  %v3808_v1 = vpack.c.bf16 %v1665_v59, %v1661_v57  ;;  %v3568_v57 = vpack.c.bf16 %v1695_v49, %v1691_v48  ;;  %v1732_v48 = vld [vmem:[#allocation14 + $0x848] sm:$0xff] }
 0x4e0   : > { %v3810_v7 = vpack.c.bf16 %v1674_v63, %v1670_v62  ;;  %v3570_v62 = vpack.c.bf16 %v1704_v54, %v1700_v53  ;;  %v1736_v49 = vld [vmem:[#allocation14 + $0x868] sm:$0xff]  ;;  %v1731_v54 = vld [vmem:[#allocation14 + $0x840] sm:$0xff] }
 0x4e1   : > { %3537 = vmatpush1.bf16.msra.mxu0 %v3536_v8  ;;  %3793 = vmatpush1.bf16.msra.mxu1 %v3792_v9  ;;  %v1669_v8 = vld [vmem:[#allocation14 + $0x650] sm:$0xff] }
 0x4e2   : > { %3539 = vmatprep.subr.bf16.mxu0 %v3538_v36  ;;  %3795 = vmatprep.subr.bf16.mxu1 %v3794_v38  ;;  %v1673_v9 = vld [vmem:[#allocation14 + $0x670] sm:$0xff]  ;;  %v1678_v36 = vld [vmem:[#allocation14 + $0x698] sm:$0xff] }
 0x4e3   : > { %v1682_v38 = vld [vmem:[#allocation14 + $0x6b8] sm:$0xff]  ;;  %v3812_v13 = vpack.c.bf16 %v1673_v9, %v1669_v8  ;;  %v3572_v8 = vpack.c.bf16 %v1703_v61, %v1699_v60  ;;  %v1737_v61 = vld [vmem:[#allocation14 + $0x870] sm:$0xff] }
 0x4e4   : > { %v3814_v17 = vpack.c.bf16 %v1682_v38, %v1678_v36  ;;  %v3574_v36 = vpack.c.bf16 %v1712_v3, %v1708_v2 }
 0x4e5   : > { %3541 = vmatpush1.bf16.msra.mxu0 %v3540_v18  ;;  %3797 = vmatpush1.bf16.msra.mxu1 %v3796_v19  ;;  %v1677_v18 = vld [vmem:[#allocation14 + $0x690] sm:$0xff] }
 0x4e6   : > { %3543 = vmatprep.subr.bf16.mxu0 %v3542_v24  ;;  %3799 = vmatprep.subr.bf16.mxu1 %v3798_v25  ;;  %v1681_v19 = vld [vmem:[#allocation14 + $0x6b0] sm:$0xff]  ;;  %v1686_v24 = vld [vmem:[#allocation14 + $0x6d8] sm:$0xff] }
 0x4e7   : > { %v1690_v25 = vld [vmem:[#allocation14 + $0x6f8] sm:$0xff]  ;;  %v3816_v27 = vpack.c.bf16 %v1681_v19, %v1677_v18  ;;  %v3576_v18 = vpack.c.bf16 %v1711_v11, %v1707_v10  ;;  %v1745_v10 = vld [vmem:[#allocation14 + $0x8b0] sm:$0xff]  ;;  %v1748_v11 = vld [vmem:[#allocation14 + $0x8c8] sm:$0xff] }
 0x4e8   : > { %v3818_v31 = vpack.c.bf16 %v1690_v25, %v1686_v24  ;;  %v3578_v24 = vpack.c.bf16 %v1720_v15, %v1716_v14 }
 0x4e9   : > { %3545 = vmatpush1.bf16.msra.mxu0 %v3544_v32  ;;  %3801 = vmatpush1.bf16.msra.mxu1 %v3800_v33  ;;  %v1685_v32 = vld [vmem:[#allocation14 + $0x6d0] sm:$0xff] }
 0x4ea   : > { %3547 = vmatprep.subr.bf16.mxu0 %v3546_v37  ;;  %3803 = vmatprep.subr.bf16.mxu1 %v3802_v39  ;;  %v1689_v33 = vld [vmem:[#allocation14 + $0x6f0] sm:$0xff]  ;;  %v1694_v37 = vld [vmem:[#allocation14 + $0x718] sm:$0xff] }
 0x4eb   : > { %v1698_v39 = vld [vmem:[#allocation14 + $0x738] sm:$0xff]  ;;  %v3820_v47 = vpack.c.bf16 %v1689_v33, %v1685_v32  ;;  %v3580_v32 = vpack.c.bf16 %v1719_v23, %v1715_v21  ;;  %v1753_v21 = vld [vmem:[#allocation14 + $0x8f0] sm:$0xff]  ;;  %v1756_v23 = vld [vmem:[#allocation14 + $0x908] sm:$0xff] }
 0x4ec   : > { %v3822_v51 = vpack.c.bf16 %v1698_v39, %v1694_v37  ;;  %v1723_v37 = vld [vmem:[#allocation14 + $0x800] sm:$0xff] }
 0x4ed   : > { %3549 = vmatpush1.bf16.msra.mxu0 %v3548_v52  ;;  %3805 = vmatpush1.bf16.msra.mxu1 %v3804_v44  ;;  %v1693_v52 = vld [vmem:[#allocation14 + $0x710] sm:$0xff]  ;;  %v1727_v39 = vld [vmem:[#allocation14 + $0x820] sm:$0xff] }
 0x4ee   : > { %3551 = vmatprep.subr.bf16.mxu0 %v3550_v55  ;;  %3807 = vmatprep.subr.bf16.mxu1 %v3806_v56  ;;  %v1697_v44 = vld [vmem:[#allocation14 + $0x730] sm:$0xff]  ;;  %v1702_v55 = vld [vmem:[#allocation14 + $0x758] sm:$0xff] }
 0x4ef   : > { %v1706_v56 = vld [vmem:[#allocation14 + $0x778] sm:$0xff]  ;;  %v3824_v59 = vpack.c.bf16 %v1697_v44, %v1693_v52  ;;  %v3584_v52 = vpack.c.bf16 %v1727_v39, %v1723_v37  ;;  %v1992_v44 = vrot.slane %v5291_v6, %v5270_v46  ;;  %v1768_v37 = vld [vmem:[#allocation14 + $0x968] sm:$0xff] }
 0x4f0   : > { %v3826_v63 = vpack.c.bf16 %v1706_v56, %v1702_v55  ;;  %v1735_v55 = vld [vmem:[#allocation14 + $0x860] sm:$0xff]  ;;  %v1733_v56 = vld [vmem:[#allocation14 + $0x850] sm:$0xff]  ;;  %v1766_v39 = vld [vmem:[#allocation14 + $0x958] sm:$0xff] }
 0x4f1   : > { %3553 = vmatpush1.bf16.msra.mxu0 %v3552_v0  ;;  %3809 = vmatpush1.bf16.msra.mxu1 %v3808_v1  ;;  %v1701_v0 = vld [vmem:[#allocation14 + $0x750] sm:$0xff]  ;;  %v3588_v2 = vpack.c.bf16 %v1735_v55, %v1731_v54  ;;  %v3844_v3 = vpack.c.bf16 %v1737_v61, %v1733_v56  ;;  %v1772_v54 = vld [vmem:[#allocation14 + $0x988] sm:$0xff]  ;;  %v1774_v56 = vld [vmem:[#allocation14 + $0x998] sm:$0xff] }
 0x4f2   : > { %3555 = vmatprep.subr.bf16.mxu0 %v3554_v4  ;;  %3811 = vmatprep.subr.bf16.mxu1 %v3810_v7  ;;  %v1705_v1 = vld [vmem:[#allocation14 + $0x770] sm:$0xff]  ;;  %v1710_v4 = vld [vmem:[#allocation14 + $0x798] sm:$0xff]  ;;  %v1776_v55 = vld [vmem:[#allocation14 + $0x9a8] sm:$0xff] }
 0x4f3   : > { %v1714_v7 = vld [vmem:[#allocation14 + $0x7b8] sm:$0xff]  ;;  %v3828_v9 = vpack.c.bf16 %v1705_v1, %v1701_v0  ;;  %v3606_v61 = vpack.c.bf16 %v1776_v55, %v1772_v54  ;;  %v1803_v54 = vld [vmem:[#allocation14 + $0xa80] sm:$0xff] }
 0x4f4   : > { %v3830_v38 = vpack.c.bf16 %v1714_v7, %v1710_v4  ;;  %v1742_v0 = vld [vmem:[#allocation14 + $0x898] sm:$0xff]  ;;  %v1739_v7 = vld [vmem:[#allocation14 + $0x880] sm:$0xff] }
 0x4f5   : > { %3557 = vmatpush1.bf16.msra.mxu0 %v3556_v40  ;;  %3813 = vmatpush1.bf16.msra.mxu1 %v3812_v13  ;;  %v1709_v40 = vld [vmem:[#allocation14 + $0x790] sm:$0xff]  ;;  %v1746_v1 = vld [vmem:[#allocation14 + $0x8b8] sm:$0xff]  ;;  %v1807_v55 = vld [vmem:[#allocation14 + $0xaa0] sm:$0xff] }
 0x4f6   : > { %3559 = vmatprep.subr.bf16.mxu0 %v3558_v16  ;;  %3815 = vmatprep.subr.bf16.mxu1 %v3814_v17  ;;  %v1713_v13 = vld [vmem:[#allocation14 + $0x7b0] sm:$0xff]  ;;  %v1718_v16 = vld [vmem:[#allocation14 + $0x7d8] sm:$0xff] }
 0x4f7   : > { %v1722_v17 = vld [vmem:[#allocation14 + $0x7f8] sm:$0xff]  ;;  %v3832_v19 = vpack.c.bf16 %v1713_v13, %v1709_v40 }
 0x4f8   : > { %v3834_v25 = vpack.c.bf16 %v1722_v17, %v1718_v16  ;;  %v1754_v40 = vld [vmem:[#allocation14 + $0x8f8] sm:$0xff]  ;;  %v1747_v16 = vld [vmem:[#allocation14 + $0x8c0] sm:$0xff] }
 0x4f9   : > { %3561 = vmatpush1.bf16.msra.mxu0 %v3560_v26  ;;  %3817 = vmatpush1.bf16.msra.mxu1 %v3816_v27  ;;  %v1717_v26 = vld [vmem:[#allocation14 + $0x7d0] sm:$0xff]  ;;  %v1751_v17 = vld [vmem:[#allocation14 + $0x8e0] sm:$0xff] }
 0x4fa   : > { %3563 = vmatprep.subr.bf16.mxu0 %v3562_v30  ;;  %3819 = vmatprep.subr.bf16.mxu1 %v3818_v31  ;;  %v1721_v27 = vld [vmem:[#allocation14 + $0x7f0] sm:$0xff]  ;;  %v1726_v30 = vld [vmem:[#allocation14 + $0x818] sm:$0xff] }
 0x4fb   : > { %v1730_v31 = vld [vmem:[#allocation14 + $0x838] sm:$0xff]  ;;  %v3836_v33 = vpack.c.bf16 %v1721_v27, %v1717_v26  ;;  %v3596_v27 = vpack.c.bf16 %v1751_v17, %v1747_v16 }
 0x4fc   : > { %v3838_v35 = vpack.c.bf16 %v1730_v31, %v1726_v30  ;;  %v1762_v26 = vld [vmem:[#allocation14 + $0x938] sm:$0xff]  ;;  %v1755_v30 = vld [vmem:[#allocation14 + $0x900] sm:$0xff] }
 0x4fd   : > { %3565 = vmatpush1.bf16.msra.mxu0 %v3564_v12  ;;  %3821 = vmatpush1.bf16.msra.mxu1 %v3820_v47  ;;  %v1725_v12 = vld [vmem:[#allocation14 + $0x810] sm:$0xff]  ;;  %v1759_v31 = vld [vmem:[#allocation14 + $0x920] sm:$0xff]  ;;  %v1790_v16 = vld [vmem:[#allocation14 + $0xa18] sm:$0xff] }
 0x4fe   : > { %3567 = vmatprep.subr.bf16.mxu0 %v3566_v50  ;;  %3823 = vmatprep.subr.bf16.mxu1 %v3822_v51  ;;  %v1729_v47 = vld [vmem:[#allocation14 + $0x830] sm:$0xff]  ;;  %v1734_v50 = vld [vmem:[#allocation14 + $0x858] sm:$0xff] }
 0x4ff   : > { %v1738_v51 = vld [vmem:[#allocation14 + $0x878] sm:$0xff]  ;;  %v3840_v53 = vpack.c.bf16 %v1729_v47, %v1725_v12  ;;  %v3600_v47 = vpack.c.bf16 %v1759_v31, %v1755_v30 }
 0x500   : > { %v3842_v60 = vpack.c.bf16 %v1738_v51, %v1734_v50  ;;  %v1770_v12 = vld [vmem:[#allocation14 + $0x978] sm:$0xff]  ;;  %v1763_v50 = vld [vmem:[#allocation14 + $0x940] sm:$0xff] }
 0x501   : > { %3569 = vmatpush1.bf16.msra.mxu0 %v3568_v57  ;;  %3825 = vmatpush1.bf16.msra.mxu1 %v3824_v59  ;;  %v2004_v57 = vrot.slane %v5291_v6, %v1004_v5  ;;  %v3586_v59 = vpack.c.bf16 %v1736_v49, %v1732_v48  ;;  %v3846_v5 = vpack.c.bf16 %v1746_v1, %v1742_v0  ;;  %v1767_v51 = vld [vmem:[#allocation14 + $0x960] sm:$0xff]  ;;  %v1773_v0 = vld [vmem:[#allocation14 + $0x990] sm:$0xff]  ;;  %v1794_v17 = vld [vmem:[#allocation14 + $0xa38] sm:$0xff] }
 0x502   : > { %3571 = vmatprep.subr.bf16.mxu0 %v3570_v62  ;;  %3827 = vmatprep.subr.bf16.mxu1 %v3826_v63  ;;  %v1740_v62 = vld [vmem:[#allocation14 + $0x888] sm:$0xff]  ;;  %v1798_v30 = vld [vmem:[#allocation14 + $0xa58] sm:$0xff] }
 0x503   : > { %v1744_v63 = vld [vmem:[#allocation14 + $0x8a8] sm:$0xff]  ;;  %v1802_v31 = vld [vmem:[#allocation14 + $0xa78] sm:$0xff] }
 0x504   : > { %v3590_v4 = vpack.c.bf16 %v1744_v63, %v1740_v62  ;;  %v1771_v62 = vld [vmem:[#allocation14 + $0x980] sm:$0xff] }
 0x505   : > { %3573 = vmatpush1.bf16.msra.mxu0 %v3572_v8  ;;  %3829 = vmatpush1.bf16.msra.mxu1 %v3828_v9  ;;  %v1743_v8 = vld [vmem:[#allocation14 + $0x8a0] sm:$0xff]  ;;  %v1741_v9 = vld [vmem:[#allocation14 + $0x890] sm:$0xff] }
 0x506   : > { %3575 = vmatprep.subr.bf16.mxu0 %v3574_v36  ;;  %3831 = vmatprep.subr.bf16.mxu1 %v3830_v38  ;;  %v1752_v36 = vld [vmem:[#allocation14 + $0x8e8] sm:$0xff]  ;;  %v1750_v38 = vld [vmem:[#allocation14 + $0x8d8] sm:$0xff]  ;;  %v3592_v13 = vpack.c.bf16 %v1743_v8, %v1739_v7  ;;  %v3848_v14 = vpack.c.bf16 %v1745_v10, %v1741_v9  ;;  %v1775_v63 = vld [vmem:[#allocation14 + $0x9a0] sm:$0xff] }
 0x507   : > { %v3594_v15 = vpack.c.bf16 %v1752_v36, %v1748_v11  ;;  %v1782_v7 = vld [vmem:[#allocation14 + $0x9d8] sm:$0xff]  ;;  %v3608_v9 = vpack.c.bf16 %v1775_v63, %v1771_v62  ;;  %v1779_v11 = vld [vmem:[#allocation14 + $0x9c0] sm:$0xff] }
 0x508   : > { %v1786_v8 = vld [vmem:[#allocation14 + $0x9f8] sm:$0xff]  ;;  %v1783_v36 = vld [vmem:[#allocation14 + $0x9e0] sm:$0xff] }
 0x509   : > { %3577 = vmatpush1.bf16.msra.mxu0 %v3576_v18  ;;  %3833 = vmatpush1.bf16.msra.mxu1 %v3832_v19  ;;  %v1749_v18 = vld [vmem:[#allocation14 + $0x8d0] sm:$0xff]  ;;  %v3850_v19 = vpack.c.bf16 %v1754_v40, %v1750_v38  ;;  %v3866_v40 = vpack.c.bf16 %v1786_v8, %v1782_v7  ;;  %v1814_v62 = vld [vmem:[#allocation14 + $0xad8] sm:$0xff] }
 0x50a   : > { %3579 = vmatprep.subr.bf16.mxu0 %v3578_v24  ;;  %3835 = vmatprep.subr.bf16.mxu1 %v3834_v25  ;;  %v1760_v24 = vld [vmem:[#allocation14 + $0x928] sm:$0xff]  ;;  %v1758_v25 = vld [vmem:[#allocation14 + $0x918] sm:$0xff]  ;;  %v3852_v28 = vpack.c.bf16 %v1753_v21, %v1749_v18  ;;  %v1781_v38 = vld [vmem:[#allocation14 + $0x9d0] sm:$0xff]  ;;  %v3612_v18 = vpack.c.bf16 %v1783_v36, %v1779_v11 }
 0x50b   : > { %v3598_v29 = vpack.c.bf16 %v1760_v24, %v1756_v23  ;;  %v1787_v23 = vld [vmem:[#allocation14 + $0xa00] sm:$0xff]  ;;  %v1818_v63 = vld [vmem:[#allocation14 + $0xaf8] sm:$0xff]  ;;  %v1813_v7 = vld [vmem:[#allocation14 + $0xad0] sm:$0xff] }
 0x50c   : > { %v1791_v24 = vld [vmem:[#allocation14 + $0xa20] sm:$0xff]  ;;  %v3882_v8 = vpack.c.bf16 %v1818_v63, %v1814_v62  ;;  %v1822_v11 = vld [vmem:[#allocation14 + $0xb18] sm:$0xff]  ;;  %v1845_v62 = vld [vmem:[#allocation14 + $0xbd0] sm:$0xff] }
 0x50d   : > { %3581 = vmatpush1.bf16.msra.mxu0 %v3580_v32  ;;  %3837 = vmatpush1.bf16.msra.mxu1 %v3836_v33  ;;  %v1757_v32 = vld [vmem:[#allocation14 + $0x910] sm:$0xff]  ;;  %v3854_v33 = vpack.c.bf16 %v1762_v26, %v1758_v25  ;;  %v3870_v26 = vpack.c.bf16 %v1794_v17, %v1790_v16  ;;  %v1826_v36 = vld [vmem:[#allocation14 + $0xb38] sm:$0xff] }
 0x50e   : > { %3583 = vmatprep.subr.bf16.mxu0 %v3582_v34  ;;  %3839 = vmatprep.subr.bf16.mxu1 %v3838_v35  ;;  %v1761_v34 = vld [vmem:[#allocation14 + $0x930] sm:$0xff]  ;;  %v1764_v35 = vld [vmem:[#allocation14 + $0x948] sm:$0xff]  ;;  %v3886_v17 = vpack.c.bf16 %v1826_v36, %v1822_v11 }
 0x50f   : > { %v3856_v48 = vpack.c.bf16 %v1761_v34, %v1757_v32  ;;  %v3602_v49 = vpack.c.bf16 %v1768_v37, %v1764_v35  ;;  %v1789_v25 = vld [vmem:[#allocation14 + $0xa10] sm:$0xff]  ;;  %v3616_v32 = vpack.c.bf16 %v1791_v24, %v1787_v23  ;;  %v1795_v35 = vld [vmem:[#allocation14 + $0xa40] sm:$0xff]  ;;  %v1830_v23 = vld [vmem:[#allocation14 + $0xb58] sm:$0xff] }
 0x510   : > { %2178 = vmatmul.mubr.f32.vlgmr.msra.gmra.mrb[4].mxu0 %v1992_v44  ;;  %2462 = vmatmul.mubr.f32.vlgmr.msra.gmra.mrb[16].mxu1 %v1992_v44  ;;  %v3858_v44 = vpack.c.bf16 %v1770_v12, %v1766_v39  ;;  %v1799_v37 = vld [vmem:[#allocation14 + $0xa60] sm:$0xff]  ;;  %v1797_v39 = vld [vmem:[#allocation14 + $0xa50] sm:$0xff]  ;;  %v3874_v12 = vpack.c.bf16 %v1802_v31, %v1798_v30  ;;  %v1834_v24 = vld [vmem:[#allocation14 + $0xb78] sm:$0xff] }
 0x511   : > { %3585 = vmatpush1.bf16.msra.mxu0 %v3584_v52  ;;  %2248 = vmatprep.mubr.f32.mxu0 %v2004_v57  ;;  %v1765_v52 = vld [vmem:[#allocation14 + $0x950] sm:$0xff]  ;;  %v3890_v31 = vpack.c.bf16 %v1834_v24, %v1830_v23 }
 0x512   : > { %3841 = vmatpush1.bf16.msra.mxu1 %v3840_v53  ;;  %2532 = vmatprep.mubr.f32.mxu1 %v2004_v57  ;;  %v1769_v53 = vld [vmem:[#allocation14 + $0x970] sm:$0xff]  ;;  %v1778_v57 = vld [vmem:[#allocation14 + $0x9b8] sm:$0xff] }
 0x513   : > { %3587 = vmatprep.subr.bf16.mxu0 %v3586_v59  ;;  %3843 = vmatprep.subr.bf16.mxu1 %v3842_v60  ;;  %v3604_v59 = vpack.c.bf16 %v1767_v51, %v1763_v50  ;;  %v3860_v60 = vpack.c.bf16 %v1769_v53, %v1765_v52  ;;  %v3862_v1 = vpack.c.bf16 %v1778_v57, %v1774_v56  ;;  %v1806_v50 = vld [vmem:[#allocation14 + $0xa98] sm:$0xff]  ;;  %v1805_v56 = vld [vmem:[#allocation14 + $0xa90] sm:$0xff] }
 0x514   : > { %v1810_v51 = vld [vmem:[#allocation14 + $0xab8] sm:$0xff]  ;;  %v3620_v52 = vpack.c.bf16 %v1799_v37, %v1795_v35  ;;  %v1821_v16 = vld [vmem:[#allocation14 + $0xb10] sm:$0xff] }
 0x515   : > { %3589 = vmatpush1.bf16.msra.mxu0 %v3588_v2  ;;  %v1777_v2 = vld [vmem:[#allocation14 + $0x9b0] sm:$0xff]  ;;  %v3878_v57 = vpack.c.bf16 %v1810_v51, %v1806_v50  ;;  %v1838_v35 = vld [vmem:[#allocation14 + $0xb98] sm:$0xff] }
 0x516   : > { %3845 = vmatpush1.bf16.msra.mxu1 %v3844_v3  ;;  %3591 = vmatprep.subr.bf16.mxu0 %v3590_v4  ;;  %v1780_v3 = vld [vmem:[#allocation14 + $0x9c8] sm:$0xff]  ;;  %v1829_v30 = vld [vmem:[#allocation14 + $0xb50] sm:$0xff]  ;;  %v1842_v37 = vld [vmem:[#allocation14 + $0xbb8] sm:$0xff] }
 0x517   : > { %3847 = vmatprep.subr.bf16.mxu1 %v3846_v5  ;;  %v1784_v4 = vld [vmem:[#allocation14 + $0x9e8] sm:$0xff]  ;;  %v3864_v5 = vpack.c.bf16 %v1777_v2, %v1773_v0  ;;  %v3624_v0 = vpack.c.bf16 %v1807_v55, %v1803_v54  ;;  %v1837_v50 = vld [vmem:[#allocation14 + $0xb90] sm:$0xff]  ;;  %v3894_v51 = vpack.c.bf16 %v1842_v37, %v1838_v35  ;;  %v1846_v54 = vld [vmem:[#allocation14 + $0xbd8] sm:$0xff] }
 0x518   : > { %v3610_v10 = vpack.c.bf16 %v1784_v4, %v1780_v3  ;;  %v1811_v3 = vld [vmem:[#allocation14 + $0xac0] sm:$0xff]  ;;  %v1850_v55 = vld [vmem:[#allocation14 + $0xbf8] sm:$0xff]  ;;  %v1853_v36 = vld [vmem:[#allocation14 + $0xc10] sm:$0xff] }
 0x519   : > { %3593 = vmatpush1.bf16.msra.mxu0 %v3592_v13  ;;  %v1785_v13 = vld [vmem:[#allocation14 + $0x9f0] sm:$0xff]  ;;  %v1815_v4 = vld [vmem:[#allocation14 + $0xae0] sm:$0xff]  ;;  %v3898_v63 = vpack.c.bf16 %v1850_v55, %v1846_v54 }
 0x51a   : > { %3849 = vmatpush1.bf16.msra.mxu1 %v3848_v14  ;;  %3595 = vmatprep.subr.bf16.mxu0 %v3594_v15  ;;  %v1788_v14 = vld [vmem:[#allocation14 + $0xa08] sm:$0xff]  ;;  %v1861_v23 = vld [vmem:[#allocation14 + $0xc50] sm:$0xff]  ;;  %v1871_v35 = vld [vmem:[#allocation14 + $0xca0] sm:$0xff] }
 0x51b   : > { %3851 = vmatprep.subr.bf16.mxu1 %v3850_v19  ;;  %v1792_v15 = vld [vmem:[#allocation14 + $0xa28] sm:$0xff]  ;;  %v3868_v19 = vpack.c.bf16 %v1785_v13, %v1781_v38  ;;  %v3628_v38 = vpack.c.bf16 %v1815_v4, %v1811_v3  ;;  %v1854_v3 = vld [vmem:[#allocation14 + $0xc18] sm:$0xff]  ;;  %v1869_v37 = vld [vmem:[#allocation14 + $0xc90] sm:$0xff] }
 0x51c   : > { %v3614_v21 = vpack.c.bf16 %v1792_v15, %v1788_v14  ;;  %v1819_v14 = vld [vmem:[#allocation14 + $0xb00] sm:$0xff]  ;;  %v1858_v4 = vld [vmem:[#allocation14 + $0xc38] sm:$0xff]  ;;  %v1877_v54 = vld [vmem:[#allocation14 + $0xcd0] sm:$0xff] }
 0x51d   : > { %3597 = vmatpush1.bf16.msra.mxu0 %v3596_v27  ;;  %v1793_v27 = vld [vmem:[#allocation14 + $0xa30] sm:$0xff]  ;;  %v1823_v15 = vld [vmem:[#allocation14 + $0xb20] sm:$0xff]  ;;  %v3902_v11 = vpack.c.bf16 %v1858_v4, %v1854_v3 }
 0x51e   : > { %3853 = vmatpush1.bf16.msra.mxu1 %v3852_v28  ;;  %3599 = vmatprep.subr.bf16.mxu0 %v3598_v29  ;;  %v1796_v28 = vld [vmem:[#allocation14 + $0xa48] sm:$0xff]  ;;  %v1885_v3 = vld [vmem:[#allocation14 + $0xd10] sm:$0xff] }
 0x51f   : > { %3855 = vmatprep.subr.bf16.mxu1 %v3854_v33  ;;  %v1800_v29 = vld [vmem:[#allocation14 + $0xa68] sm:$0xff]  ;;  %v3872_v33 = vpack.c.bf16 %v1793_v27, %v1789_v25  ;;  %v3632_v25 = vpack.c.bf16 %v1823_v15, %v1819_v14  ;;  %v1862_v15 = vld [vmem:[#allocation14 + $0xc58] sm:$0xff] }
 0x520   : > { %v3618_v34 = vpack.c.bf16 %v1800_v29, %v1796_v28  ;;  %v1827_v28 = vld [vmem:[#allocation14 + $0xb40] sm:$0xff] }
 0x521   : > { %3601 = vmatpush1.bf16.msra.mxu0 %v3600_v47  ;;  %v1801_v47 = vld [vmem:[#allocation14 + $0xa70] sm:$0xff]  ;;  %v1831_v29 = vld [vmem:[#allocation14 + $0xb60] sm:$0xff] }
 0x522   : > { %3857 = vmatpush1.bf16.msra.mxu1 %v3856_v48  ;;  %3603 = vmatprep.subr.bf16.mxu0 %v3602_v49  ;;  %v1804_v48 = vld [vmem:[#allocation14 + $0xa88] sm:$0xff] }
 0x523   : > { %3859 = vmatprep.subr.bf16.mxu1 %v3858_v44  ;;  %v1808_v49 = vld [vmem:[#allocation14 + $0xaa8] sm:$0xff]  ;;  %v3876_v44 = vpack.c.bf16 %v1801_v47, %v1797_v39  ;;  %v3636_v39 = vpack.c.bf16 %v1831_v29, %v1827_v28  ;;  %v2012_v28 = vrot.slane %v5291_v6, %v1012_v22  ;;  %v1878_v22 = vld [vmem:[#allocation14 + $0xcd8] sm:$0xff] }
 0x524   : > { %v3622_v53 = vpack.c.bf16 %v1808_v49, %v1804_v48  ;;  %v1835_v48 = vld [vmem:[#allocation14 + $0xb80] sm:$0xff] }
 0x525   : > { %3605 = vmatpush1.bf16.msra.mxu0 %v3604_v59  ;;  %v1809_v59 = vld [vmem:[#allocation14 + $0xab0] sm:$0xff]  ;;  %v1839_v49 = vld [vmem:[#allocation14 + $0xba0] sm:$0xff] }
 0x526   : > { %3861 = vmatpush1.bf16.msra.mxu1 %v3860_v60  ;;  %3607 = vmatprep.subr.bf16.mxu0 %v3606_v61  ;;  %v1812_v60 = vld [vmem:[#allocation14 + $0xac8] sm:$0xff] }
 0x527   : > { %3863 = vmatprep.subr.bf16.mxu1 %v3862_v1  ;;  %v1816_v61 = vld [vmem:[#allocation14 + $0xae8] sm:$0xff]  ;;  %v3880_v1 = vpack.c.bf16 %v1809_v59, %v1805_v56  ;;  %v3640_v56 = vpack.c.bf16 %v1839_v49, %v1835_v48  ;;  %v1882_v49 = vld [vmem:[#allocation14 + $0xcf8] sm:$0xff] }
 0x528   : > { %v3626_v2 = vpack.c.bf16 %v1816_v61, %v1812_v60  ;;  %v1843_v60 = vld [vmem:[#allocation14 + $0xbc0] sm:$0xff]  ;;  %v1880_v48 = vld [vmem:[#allocation14 + $0xce8] sm:$0xff]  ;;  %v3914_v55 = vpack.c.bf16 %v1882_v49, %v1878_v22  ;;  %v1913_v22 = vld [vmem:[#allocation14 + $0xdf0] sm:$0xff] }
 0x529   : > { %3609 = vmatpush1.bf16.msra.mxu0 %v3608_v9  ;;  %v1817_v9 = vld [vmem:[#allocation14 + $0xaf0] sm:$0xff]  ;;  %v1847_v61 = vld [vmem:[#allocation14 + $0xbe0] sm:$0xff]  ;;  %v1916_v49 = vld [vmem:[#allocation14 + $0xe08] sm:$0xff] }
 0x52a   : > { %3865 = vmatpush1.bf16.msra.mxu1 %v3864_v5  ;;  %3611 = vmatprep.subr.bf16.mxu0 %v3610_v10  ;;  %v1820_v5 = vld [vmem:[#allocation14 + $0xb08] sm:$0xff] }
 0x52b   : > { %3867 = vmatprep.subr.bf16.mxu1 %v3866_v40  ;;  %v1824_v10 = vld [vmem:[#allocation14 + $0xb28] sm:$0xff]  ;;  %v3884_v40 = vpack.c.bf16 %v1817_v9, %v1813_v7  ;;  %v3644_v7 = vpack.c.bf16 %v1847_v61, %v1843_v60  ;;  %v1886_v60 = vld [vmem:[#allocation14 + $0xd18] sm:$0xff] }
 0x52c   : > { %v3630_v13 = vpack.c.bf16 %v1824_v10, %v1820_v5  ;;  %v1851_v5 = vld [vmem:[#allocation14 + $0xc00] sm:$0xff]  ;;  %v1890_v61 = vld [vmem:[#allocation14 + $0xd38] sm:$0xff] }
 0x52d   : > { %3613 = vmatpush1.bf16.msra.mxu0 %v3612_v18  ;;  %v1825_v18 = vld [vmem:[#allocation14 + $0xb30] sm:$0xff]  ;;  %v1855_v10 = vld [vmem:[#allocation14 + $0xc20] sm:$0xff]  ;;  %v3918_v4 = vpack.c.bf16 %v1890_v61, %v1886_v60  ;;  %v1924_v61 = vld [vmem:[#allocation14 + $0xe48] sm:$0xff] }
 0x52e   : > { %3869 = vmatpush1.bf16.msra.mxu1 %v3868_v19  ;;  %3615 = vmatprep.subr.bf16.mxu0 %v3614_v21  ;;  %v1828_v19 = vld [vmem:[#allocation14 + $0xb48] sm:$0xff]  ;;  %v3648_v14 = vpack.c.bf16 %v1855_v10, %v1851_v5  ;;  %v1894_v5 = vld [vmem:[#allocation14 + $0xd58] sm:$0xff]  ;;  %v1921_v60 = vld [vmem:[#allocation14 + $0xe30] sm:$0xff] }
 0x52f   : > { %3871 = vmatprep.subr.bf16.mxu1 %v3870_v26  ;;  %v1832_v21 = vld [vmem:[#allocation14 + $0xb68] sm:$0xff]  ;;  %v3888_v26 = vpack.c.bf16 %v1825_v18, %v1821_v16  ;;  %v1866_v16 = vld [vmem:[#allocation14 + $0xc78] sm:$0xff] }
 0x530   : > { %v3634_v27 = vpack.c.bf16 %v1832_v21, %v1828_v19  ;;  %v1859_v19 = vld [vmem:[#allocation14 + $0xc40] sm:$0xff]  ;;  %v3906_v29 = vpack.c.bf16 %v1866_v16, %v1862_v15  ;;  %v1898_v10 = vld [vmem:[#allocation14 + $0xd78] sm:$0xff]  ;;  %v1897_v16 = vld [vmem:[#allocation14 + $0xd70] sm:$0xff] }
 0x531   : > { %3617 = vmatpush1.bf16.msra.mxu0 %v3616_v32  ;;  %v1833_v32 = vld [vmem:[#allocation14 + $0xb70] sm:$0xff]  ;;  %v1863_v21 = vld [vmem:[#allocation14 + $0xc60] sm:$0xff]  ;;  %v3922_v15 = vpack.c.bf16 %v1898_v10, %v1894_v5  ;;  %v1932_v10 = vld [vmem:[#allocation14 + $0xe88] sm:$0xff] }
 0x532   : > { %3873 = vmatpush1.bf16.msra.mxu1 %v3872_v33  ;;  %3619 = vmatprep.subr.bf16.mxu0 %v3618_v34  ;;  %v1836_v33 = vld [vmem:[#allocation14 + $0xb88] sm:$0xff]  ;;  %v1929_v5 = vld [vmem:[#allocation14 + $0xe70] sm:$0xff] }
 0x533   : > { %3875 = vmatprep.subr.bf16.mxu1 %v3874_v12  ;;  %v1840_v34 = vld [vmem:[#allocation14 + $0xba8] sm:$0xff]  ;;  %v3892_v12 = vpack.c.bf16 %v1833_v32, %v1829_v30  ;;  %v1870_v30 = vld [vmem:[#allocation14 + $0xc98] sm:$0xff] }
 0x534   : > { %v3638_v47 = vpack.c.bf16 %v1840_v34, %v1836_v33  ;;  %v1867_v34 = vld [vmem:[#allocation14 + $0xc80] sm:$0xff] }
 0x535   : > { %3621 = vmatpush1.bf16.msra.mxu0 %v3620_v52  ;;  %v1841_v52 = vld [vmem:[#allocation14 + $0xbb0] sm:$0xff] }
 0x536   : > { %3877 = vmatpush1.bf16.msra.mxu1 %v3876_v44  ;;  %3623 = vmatprep.subr.bf16.mxu0 %v3622_v53  ;;  %v1844_v44 = vld [vmem:[#allocation14 + $0xbc8] sm:$0xff] }
 0x537   : > { %3879 = vmatprep.subr.bf16.mxu1 %v3878_v57  ;;  %v1848_v53 = vld [vmem:[#allocation14 + $0xbe8] sm:$0xff]  ;;  %v3896_v57 = vpack.c.bf16 %v1841_v52, %v1837_v50  ;;  %v3656_v50 = vpack.c.bf16 %v1871_v35, %v1867_v34 }
 0x538   : > { %v3642_v59 = vpack.c.bf16 %v1848_v53, %v1844_v44  ;;  %v1875_v44 = vld [vmem:[#allocation14 + $0xcc0] sm:$0xff] }
 0x539   : > { %3625 = vmatpush1.bf16.msra.mxu0 %v3624_v0  ;;  %v1849_v0 = vld [vmem:[#allocation14 + $0xbf0] sm:$0xff]  ;;  %v1879_v53 = vld [vmem:[#allocation14 + $0xce0] sm:$0xff] }
 0x53a   : > { %3881 = vmatpush1.bf16.msra.mxu1 %v3880_v1  ;;  %3627 = vmatprep.subr.bf16.mxu0 %v3626_v2  ;;  %v1852_v1 = vld [vmem:[#allocation14 + $0xc08] sm:$0xff] }
 0x53b   : > { %3883 = vmatprep.subr.bf16.mxu1 %v3882_v8  ;;  %v1856_v2 = vld [vmem:[#allocation14 + $0xc28] sm:$0xff]  ;;  %v3900_v8 = vpack.c.bf16 %v1849_v0, %v1845_v62  ;;  %v3660_v62 = vpack.c.bf16 %v1879_v53, %v1875_v44 }
 0x53c   : > { %v3646_v9 = vpack.c.bf16 %v1856_v2, %v1852_v1  ;;  %v1883_v1 = vld [vmem:[#allocation14 + $0xd00] sm:$0xff] }
 0x53d   : > { %3629 = vmatpush1.bf16.msra.mxu0 %v3628_v38  ;;  %v1857_v38 = vld [vmem:[#allocation14 + $0xc30] sm:$0xff]  ;;  %v1887_v2 = vld [vmem:[#allocation14 + $0xd20] sm:$0xff] }
 0x53e   : > { %3885 = vmatpush1.bf16.msra.mxu1 %v3884_v40  ;;  %3631 = vmatprep.subr.bf16.mxu0 %v3630_v13  ;;  %v1860_v40 = vld [vmem:[#allocation14 + $0xc48] sm:$0xff]  ;;  %v3904_v18 = vpack.c.bf16 %v1857_v38, %v1853_v36 }
 0x53f   : > { %3887 = vmatprep.subr.bf16.mxu1 %v3886_v17  ;;  %v1864_v13 = vld [vmem:[#allocation14 + $0xc68] sm:$0xff]  ;;  %v2000_v17 = vrot.slane %v5291_v6, %v1000_v43  ;;  %v3652_v43 = vpack.c.bf16 %v1863_v21, %v1859_v19  ;;  %v1902_v19 = vld [vmem:[#allocation14 + $0xd98] sm:$0xff] }
 0x540   : > { %v3650_v24 = vpack.c.bf16 %v1864_v13, %v1860_v40  ;;  %v1891_v40 = vld [vmem:[#allocation14 + $0xd40] sm:$0xff]  ;;  %v1906_v21 = vld [vmem:[#allocation14 + $0xdb8] sm:$0xff] }
 0x541   : > { %3633 = vmatpush1.bf16.msra.mxu0 %v3632_v25  ;;  %v1865_v25 = vld [vmem:[#allocation14 + $0xc70] sm:$0xff]  ;;  %v1895_v13 = vld [vmem:[#allocation14 + $0xd60] sm:$0xff] }
 0x542   : > { %3889 = vmatpush1.bf16.msra.mxu1 %v3888_v26  ;;  %3635 = vmatprep.subr.bf16.mxu0 %v3634_v27  ;;  %v1868_v26 = vld [vmem:[#allocation14 + $0xc88] sm:$0xff]  ;;  %v3908_v32 = vpack.c.bf16 %v1865_v25, %v1861_v23  ;;  %v3668_v23 = vpack.c.bf16 %v1895_v13, %v1891_v40 }
 0x543   : > { %3891 = vmatprep.subr.bf16.mxu1 %v3890_v31  ;;  %v1872_v27 = vld [vmem:[#allocation14 + $0xca8] sm:$0xff]  ;;  %v1874_v31 = vld [vmem:[#allocation14 + $0xcb8] sm:$0xff] }
 0x544   : > { %v3654_v33 = vpack.c.bf16 %v1872_v27, %v1868_v26  ;;  %v1899_v26 = vld [vmem:[#allocation14 + $0xd80] sm:$0xff] }
 0x545   : > { %3637 = vmatpush1.bf16.msra.mxu0 %v3636_v39  ;;  %v3910_v39 = vpack.c.bf16 %v1874_v31, %v1870_v30  ;;  %v1903_v27 = vld [vmem:[#allocation14 + $0xda0] sm:$0xff]  ;;  %v1905_v30 = vld [vmem:[#allocation14 + $0xdb0] sm:$0xff]  ;;  %v1908_v31 = vld [vmem:[#allocation14 + $0xdc8] sm:$0xff] }
 0x546   : > { %3893 = vmatpush1.bf16.msra.mxu1 %v3892_v12  ;;  %3639 = vmatprep.subr.bf16.mxu0 %v3638_v47  ;;  %v1873_v12 = vld [vmem:[#allocation14 + $0xcb0] sm:$0xff]  ;;  %v1876_v47 = vld [vmem:[#allocation14 + $0xcc8] sm:$0xff]  ;;  %v3672_v34 = vpack.c.bf16 %v1903_v27, %v1899_v26 }
 0x547   : > { %3895 = vmatprep.subr.bf16.mxu1 %v3894_v51  ;;  %v3912_v51 = vpack.c.bf16 %v1873_v12, %v1869_v37  ;;  %v3658_v52 = vpack.c.bf16 %v1880_v48, %v1876_v47  ;;  %v1911_v12 = vld [vmem:[#allocation14 + $0xde0] sm:$0xff]  ;;  %v1909_v47 = vld [vmem:[#allocation14 + $0xdd0] sm:$0xff] }
 0x548   : > { %v3932_v53 = vpack.c.bf16 %v1913_v22, %v1909_v47  ;;  %v1951_v22 = vld [vmem:[#allocation14 + $0xf20] sm:$0xff] }
 0x549   : > { %3641 = vmatpush1.bf16.msra.mxu0 %v3640_v56  ;;  %v1881_v56 = vld [vmem:[#allocation14 + $0xcf0] sm:$0xff] }
 0x54a   : > { %3897 = vmatpush1.bf16.msra.mxu1 %v3896_v57  ;;  %3643 = vmatprep.subr.bf16.mxu0 %v3642_v59  ;;  %v1884_v57 = vld [vmem:[#allocation14 + $0xd08] sm:$0xff] }
 0x54b   : > { %3899 = vmatprep.subr.bf16.mxu1 %v3898_v63  ;;  %v1888_v59 = vld [vmem:[#allocation14 + $0xd28] sm:$0xff]  ;;  %v3916_v63 = vpack.c.bf16 %v1881_v56, %v1877_v54  ;;  %v1919_v56 = vld [vmem:[#allocation14 + $0xe20] sm:$0xff] }
 0x54c   : > { %v3662_v0 = vpack.c.bf16 %v1888_v59, %v1884_v57  ;;  %v1917_v57 = vld [vmem:[#allocation14 + $0xe10] sm:$0xff] }
 0x54d   : > { %3645 = vmatpush1.bf16.msra.mxu0 %v3644_v7  ;;  %v1889_v7 = vld [vmem:[#allocation14 + $0xd30] sm:$0xff] }
 0x54e   : > { %3901 = vmatpush1.bf16.msra.mxu1 %v3900_v8  ;;  %3647 = vmatprep.subr.bf16.mxu0 %v3646_v9  ;;  %v1892_v8 = vld [vmem:[#allocation14 + $0xd48] sm:$0xff]  ;;  %v3920_v36 = vpack.c.bf16 %v1889_v7, %v1885_v3  ;;  %v1927_v7 = vld [vmem:[#allocation14 + $0xe60] sm:$0xff] }
 0x54f   : > { %3903 = vmatprep.subr.bf16.mxu1 %v3902_v11  ;;  %v1896_v9 = vld [vmem:[#allocation14 + $0xd68] sm:$0xff]  ;;  %v3664_v11 = vpack.c.bf16 %v1887_v2, %v1883_v1  ;;  %v3936_v2 = vpack.c.bf16 %v1921_v60, %v1917_v57  ;;  %v1959_v60 = vld [vmem:[#allocation14 + $0xf60] sm:$0xff] }
 0x550   : > { %2249 = vmatmul.mubr.f32.vlgmr.msra.gmra.mrb[4].mxu0 %v2000_v17  ;;  %v3666_v38 = vpack.c.bf16 %v1896_v9, %v1892_v8  ;;  %v1925_v8 = vld [vmem:[#allocation14 + $0xe50] sm:$0xff] }
 0x551   : > { %2533 = vmatmul.mubr.f32.vlgmr.msra.gmra.mrb[16].mxu1 %v2000_v17  ;;  %3649 = vmatpush1.bf16.msra.mxu0 %v3648_v14  ;;  %v1893_v14 = vld [vmem:[#allocation14 + $0xd50] sm:$0xff]  ;;  %v1900_v17 = vld [vmem:[#allocation14 + $0xd88] sm:$0xff]  ;;  %v3940_v13 = vpack.c.bf16 %v1929_v5, %v1925_v8  ;;  %v1967_v5 = vld [vmem:[#allocation14 + $0xfa0] sm:$0xff] }
 0x552   : > { %2319 = vmatprep.mubr.f32.mxu0 %v2012_v28  ;;  %3905 = vmatpush1.bf16.msra.mxu1 %v3904_v18  ;;  %v1904_v18 = vld [vmem:[#allocation14 + $0xda8] sm:$0xff] }
 0x553   : > { %2603 = vmatprep.mubr.f32.mxu1 %v2012_v28  ;;  %3651 = vmatprep.subr.bf16.mxu0 %v3650_v24  ;;  %v3924_v24 = vpack.c.bf16 %v1897_v16, %v1893_v14  ;;  %v3670_v25 = vpack.c.bf16 %v1904_v18, %v1900_v17  ;;  %v1901_v28 = vld [vmem:[#allocation14 + $0xd90] sm:$0xff]  ;;  %v1935_v16 = vld [vmem:[#allocation14 + $0xea0] sm:$0xff] }
 0x554   : > { %3907 = vmatprep.subr.bf16.mxu1 %v3906_v29  ;;  %v3926_v29 = vpack.c.bf16 %v1906_v21, %v1902_v19  ;;  %v3928_v35 = vpack.c.bf16 %v1905_v30, %v1901_v28  ;;  %v1933_v17 = vld [vmem:[#allocation14 + $0xe90] sm:$0xff]  ;;  %v1940_v21 = vld [vmem:[#allocation14 + $0xec8] sm:$0xff]  ;;  %v1943_v30 = vld [vmem:[#allocation14 + $0xee0] sm:$0xff] }
 0x555   : > { %3653 = vmatpush1.bf16.msra.mxu0 %v3652_v43  ;;  %v1912_v43 = vld [vmem:[#allocation14 + $0xde8] sm:$0xff]  ;;  %v1937_v19 = vld [vmem:[#allocation14 + $0xeb0] sm:$0xff] }
 0x556   : > { %3909 = vmatpush1.bf16.msra.mxu1 %v3908_v32  ;;  %3655 = vmatprep.subr.bf16.mxu0 %v3654_v33  ;;  %v1910_v32 = vld [vmem:[#allocation14 + $0xdd8] sm:$0xff]  ;;  %v3674_v37 = vpack.c.bf16 %v1912_v43, %v1908_v31  ;;  %v3944_v27 = vpack.c.bf16 %v1937_v19, %v1933_v17  ;;  %v1941_v31 = vld [vmem:[#allocation14 + $0xed0] sm:$0xff]  ;;  %v1975_v19 = vld [vmem:[#allocation14 + $0xfe0] sm:$0xff] }
 0x557   : > { %3911 = vmatprep.subr.bf16.mxu1 %v3910_v39  ;;  %v1914_v33 = vld [vmem:[#allocation14 + $0xdf8] sm:$0xff]  ;;  %v1907_v39 = vld [vmem:[#allocation14 + $0xdc0] sm:$0xff] }
 0x558   : > { %v3930_v48 = vpack.c.bf16 %v1914_v33, %v1910_v32  ;;  %v3676_v44 = vpack.c.bf16 %v1911_v12, %v1907_v39  ;;  %v1945_v32 = vld [vmem:[#allocation14 + $0xef0] sm:$0xff]  ;;  %v1948_v33 = vld [vmem:[#allocation14 + $0xf08] sm:$0xff] }
 0x559   : > { %3657 = vmatpush1.bf16.msra.mxu0 %v3656_v50  ;;  %v1920_v50 = vld [vmem:[#allocation14 + $0xe28] sm:$0xff]  ;;  %v3948_v12 = vpack.c.bf16 %v1945_v32, %v1941_v31  ;;  %v2616_v31 = vld [vmem:[#allocation17 + $0x10] sm:$0xff]  ;;  %v2621_v32 = vld [vmem:[#allocation17 + $0x38] sm:$0xff] }
 0x55a   : > { %3913 = vmatpush1.bf16.msra.mxu1 %v3912_v51  ;;  %3659 = vmatprep.subr.bf16.mxu0 %v3658_v52  ;;  %v1918_v51 = vld [vmem:[#allocation14 + $0xe18] sm:$0xff]  ;;  %v3678_v54 = vpack.c.bf16 %v1920_v50, %v1916_v49  ;;  %v1949_v49 = vld [vmem:[#allocation14 + $0xf10] sm:$0xff] }
 0x55b   : > { %3915 = vmatprep.subr.bf16.mxu1 %v3914_v55  ;;  %v1922_v52 = vld [vmem:[#allocation14 + $0xe38] sm:$0xff]  ;;  %v1915_v55 = vld [vmem:[#allocation14 + $0xe00] sm:$0xff] }
 0x55c   : > { %v3934_v59 = vpack.c.bf16 %v1922_v52, %v1918_v51  ;;  %v3680_v1 = vpack.c.bf16 %v1919_v56, %v1915_v55  ;;  %v1953_v51 = vld [vmem:[#allocation14 + $0xf30] sm:$0xff]  ;;  %v1956_v52 = vld [vmem:[#allocation14 + $0xf48] sm:$0xff] }
 0x55d   : > { %3661 = vmatpush1.bf16.msra.mxu0 %v3660_v62  ;;  %v1928_v62 = vld [vmem:[#allocation14 + $0xe68] sm:$0xff]  ;;  %v3952_v56 = vpack.c.bf16 %v1953_v51, %v1949_v49 }
 0x55e   : > { %3917 = vmatpush1.bf16.msra.mxu1 %v3916_v63  ;;  %3663 = vmatprep.subr.bf16.mxu0 %v3662_v0  ;;  %v1926_v63 = vld [vmem:[#allocation14 + $0xe58] sm:$0xff]  ;;  %v3682_v3 = vpack.c.bf16 %v1928_v62, %v1924_v61  ;;  %v1957_v61 = vld [vmem:[#allocation14 + $0xf50] sm:$0xff]  ;;  %v2622_v49 = vld [vmem:[#allocation17 + $0x40] sm:$0xff] }
 0x55f   : > { %3919 = vmatprep.subr.bf16.mxu1 %v3918_v4  ;;  %v1930_v0 = vld [vmem:[#allocation14 + $0xe78] sm:$0xff]  ;;  %v1923_v4 = vld [vmem:[#allocation14 + $0xe40] sm:$0xff]  ;;  %v2627_v51 = vld [vmem:[#allocation17 + $0x68] sm:$0xff] }
 0x560   : > { %v3938_v9 = vpack.c.bf16 %v1930_v0, %v1926_v63  ;;  %v3684_v40 = vpack.c.bf16 %v1927_v7, %v1923_v4  ;;  %v1961_v63 = vld [vmem:[#allocation14 + $0xf70] sm:$0xff]  ;;  %v1964_v0 = vld [vmem:[#allocation14 + $0xf88] sm:$0xff] }
 0x561   : > { %3665 = vmatpush1.bf16.msra.mxu0 %v3664_v11  ;;  %v1936_v11 = vld [vmem:[#allocation14 + $0xea8] sm:$0xff]  ;;  %v3956_v7 = vpack.c.bf16 %v1961_v63, %v1957_v61  ;;  %v2637_v61 = vld [vmem:[#allocation17 + $0xb8] sm:$0xff] }
 0x562   : > { %3921 = vmatpush1.bf16.msra.mxu1 %v3920_v36  ;;  %3667 = vmatprep.subr.bf16.mxu0 %v3666_v38  ;;  %v1934_v36 = vld [vmem:[#allocation14 + $0xe98] sm:$0xff]  ;;  %v3686_v14 = vpack.c.bf16 %v1936_v11, %v1932_v10  ;;  %v1965_v10 = vld [vmem:[#allocation14 + $0xf90] sm:$0xff] }
 0x563   : > { %3923 = vmatprep.subr.bf16.mxu1 %v3922_v15  ;;  %v1938_v38 = vld [vmem:[#allocation14 + $0xeb8] sm:$0xff]  ;;  %v1931_v15 = vld [vmem:[#allocation14 + $0xe80] sm:$0xff] }
 0x564   : > { %v3942_v18 = vpack.c.bf16 %v1938_v38, %v1934_v36  ;;  %v3688_v26 = vpack.c.bf16 %v1935_v16, %v1931_v15  ;;  %v1969_v36 = vld [vmem:[#allocation14 + $0xfb0] sm:$0xff]  ;;  %v1972_v38 = vld [vmem:[#allocation14 + $0xfc8] sm:$0xff] }
 0x565   : > { %3669 = vmatpush1.bf16.msra.mxu0 %v3668_v23  ;;  %v1944_v23 = vld [vmem:[#allocation14 + $0xee8] sm:$0xff]  ;;  %v3960_v16 = vpack.c.bf16 %v1969_v36, %v1965_v10  ;;  %v2645_v10 = vld [vmem:[#allocation17 + $0xf8] sm:$0xff] }
 0x566   : > { %3925 = vmatpush1.bf16.msra.mxu1 %v3924_v24  ;;  %3671 = vmatprep.subr.bf16.mxu0 %v3670_v25  ;;  %v1942_v24 = vld [vmem:[#allocation14 + $0xed8] sm:$0xff]  ;;  %v3690_v28 = vpack.c.bf16 %v1944_v23, %v1940_v21  ;;  %v1973_v21 = vld [vmem:[#allocation14 + $0xfd0] sm:$0xff] }
 0x567   : > { %3927 = vmatprep.subr.bf16.mxu1 %v3926_v29  ;;  %v1946_v25 = vld [vmem:[#allocation14 + $0xef8] sm:$0xff]  ;;  %v1939_v29 = vld [vmem:[#allocation14 + $0xec0] sm:$0xff] }
 0x568   : > { %v3946_v43 = vpack.c.bf16 %v1946_v25, %v1942_v24  ;;  %v3692_v39 = vpack.c.bf16 %v1943_v30, %v1939_v29  ;;  %v1977_v24 = vld [vmem:[#allocation14 + $0xff0] sm:$0xff]  ;;  %v2614_v30 = vld [vmem:[#allocation17] sm:$0xff] }
 0x569   : > { %3673 = vmatpush1.bf16.msra.mxu0 %v3672_v34  ;;  %v1952_v34 = vld [vmem:[#allocation14 + $0xf28] sm:$0xff] }
 0x56a   : > { %3929 = vmatpush1.bf16.msra.mxu1 %v3928_v35  ;;  %3675 = vmatprep.subr.bf16.mxu0 %v3674_v37  ;;  %v1950_v35 = vld [vmem:[#allocation14 + $0xf18] sm:$0xff]  ;;  %v3694_v47 = vpack.c.bf16 %v1952_v34, %v1948_v33  ;;  %v2615_v25 = vld [vmem:[#allocation17 + $0x8] sm:$0xff]  ;;  %v3968_v33 = vpack.c.bf16 %v2616_v31, %v2614_v30  ;;  %v2008_v34 = vrot.slane %v5291_v6, %v1008_v20  ;;  %v2626_v6 = vld [vmem:[#allocation17 + $0x60] sm:$0xff] }
 0x56b   : > { %3931 = vmatprep.subr.bf16.mxu1 %v3930_v48  ;;  %v1954_v37 = vld [vmem:[#allocation14 + $0xf38] sm:$0xff]  ;;  %v1947_v48 = vld [vmem:[#allocation14 + $0xf00] sm:$0xff] }
 0x56c   : > { %v3950_v50 = vpack.c.bf16 %v1954_v37, %v1950_v35  ;;  %v3696_v55 = vpack.c.bf16 %v1951_v22, %v1947_v48  ;;  %v2618_v37 = vld [vmem:[#allocation17 + $0x20] sm:$0xff] }
 0x56d   : > { %3677 = vmatpush1.bf16.msra.mxu0 %v3676_v44  ;;  %v1960_v44 = vld [vmem:[#allocation14 + $0xf68] sm:$0xff] }
 0x56e   : > { %3933 = vmatpush1.bf16.msra.mxu1 %v3932_v53  ;;  %3679 = vmatprep.subr.bf16.mxu0 %v3678_v54  ;;  %v1958_v53 = vld [vmem:[#allocation14 + $0xf58] sm:$0xff]  ;;  %v3698_v57 = vpack.c.bf16 %v1960_v44, %v1956_v52  ;;  %v2654_v31 = vld [vmem:[#allocation17 + $0x140] sm:$0xff] }
 0x56f   : > { %3935 = vmatprep.subr.bf16.mxu1 %v3934_v59  ;;  %v1962_v54 = vld [vmem:[#allocation14 + $0xf78] sm:$0xff]  ;;  %v1955_v59 = vld [vmem:[#allocation14 + $0xf40] sm:$0xff] }
 0x570   : > { %v3954_v62 = vpack.c.bf16 %v1962_v54, %v1958_v53  ;;  %v3700_v4 = vpack.c.bf16 %v1959_v60, %v1955_v59  ;;  %v2629_v52 = vld [vmem:[#allocation17 + $0x78] sm:$0xff]  ;;  %v2628_v44 = vld [vmem:[#allocation17 + $0x70] sm:$0xff]  ;;  %v2631_v53 = vld [vmem:[#allocation17 + $0x88] sm:$0xff] }
 0x571   : > { %3681 = vmatpush1.bf16.msra.mxu0 %v3680_v1  ;;  %v1968_v1 = vld [vmem:[#allocation14 + $0xfa8] sm:$0xff]  ;;  %v3978_v20 = vpack.c.bf16 %v2629_v52, %v2627_v51  ;;  %v2633_v54 = vld [vmem:[#allocation17 + $0x98] sm:$0xff]  ;;  %v2632_v59 = vld [vmem:[#allocation17 + $0x90] sm:$0xff] }
 0x572   : > { %3937 = vmatpush1.bf16.msra.mxu1 %v3936_v2  ;;  %3683 = vmatprep.subr.bf16.mxu0 %v3682_v3  ;;  %v1966_v2 = vld [vmem:[#allocation14 + $0xf98] sm:$0xff]  ;;  %v3702_v8 = vpack.c.bf16 %v1968_v1, %v1964_v0  ;;  %v2635_v60 = vld [vmem:[#allocation17 + $0xa8] sm:$0xff]  ;;  %v2634_v0 = vld [vmem:[#allocation17 + $0xa0] sm:$0xff] }
 0x573   : > { %3939 = vmatprep.subr.bf16.mxu1 %v3938_v9  ;;  %v1970_v3 = vld [vmem:[#allocation14 + $0xfb8] sm:$0xff]  ;;  %v1963_v9 = vld [vmem:[#allocation14 + $0xf80] sm:$0xff]  ;;  %v3986_v63 = vpack.c.bf16 %v2637_v61, %v2635_v60  ;;  %v2667_v51 = vld [vmem:[#allocation17 + $0x1a8] sm:$0xff] }
 0x574   : > { %v3958_v11 = vpack.c.bf16 %v1970_v3, %v1966_v2  ;;  %v3704_v15 = vpack.c.bf16 %v1967_v5, %v1963_v9  ;;  %v2636_v1 = vld [vmem:[#allocation17 + $0xb0] sm:$0xff]  ;;  %v2639_v2 = vld [vmem:[#allocation17 + $0xc8] sm:$0xff]  ;;  %v2641_v3 = vld [vmem:[#allocation17 + $0xd8] sm:$0xff] }
 0x575   : > { %3685 = vmatpush1.bf16.msra.mxu0 %v3684_v40  ;;  %v1976_v40 = vld [vmem:[#allocation14 + $0xfe8] sm:$0xff]  ;;  %v2640_v9 = vld [vmem:[#allocation17 + $0xd0] sm:$0xff]  ;;  %v2669_v52 = vld [vmem:[#allocation17 + $0x1b8] sm:$0xff] }
 0x576   : > { %3941 = vmatpush1.bf16.msra.mxu1 %v3940_v13  ;;  %3687 = vmatprep.subr.bf16.mxu0 %v3686_v14  ;;  %v1974_v13 = vld [vmem:[#allocation14 + $0xfd8] sm:$0xff]  ;;  %v3706_v17 = vpack.c.bf16 %v1976_v40, %v1972_v38  ;;  %v2643_v5 = vld [vmem:[#allocation17 + $0xe8] sm:$0xff]  ;;  %v2642_v38 = vld [vmem:[#allocation17 + $0xe0] sm:$0xff] }
 0x577   : > { %3943 = vmatprep.subr.bf16.mxu1 %v3942_v18  ;;  %v1978_v14 = vld [vmem:[#allocation14 + $0xff8] sm:$0xff]  ;;  %v1971_v18 = vld [vmem:[#allocation14 + $0xfc0] sm:$0xff]  ;;  %v3994_v36 = vpack.c.bf16 %v2645_v10, %v2643_v5  ;;  %v2675_v61 = vld [vmem:[#allocation17 + $0x1e8] sm:$0xff] }
 0x578   : > { %v3962_v23 = vpack.c.bf16 %v1978_v14, %v1974_v13  ;;  %v2644_v40 = vld [vmem:[#allocation17 + $0xf0] sm:$0xff]  ;;  %v2647_v13 = vld [vmem:[#allocation17 + $0x108] sm:$0xff]  ;;  %v2649_v14 = vld [vmem:[#allocation17 + $0x118] sm:$0xff] }
 0x579   : > { %3689 = vmatpush1.bf16.msra.mxu0 %v3688_v26  ;;  %v2617_v26 = vld [vmem:[#allocation17 + $0x18] sm:$0xff]  ;;  %v2898_v5 = vld [vmem:[#allocation20] sm:$0xff] }
 0x57a   : > { %3945 = vmatpush1.bf16.msra.mxu1 %v3944_v27  ;;  %3691 = vmatprep.subr.bf16.mxu0 %v3690_v28  ;;  %v3708_v27 = vpack.c.bf16 %v1975_v19, %v1971_v18  ;;  %v3964_v28 = vpack.c.bf16 %v1977_v24, %v1973_v21  ;;  %v3966_v29 = vpack.c.bf16 %v2617_v26, %v2615_v25  ;;  %v2648_v18 = vld [vmem:[#allocation17 + $0x110] sm:$0xff]  ;;  %v2651_v19 = vld [vmem:[#allocation17 + $0x128] sm:$0xff]  ;;  %v2653_v21 = vld [vmem:[#allocation17 + $0x138] sm:$0xff] }
 0x57b   : > { %3947 = vmatprep.subr.bf16.mxu1 %v3946_v43  ;;  %v2619_v43 = vld [vmem:[#allocation17 + $0x28] sm:$0xff]  ;;  %v4002_v24 = vpack.c.bf16 %v2653_v21, %v2651_v19  ;;  %v2650_v25 = vld [vmem:[#allocation17 + $0x120] sm:$0xff]  ;;  %v2652_v26 = vld [vmem:[#allocation17 + $0x130] sm:$0xff] }
 0x57c   : > { %v3970_v35 = vpack.c.bf16 %v2621_v32, %v2619_v43  ;;  %v2656_v43 = vld [vmem:[#allocation17 + $0x150] sm:$0xff]  ;;  %v2659_v32 = vld [vmem:[#allocation17 + $0x168] sm:$0xff] }
 0x57d   : > { %3693 = vmatpush1.bf16.msra.mxu0 %v3692_v39  ;;  %v2620_v39 = vld [vmem:[#allocation17 + $0x30] sm:$0xff]  ;;  %v2902_v21 = vld [vmem:[#allocation20 + $0x20] sm:$0xff] }
 0x57e   : > { %3949 = vmatpush1.bf16.msra.mxu1 %v3948_v12  ;;  %3695 = vmatprep.subr.bf16.mxu0 %v3694_v47  ;;  %v2623_v12 = vld [vmem:[#allocation17 + $0x48] sm:$0xff]  ;;  %v2625_v47 = vld [vmem:[#allocation17 + $0x58] sm:$0xff]  ;;  %v3972_v48 = vpack.c.bf16 %v2620_v39, %v2618_v37  ;;  %v2658_v37 = vld [vmem:[#allocation17 + $0x160] sm:$0xff] }
 0x57f   : > { %3951 = vmatprep.subr.bf16.mxu1 %v3950_v50  ;;  %v3974_v22 = vpack.c.bf16 %v2625_v47, %v2623_v12  ;;  %v2624_v50 = vld [vmem:[#allocation17 + $0x50] sm:$0xff]  ;;  %v2663_v12 = vld [vmem:[#allocation17 + $0x188] sm:$0xff]  ;;  %v2665_v47 = vld [vmem:[#allocation17 + $0x198] sm:$0xff] }
 0x580   : > { %v3976_v41 = vpack.c.bf16 %v2624_v50, %v2622_v49  ;;  %v2660_v39 = vld [vmem:[#allocation17 + $0x170] sm:$0xff]  ;;  %v2662_v49 = vld [vmem:[#allocation17 + $0x180] sm:$0xff] }
 0x581   : > { %3697 = vmatpush1.bf16.msra.mxu0 %v3696_v55  ;;  %v3980_v55 = vpack.c.bf16 %v2628_v44, %v2626_v6  ;;  %v2664_v50 = vld [vmem:[#allocation17 + $0x190] sm:$0xff]  ;;  %v2666_v6 = vld [vmem:[#allocation17 + $0x1a0] sm:$0xff] }
 0x582   : > { %3953 = vmatpush1.bf16.msra.mxu1 %v3952_v56  ;;  %3699 = vmatprep.subr.bf16.mxu0 %v3698_v57  ;;  %v3982_v56 = vpack.c.bf16 %v2633_v54, %v2631_v53  ;;  %v2630_v57 = vld [vmem:[#allocation17 + $0x80] sm:$0xff]  ;;  %v2668_v44 = vld [vmem:[#allocation17 + $0x1b0] sm:$0xff]  ;;  %v2671_v53 = vld [vmem:[#allocation17 + $0x1c8] sm:$0xff] }
 0x583   : > { %3955 = vmatprep.subr.bf16.mxu1 %v3954_v62  ;;  %v3984_v62 = vpack.c.bf16 %v2632_v59, %v2630_v57  ;;  %v2673_v54 = vld [vmem:[#allocation17 + $0x1d8] sm:$0xff]  ;;  %v2670_v57 = vld [vmem:[#allocation17 + $0x1c0] sm:$0xff]  ;;  %v2672_v59 = vld [vmem:[#allocation17 + $0x1d0] sm:$0xff] }
 0x584   : > { %v4024_v60 = vpack.c.bf16 %v2672_v59, %v2670_v57  ;;  %v2680_v57 = vld [vmem:[#allocation17 + $0x210] sm:$0xff] }
 0x585   : > { %3701 = vmatpush1.bf16.msra.mxu0 %v3700_v4  ;;  %v3988_v4 = vpack.c.bf16 %v2636_v1, %v2634_v0  ;;  %v2674_v0 = vld [vmem:[#allocation17 + $0x1e0] sm:$0xff]  ;;  %v2676_v1 = vld [vmem:[#allocation17 + $0x1f0] sm:$0xff] }
 0x586   : > { %3957 = vmatpush1.bf16.msra.mxu1 %v3956_v7  ;;  %3703 = vmatprep.subr.bf16.mxu0 %v3702_v8  ;;  %v3990_v7 = vpack.c.bf16 %v2641_v3, %v2639_v2  ;;  %v2638_v8 = vld [vmem:[#allocation17 + $0xc0] sm:$0xff]  ;;  %v4028_v2 = vpack.c.bf16 %v2676_v1, %v2674_v0  ;;  %v2679_v3 = vld [vmem:[#allocation17 + $0x208] sm:$0xff] }
 0x587   : > { %3959 = vmatprep.subr.bf16.mxu1 %v3958_v11  ;;  %v3992_v11 = vpack.c.bf16 %v2640_v9, %v2638_v8  ;;  %v2914_v8 = vld [vmem:[#allocation20 + $0x80] sm:$0xff]  ;;  %v2915_v9 = vld [vmem:[#allocation20 + $0x88] sm:$0xff] }
 0x588   : > { %v4094_v10 = vpack.c.bf16 %v2915_v9, %v2914_v8  ;;  %v2689_v9 = vld [vmem:[#allocation17 + $0x258] sm:$0xff] }
 0x589   : > { %3705 = vmatpush1.bf16.msra.mxu0 %v3704_v15  ;;  %v3996_v15 = vpack.c.bf16 %v2644_v40, %v2642_v38  ;;  %v2917_v38 = vld [vmem:[#allocation20 + $0x98] sm:$0xff] }
 0x58a   : > { %3961 = vmatpush1.bf16.msra.mxu1 %v3960_v16  ;;  %3707 = vmatprep.subr.bf16.mxu0 %v3706_v17  ;;  %v3998_v16 = vpack.c.bf16 %v2649_v14, %v2647_v13  ;;  %v2646_v17 = vld [vmem:[#allocation17 + $0x100] sm:$0xff]  ;;  %v2900_v14 = vld [vmem:[#allocation20 + $0x10] sm:$0xff] }
 0x58b   : > { %3963 = vmatprep.subr.bf16.mxu1 %v3962_v23  ;;  %v4000_v23 = vpack.c.bf16 %v2648_v18, %v2646_v17  ;;  %v2919_v17 = vld [vmem:[#allocation20 + $0xa8] sm:$0xff] }
 0x58d   : > { %3709 = vmatpush1.bf16.msra.mxu0 %v3708_v27  ;;  %v2655_v27 = vld [vmem:[#allocation17 + $0x148] sm:$0xff] }
 0x58e   : > { %3965 = vmatpush1.bf16.msra.mxu1 %v3964_v28  ;;  %3967 = vmatprep.subr.bf16.mxu0 %v3966_v29  ;;  %v2657_v28 = vld [vmem:[#allocation17 + $0x158] sm:$0xff]  ;;  %v4004_v29 = vpack.c.bf16 %v2652_v26, %v2650_v25 }
 0x58f   : > { %v4006_v30 = vpack.c.bf16 %v2657_v28, %v2655_v27  ;;  %4095 = vmatprep.subr.bf16.mxu1 %v4094_v10  ;;  %v2921_v25 = vld [vmem:[#allocation20 + $0xb8] sm:$0xff]  ;;  %v2904_v28 = vld [vmem:[#allocation20 + $0x30] sm:$0xff] }
 0x590   : > { %2320 = vmatmul.mubr.f32.vlgmr.msra.gmra.mrb[4].mxu0 %v2008_v34 }
 0x591   : > { %2604 = vmatmul.mubr.f32.vlgmr.msra.gmra.mrb[16].mxu1 %v2008_v34  ;;  %3969 = vmatpush1.bf16.msra.mxu0 %v3968_v33  ;;  %v2661_v33 = vld [vmem:[#allocation17 + $0x178] sm:$0xff]  ;;  %v4008_v34 = vpack.c.bf16 %v2656_v43, %v2654_v31  ;;  %v2923_v31 = vld [vmem:[#allocation20 + $0xc8] sm:$0xff] }
 0x592   : > { %3971 = vmatprep.subr.bf16.mxu0 %v3970_v35  ;;  %v4010_v35 = vpack.c.bf16 %v2661_v33, %v2659_v32  ;;  %v2906_v33 = vld [vmem:[#allocation20 + $0x40] sm:$0xff] }
 0x595   : > { %3973 = vmatpush1.bf16.msra.mxu0 %v3972_v48  ;;  %v4012_v48 = vpack.c.bf16 %v2660_v39, %v2658_v37  ;;  %v2925_v37 = vld [vmem:[#allocation20 + $0xd8] sm:$0xff] }
 0x596   : > { %3975 = vmatprep.subr.bf16.mxu0 %v3974_v22  ;;  %v4014_v22 = vpack.c.bf16 %v2665_v47, %v2663_v12  ;;  %v2908_v47 = vld [vmem:[#allocation20 + $0x50] sm:$0xff] }
 0x599   : > { %3977 = vmatpush1.bf16.msra.mxu0 %v3976_v41  ;;  %v4016_v41 = vpack.c.bf16 %v2664_v50, %v2662_v49  ;;  %v2927_v49 = vld [vmem:[#allocation20 + $0xe8] sm:$0xff] }
 0x59a   : > { %3979 = vmatprep.subr.bf16.mxu0 %v3978_v20  ;;  %v4018_v20 = vpack.c.bf16 %v2669_v52, %v2667_v51  ;;  %v5313_v52 = vld [vmem:[#allocation15] sm:$0xf] }
 0x59d   : > { %3981 = vmatpush1.bf16.msra.mxu0 %v3980_v55  ;;  %v4020_v55 = vpack.c.bf16 %v2668_v44, %v2666_v6  ;;  %v2037_v6 = vrot.slane %v5313_v52, %v5273_v58  ;;  %v2687_v58 = vld [vmem:[#allocation17 + $0x248] sm:$0xff] }
 0x59e   : > { %3983 = vmatprep.subr.bf16.mxu0 %v3982_v56  ;;  %v4022_v56 = vpack.c.bf16 %v2673_v54, %v2671_v53  ;;  %v4038_v10 = vpack.c.bf16 %v2689_v9, %v2687_v58  ;;  %v2724_v58 = vld [vmem:[#allocation17 + $0x370] sm:$0xff]  ;;  %v2727_v9 = vld [vmem:[#allocation17 + $0x388] sm:$0xff] }
 0x5a1   : > { %3985 = vmatpush1.bf16.msra.mxu0 %v3984_v62  ;;  %v2677_v62 = vld [vmem:[#allocation17 + $0x1f8] sm:$0xff] }
 0x5a2   : > { %3987 = vmatprep.subr.bf16.mxu0 %v3986_v63  ;;  %v4026_v63 = vpack.c.bf16 %v2677_v62, %v2675_v61  ;;  %v2683_v61 = vld [vmem:[#allocation17 + $0x228] sm:$0xff]  ;;  %v2685_v62 = vld [vmem:[#allocation17 + $0x238] sm:$0xff] }
 0x5a5   : > { %3989 = vmatpush1.bf16.msra.mxu0 %v3988_v4  ;;  %v2681_v4 = vld [vmem:[#allocation17 + $0x218] sm:$0xff] }
 0x5a6   : > { %3991 = vmatprep.subr.bf16.mxu0 %v3990_v7  ;;  %v4030_v7 = vpack.c.bf16 %v2681_v4, %v2679_v3  ;;  %v4034_v3 = vpack.c.bf16 %v2685_v62, %v2683_v61  ;;  %v2682_v4 = vld [vmem:[#allocation17 + $0x220] sm:$0xff]  ;;  %v2721_v61 = vld [vmem:[#allocation17 + $0x358] sm:$0xff] }
 0x5a9   : > { %3993 = vmatpush1.bf16.msra.mxu0 %v3992_v11  ;;  %v2899_v11 = vld [vmem:[#allocation20 + $0x8] sm:$0xff] }
 0x5aa   : > { %3995 = vmatprep.subr.bf16.mxu0 %v3994_v36  ;;  %v2916_v36 = vld [vmem:[#allocation20 + $0x90] sm:$0xff]  ;;  %v4096_v40 = vpack.c.bf16 %v2899_v11, %v2898_v5  ;;  %v2686_v11 = vld [vmem:[#allocation17 + $0x240] sm:$0xff] }
 0x5ab   : > { %v4098_v13 = vpack.c.bf16 %v2917_v38, %v2916_v36  ;;  %v2688_v36 = vld [vmem:[#allocation17 + $0x250] sm:$0xff]  ;;  %v2691_v38 = vld [vmem:[#allocation17 + $0x268] sm:$0xff] }
 0x5ac   : > { %4097 = vmatpush3.bf16.msra.mxu1 %v4096_v40  ;;  %v2693_v40 = vld [vmem:[#allocation17 + $0x278] sm:$0xff] }
 0x5ad   : > { %3997 = vmatpush1.bf16.msra.mxu0 %v3996_v15  ;;  %v2901_v15 = vld [vmem:[#allocation20 + $0x18] sm:$0xff]  ;;  %4099 = vmatprep.subr.bf16.mxu1 %v4098_v13  ;;  %v4040_v13 = vpack.c.bf16 %v2688_v36, %v2686_v11 }
 0x5ae   : > { %3999 = vmatprep.subr.bf16.mxu0 %v3998_v16  ;;  %v2918_v16 = vld [vmem:[#allocation20 + $0xa0] sm:$0xff]  ;;  %v4100_v18 = vpack.c.bf16 %v2901_v15, %v2900_v14  ;;  %v4042_v14 = vpack.c.bf16 %v2693_v40, %v2691_v38  ;;  %v2728_v38 = vld [vmem:[#allocation17 + $0x390] sm:$0xff] }
 0x5af   : > { %v4102_v19 = vpack.c.bf16 %v2919_v17, %v2918_v16  ;;  %v2690_v15 = vld [vmem:[#allocation17 + $0x260] sm:$0xff]  ;;  %v2692_v16 = vld [vmem:[#allocation17 + $0x270] sm:$0xff]  ;;  %v2695_v17 = vld [vmem:[#allocation17 + $0x288] sm:$0xff] }
 0x5b0   : > { %4101 = vmatpush3.bf16.msra.mxu1 %v4100_v18  ;;  %v2697_v18 = vld [vmem:[#allocation17 + $0x298] sm:$0xff]  ;;  %v2726_v36 = vld [vmem:[#allocation17 + $0x380] sm:$0xff]  ;;  %v2731_v40 = vld [vmem:[#allocation17 + $0x3a8] sm:$0xff] }
 0x5b1   : > { %4001 = vmatpush1.bf16.msra.mxu0 %v4000_v23  ;;  %v2903_v23 = vld [vmem:[#allocation20 + $0x28] sm:$0xff]  ;;  %4103 = vmatprep.subr.bf16.mxu1 %v4102_v19  ;;  %v4044_v19 = vpack.c.bf16 %v2692_v16, %v2690_v15  ;;  %v2730_v16 = vld [vmem:[#allocation17 + $0x3a0] sm:$0xff] }
 0x5b2   : > { %4003 = vmatprep.subr.bf16.mxu0 %v4002_v24  ;;  %v2920_v24 = vld [vmem:[#allocation20 + $0xb0] sm:$0xff]  ;;  %v4104_v26 = vpack.c.bf16 %v2903_v23, %v2902_v21  ;;  %v4046_v21 = vpack.c.bf16 %v2697_v18, %v2695_v17  ;;  %v2694_v23 = vld [vmem:[#allocation17 + $0x280] sm:$0xff]  ;;  %v2735_v18 = vld [vmem:[#allocation17 + $0x3c8] sm:$0xff] }
 0x5b3   : > { %v4106_v27 = vpack.c.bf16 %v2921_v25, %v2920_v24  ;;  %v2696_v24 = vld [vmem:[#allocation17 + $0x290] sm:$0xff]  ;;  %v2699_v25 = vld [vmem:[#allocation17 + $0x2a8] sm:$0xff] }
 0x5b4   : > { %4105 = vmatpush3.bf16.msra.mxu1 %v4104_v26  ;;  %v2701_v26 = vld [vmem:[#allocation17 + $0x2b8] sm:$0xff]  ;;  %v2732_v17 = vld [vmem:[#allocation17 + $0x3b0] sm:$0xff] }
 0x5b5   : > { %4005 = vmatpush1.bf16.msra.mxu0 %v4004_v29  ;;  %v2905_v29 = vld [vmem:[#allocation20 + $0x38] sm:$0xff]  ;;  %4107 = vmatprep.subr.bf16.mxu1 %v4106_v27  ;;  %v4048_v27 = vpack.c.bf16 %v2696_v24, %v2694_v23 }
 0x5b6   : > { %4007 = vmatprep.subr.bf16.mxu0 %v4006_v30  ;;  %v2922_v30 = vld [vmem:[#allocation20 + $0xc0] sm:$0xff]  ;;  %v4108_v43 = vpack.c.bf16 %v2905_v29, %v2904_v28  ;;  %v4050_v28 = vpack.c.bf16 %v2701_v26, %v2699_v25  ;;  %v2736_v25 = vld [vmem:[#allocation17 + $0x3d0] sm:$0xff] }
 0x5b7   : > { %v4110_v32 = vpack.c.bf16 %v2923_v31, %v2922_v30  ;;  %v2698_v29 = vld [vmem:[#allocation17 + $0x2a0] sm:$0xff]  ;;  %v2700_v30 = vld [vmem:[#allocation17 + $0x2b0] sm:$0xff]  ;;  %v2703_v31 = vld [vmem:[#allocation17 + $0x2c8] sm:$0xff] }
 0x5b8   : > { %4109 = vmatpush3.bf16.msra.mxu1 %v4108_v43  ;;  %v2705_v43 = vld [vmem:[#allocation17 + $0x2d8] sm:$0xff]  ;;  %v2734_v24 = vld [vmem:[#allocation17 + $0x3c0] sm:$0xff]  ;;  %v2739_v26 = vld [vmem:[#allocation17 + $0x3e8] sm:$0xff] }
 0x5b9   : > { %4009 = vmatpush1.bf16.msra.mxu0 %v4008_v34  ;;  %v2907_v34 = vld [vmem:[#allocation20 + $0x48] sm:$0xff]  ;;  %4111 = vmatprep.subr.bf16.mxu1 %v4110_v32  ;;  %v4052_v32 = vpack.c.bf16 %v2700_v30, %v2698_v29  ;;  %v2033_v29 = vrot.slane %v5313_v52, %v5270_v46  ;;  %v2912_v46 = vld [vmem:[#allocation20 + $0x70] sm:$0xff] }
 0x5ba   : > { %4011 = vmatprep.subr.bf16.mxu0 %v4010_v35  ;;  %v2924_v35 = vld [vmem:[#allocation20 + $0xd0] sm:$0xff]  ;;  %v4112_v39 = vpack.c.bf16 %v2907_v34, %v2906_v33  ;;  %v4054_v33 = vpack.c.bf16 %v2705_v43, %v2703_v31  ;;  %v2702_v34 = vld [vmem:[#allocation17 + $0x2c0] sm:$0xff] }
 0x5bb   : > { %v4114_v12 = vpack.c.bf16 %v2925_v37, %v2924_v35  ;;  %v2704_v35 = vld [vmem:[#allocation17 + $0x2d0] sm:$0xff]  ;;  %v2707_v37 = vld [vmem:[#allocation17 + $0x2e8] sm:$0xff]  ;;  %v2738_v31 = vld [vmem:[#allocation17 + $0x3e0] sm:$0xff] }
 0x5bc   : > { %4113 = vmatpush3.bf16.msra.mxu1 %v4112_v39  ;;  %v2709_v39 = vld [vmem:[#allocation17 + $0x2f8] sm:$0xff]  ;;  %v2740_v43 = vld [vmem:[#allocation17 + $0x3f0] sm:$0xff] }
 0x5bd   : > { %4013 = vmatpush1.bf16.msra.mxu0 %v4012_v48  ;;  %v2909_v48 = vld [vmem:[#allocation20 + $0x58] sm:$0xff]  ;;  %4115 = vmatprep.subr.bf16.mxu1 %v4114_v12  ;;  %v4056_v12 = vpack.c.bf16 %v2704_v35, %v2702_v34  ;;  %v2910_v35 = vld [vmem:[#allocation20 + $0x60] sm:$0xff] }
 0x5be   : > { %4015 = vmatprep.subr.bf16.mxu0 %v4014_v22  ;;  %v2926_v22 = vld [vmem:[#allocation20 + $0xe0] sm:$0xff]  ;;  %v4116_v50 = vpack.c.bf16 %v2909_v48, %v2908_v47  ;;  %v4058_v47 = vpack.c.bf16 %v2709_v39, %v2707_v37  ;;  %v2911_v37 = vld [vmem:[#allocation20 + $0x68] sm:$0xff] }
 0x5bf   : > { %v4118_v51 = vpack.c.bf16 %v2927_v49, %v2926_v22  ;;  %v2706_v48 = vld [vmem:[#allocation17 + $0x2e0] sm:$0xff]  ;;  %v2708_v22 = vld [vmem:[#allocation17 + $0x2f0] sm:$0xff]  ;;  %v2711_v49 = vld [vmem:[#allocation17 + $0x308] sm:$0xff]  ;;  %v4120_v39 = vpack.c.bf16 %v2911_v37, %v2910_v35 }
 0x5c0   : > { %4117 = vmatpush3.bf16.msra.mxu1 %v4116_v50  ;;  %v2713_v50 = vld [vmem:[#allocation17 + $0x318] sm:$0xff] }
 0x5c1   : > { %4017 = vmatpush1.bf16.msra.mxu0 %v4016_v41  ;;  %4119 = vmatprep.subr.bf16.mxu1 %v4118_v51  ;;  %v2025_v41 = vrot.slane %v5313_v52, %v5244_v42  ;;  %v4060_v51 = vpack.c.bf16 %v2708_v22, %v2706_v48 }
 0x5c2   : > { %4019 = vmatprep.subr.bf16.mxu0 %v4018_v20  ;;  %v2029_v20 = vrot.slane %v5313_v52, %v5250_v45  ;;  %v2913_v52 = vld [vmem:[#allocation20 + $0x78] sm:$0xff] }
 0x5c3   : > { %v4124_v22 = vpack.c.bf16 %v2913_v52, %v2912_v46 }
 0x5c4   : > { %4121 = vmatpush3.bf16.msra.mxu1 %v4120_v39 }
 0x5c5   : > { %4021 = vmatpush1.bf16.msra.mxu0 %v4020_v55 }
 0x5c6   : > { %4023 = vmatprep.subr.bf16.mxu0 %v4022_v56  ;;  %v2678_v56 = vld [vmem:[#allocation17 + $0x200] sm:$0xff] }
 0x5c7   : > { %v4032_v1 = vpack.c.bf16 %v2680_v57, %v2678_v56  ;;  %v2714_v57 = vld [vmem:[#allocation17 + $0x320] sm:$0xff] }
 0x5c9   : > { %4025 = vmatpush1.bf16.msra.mxu0 %v4024_v60 }
 0x5ca   : > { %4027 = vmatprep.subr.bf16.mxu0 %v4026_v63 }
 0x5cd   : > { %4029 = vmatpush1.bf16.msra.mxu0 %v4028_v2 }
 0x5ce   : > { %4031 = vmatprep.subr.bf16.mxu0 %v4030_v7  ;;  %v2684_v7 = vld [vmem:[#allocation17 + $0x230] sm:$0xff] }
 0x5cf   : > { %v4036_v5 = vpack.c.bf16 %v2684_v7, %v2682_v4 }
 0x663   : > { %v2321_v44 = vpop.f32.mrb[4].mxu0 }
 0x664   : > { %v4126_v53 = vadd.f32 %v2321_v44, %v2025_v41  ;;  %v5321_v54 = vpop.f32.mrb[16].mxu1  ;;  %v2323_v55 = vpop.f32.mrb[5].mxu0  ;;  %v4062_v41 = vpack.c.bf16 %v2713_v50, %v2711_v49  ;;  %v2715_v44 = vld [vmem:[#allocation17 + $0x328] sm:$0xff]  ;;  %v2742_v49 = vld [vmem:[#allocation18] sm:$0x3] }
 0x665   : > { %v4127_v59 = vadd.f32 %v2323_v55, %v2029_v20  ;;  %v2607_v60 = vpop.f32.mrb[17].mxu1  ;;  %v2710_v20 = vld [vmem:[#allocation17 + $0x300] sm:$0xff]  ;;  %v2751_v50 = vrot.slane %v2742_v49, %v5250_v45 }
 0x666   : > { %v4129_v63 = vadd.f32 %v2607_v60, %v2037_v6  ;;  %v2610_v2 = vmax.f32 %v4126_v53, 0.0  ;;  %v2712_v6 = vld [vmem:[#allocation17 + $0x310] sm:$0xff]  ;;  %v2717_v53 = vld [vmem:[#allocation17 + $0x338] sm:$0xff]  ;;  %v2719_v60 = vld [vmem:[#allocation17 + $0x348] sm:$0xff] }
 0x667   : > { %v2611_v0 = vmax.f32 %v4127_v59, 0.0  ;;  %v4064_v55 = vpack.c.bf16 %v2712_v6, %v2710_v20  ;;  %v4066_v56 = vpack.c.bf16 %v2717_v53, %v2715_v44  ;;  %v2716_v59 = vld [vmem:[#allocation17 + $0x330] sm:$0xff] }
 0x668   : > { %v2613_v8 = vmax.f32 %v4129_v63, 0.0  ;;  %v4068_v62 = vpack.c.bf16 %v2716_v59, %v2714_v57  ;;  %v4070_v63 = vpack.c.bf16 %v2721_v61, %v2719_v60 }
 0x669   : > { %2818 = vmatprep.mubr.f32.mxu0 %v2611_v0  ;;  %v2718_v0 = vld [vmem:[#allocation17 + $0x340] sm:$0xff] }
 0x66a   : > { %2819 = vmatmul.mubr.f32.vlgmr.msra.gmra.mrb[6].mxu0 %v2610_v2  ;;  %v2723_v2 = vld [vmem:[#allocation17 + $0x368] sm:$0xff] }
 0x66b   : > { %4033 = vmatpush1.bf16.msra.mxu0 %v4032_v1  ;;  %2889 = vmatprep.mubr.f32.mxu0 %v2613_v8  ;;  %v2720_v1 = vld [vmem:[#allocation17 + $0x350] sm:$0xff]  ;;  %v2722_v8 = vld [vmem:[#allocation17 + $0x360] sm:$0xff] }
 0x66c   : > { %4035 = vmatprep.subr.bf16.mxu0 %v4034_v3  ;;  %v2725_v3 = vld [vmem:[#allocation17 + $0x378] sm:$0xff]  ;;  %v4072_v4 = vpack.c.bf16 %v2720_v1, %v2718_v0 }
 0x66d   : > { %v4074_v7 = vpack.c.bf16 %v2725_v3, %v2723_v2 }
 0x66f   : > { %4037 = vmatpush1.bf16.msra.mxu0 %v4036_v5  ;;  %v2729_v5 = vld [vmem:[#allocation17 + $0x398] sm:$0xff] }
 0x670   : > { %4039 = vmatprep.subr.bf16.mxu0 %v4038_v10  ;;  %v4076_v10 = vpack.c.bf16 %v2724_v58, %v2722_v8  ;;  %v4078_v11 = vpack.c.bf16 %v2729_v5, %v2727_v9 }
 0x673   : > { %4041 = vmatpush1.bf16.msra.mxu0 %v4040_v13  ;;  %v2733_v13 = vld [vmem:[#allocation17 + $0x3b8] sm:$0xff] }
 0x674   : > { %4043 = vmatprep.subr.bf16.mxu0 %v4042_v14  ;;  %v4080_v14 = vpack.c.bf16 %v2728_v38, %v2726_v36  ;;  %v4082_v15 = vpack.c.bf16 %v2733_v13, %v2731_v40 }
 0x677   : > { %4045 = vmatpush1.bf16.msra.mxu0 %v4044_v19  ;;  %v2737_v19 = vld [vmem:[#allocation17 + $0x3d8] sm:$0xff] }
 0x678   : > { %4047 = vmatprep.subr.bf16.mxu0 %v4046_v21  ;;  %v4084_v21 = vpack.c.bf16 %v2732_v17, %v2730_v16  ;;  %v4086_v23 = vpack.c.bf16 %v2737_v19, %v2735_v18 }
 0x67b   : > { %4049 = vmatpush1.bf16.msra.mxu0 %v4048_v27  ;;  %v2741_v27 = vld [vmem:[#allocation17 + $0x3f8] sm:$0xff] }
 0x67c   : > { %4051 = vmatprep.subr.bf16.mxu0 %v4050_v28  ;;  %v4088_v28 = vpack.c.bf16 %v2736_v25, %v2734_v24  ;;  %v4090_v30 = vpack.c.bf16 %v2741_v27, %v2739_v26 }
 0x67f   : > { %4053 = vmatpush1.bf16.msra.mxu0 %v4052_v32  ;;  %v4092_v32 = vpack.c.bf16 %v2740_v43, %v2738_v31 }
 0x680   : > { %4055 = vmatprep.subr.bf16.mxu0 %v4054_v33  ;;  %v4128_v33 = vadd.f32 %v5321_v54, %v2033_v29  ;;  %v2747_v54 = vrot.slane %v2742_v49, %v5244_v42 }
 0x682   : > { %v2612_v34 = vmax.f32 %v4128_v33, 0.0 }
 0x683   : > { %4057 = vmatpush1.bf16.msra.mxu0 %v4056_v12  ;;  %v2928_v12 = vld [vmem:[#allocation20 + $0xf0] sm:$0xff] }
 0x684   : > { %4059 = vmatprep.subr.bf16.mxu0 %v4058_v47  ;;  %v2929_v47 = vld [vmem:[#allocation20 + $0xf8] sm:$0xff] }
 0x685   : > { %v4122_v48 = vpack.c.bf16 %v2929_v47, %v2928_v12 }
 0x687   : > { %4061 = vmatpush1.bf16.msra.mxu0 %v4060_v51  ;;  %4123 = vmatprep.subr.bf16.mxu1 %v4122_v48 }
 0x688   : > { %4063 = vmatprep.subr.bf16.mxu0 %v4062_v41  ;;  %4125 = vmatpush3.bf16.msra.mxu1 %v4124_v22 }
 0x68b   : > { %4065 = vmatpush1.bf16.msra.mxu0 %v4064_v55 }
 0x68c   : > { %4067 = vmatprep.subr.bf16.mxu0 %v4066_v56  ;;  %v2930_v56 = vld [vmem:[#allocation21] sm:$0x1] }
 0x68f   : > { %4069 = vmatpush1.bf16.msra.mxu0 %v4068_v62 }
 0x690   : > { %4071 = vmatprep.subr.bf16.mxu0 %v4070_v63 }
 0x693   : > { %4073 = vmatpush1.bf16.msra.mxu0 %v4072_v4 }
 0x694   : > { %4075 = vmatprep.subr.bf16.mxu0 %v4074_v7 }
 0x697   : > { %4077 = vmatpush1.bf16.msra.mxu0 %v4076_v10 }
 0x698   : > { %4079 = vmatprep.subr.bf16.mxu0 %v4078_v11 }
 0x69b   : > { %4081 = vmatpush1.bf16.msra.mxu0 %v4080_v14 }
 0x69c   : > { %4083 = vmatprep.subr.bf16.mxu0 %v4082_v15 }
 0x69f   : > { %4085 = vmatpush1.bf16.msra.mxu0 %v4084_v21 }
 0x6a0   : > { %4087 = vmatprep.subr.bf16.mxu0 %v4086_v23 }
 0x6a3   : > { %4089 = vmatpush1.bf16.msra.mxu0 %v4088_v28 }
 0x6a4   : > { %4091 = vmatprep.subr.bf16.mxu0 %v4090_v30 }
 0x6a7   : > { %4093 = vmatpush1.bf16.msra.mxu0 %v4092_v32 }
 0x6aa   : > { %2890 = vmatmul.mubr.f32.vlgmr.msra.gmra.mrb[6].mxu0 %v2612_v34 }
 0x77d   : > { %v2891_v51 = vpop.f32.mrb[6].mxu0 }
 0x77e   : > { %v4130_v41 = vadd.f32 %v2891_v51, %v2747_v54  ;;  %v2893_v20 = vpop.f32.mrb[7].mxu0 }
 0x77f   : > { %v4131_v6 = vadd.f32 %v2893_v20, %v2751_v50 }
 0x780   : > { %v2896_v53 = vmax.f32 %v4130_v41, 0.0 }
 0x781   : > { %v2897_v44 = vmax.f32 %v4131_v6, 0.0 }
 0x783   : > { %2995 = vmatprep.mubr.f32.mxu1 %v2897_v44 }
 0x784   : > { %2996 = vmatmul.mubr.f32.vlgmr.msra.gmra.mrb[18].mxu1 %v2896_v53 }
 0x857   : > { %v3283_v55 = vpop.f32.mrb[18].mxu1 }
 0x858   : > { %v3284_v57 = vpop.f32.mrb[19].mxu1 }
 0x859   : > { %v3285_v59 = vadd.f32 %v3284_v57, %v3283_v55 }
 0x85b   : > { %v2998_v42 = vadd.f32 %v3285_v59, %v2930_v56 }
 0x85d   : > { %3001 = vst [vmem:[%s611_s4] sm:$0x1] %v2998_v42 }
 0x85e   : > { %4681 = shalt.err (!%p4678_p6)
}
 0x85f   : > { %s4682_s2 = scalar_lea.hbm %s5333_s30, 16  ;;  %s4686_s19 = scalar_lea.hbm %s5439_s18, 32 }
 0x860   : > { %p4683_p7 = scmp.ne.s32.totalorder %s5333_s30, %s4682_s2  ;;  %p4687_p0 = scmp.lt.u32.totalorder %s5333_s30, %s5439_s18 }
 0x861   : > { %p4688_p2 = scmp.lt.u32.totalorder %s4686_s19, %s4682_s2  ;;  %p4690_p1 = scmp.lt.u32.totalorder %s4682_s2, %s5333_s30 }
 0x862   : > { %p4684_p9 = pnand %p4683_p7, %p5440_p4 }
 0x863   : > { %p4689_p13 = por %p4688_p2, %p4687_p0 }
 0x864   : > { %p4685_p12 = pneg %p4684_p9 }
 0x865   : > { %p4691_p8 = por %p4690_p1, %p4689_p13 }
 0x867   : > { %p4692_p10 = pnand %p4691_p8, %p4685_p12 }
 0x869   : > { %4695 = shalt.err (!%p4692_p10)
}
 0x86a   : > { %4194 = dma.vmem_to_hbm [thread:$0]  (%p5440_p4), %s5335_s21, 16, %s5333_s30, %s3003_s24  }
 0x86b PF: > { %s5441_s16 = sld [smem:[#allocation35_spill]]  ;;  %s5442_s3 = sld [smem:[#allocation32_spill]] }
 0x86c   : > { %s5443_s4 = sld [smem:[#allocation38_spill]] }
 0x871   : > { %p4261_p11 = scmp.ge.s32.totalorder %s5441_s16, 2  ;;  %s3027_s13 = sand.u32 1, %s5442_s3  }
 0x872   : > { %p5444_p3 = scmp.ne.s32.totalorder %s5443_s4, 0  ;;  %s3028_s1 = scalar_lea.sflag [#allocation5], %s3027_s13 }
 0x874   : > { %p4234_p5 = pnand %p4261_p11, %p5444_p3 }
 0x876   : > { %4749 = dma.done.wait (!%p4234_p5), %s3028_s1, 16  }
 0x877   : > { %4751 = vsyncadd (!%p4234_p5), %s3028_s1, 4294967280  ;;  %s33_s30 = sadd.s32 1, %s5441_s16   ;;  %s5445_s20 = sld [smem:[#allocation33_spill]] }
 0x878   : > { %p30_p6 = scmp.ge.s32.totalorder %s33_s30, 4   ;;  %s5446_s27 = sld [smem:[#allocation39_spill]] }
 0x879   : > { %s5447_s28 = sld [smem:[#allocation34_spill]]  ;;  %s5448_s29 = sld [smem:[#allocation36_spill]] }
 0x87a   : > { %s5449_s25 = smov %s4758_s26  ;;  %32 = sbr.rel (!%p30_p6) target bundleno = 17 (0x11), region = 164 }
 0x87d   : > { %s5450_s26 = smov %s5445_s20 }
 0x881   :  { %3032 = vsyncpa [#allocation4], 1 }
 0x882   :  { %3034 = vsyncpa [#allocation4 + $0x1], 1 }
 0x883   :  { %3035 = vsyncpa [#allocation7], 1 }
 0x884   :  { %3036 = vsyncpa [#allocation10], 1 }
 0x885   :  { %3037 = vsyncpa [#allocation13], 1 }
 0x886   :  { %3038 = vsyncpa [#allocation16], 1 }
 0x887   :  { %3039 = vsyncpa [#allocation19], 1 }
 0x888   :  { %3040 = vsyncpa [#allocation22], 1 }
 0x889   :  { %3041 = vsyncpa [#allocation5], 1 }
 0x88a   :  { %3043 = vsyncpa [#allocation5 + $0x1], 1 }

</bundles_post_ra>
